<compile_context>
chip_gen: v5e
topology: v5e:2x2
jax: 0.10.0
libtpu: 0.0.40
codegen_flags: <defaults>
</compile_context>

<pallas_src>
import functools

import jax
import jax.numpy as jnp
from jax.experimental import pallas as pl
from jax.experimental.pallas import tpu as pltpu


# ----------------------------------------------------------------------------
# Hardware / sizing helpers.
# ----------------------------------------------------------------------------
def _vmem_capacity_bytes():
    try:
        return int(pltpu.get_tpu_info().vmem_capacity_bytes)
    except Exception:
        return 64 * 1024 * 1024          # conservative fallback (v7x per-core)


def _num_tensorcores():
    try:
        return max(1, int(getattr(jax.devices()[0], "num_cores", 1)))
    except Exception:
        return 1


def _vmem_bytes_estimate(Bt, Tc, D, H, L):
    """Rough per-core VMEM footprint for time chunk Tc and batch tile Bt."""
    bpe_c, bpe_f = 2, 4                  # bf16 matmul operands, f32 elsewhere
    w = 0
    d_in = D
    for _ in range(L):
        w += (d_in * 4 * H + H * 4 * H) * bpe_c + 4 * H * bpe_f   # 1-buffered
        d_in = H
    x_buf = 2 * Tc * Bt * D * bpe_c      # double-buffered input chunk (bf16)
    o_buf = 2 * Tc * Bt * H * bpe_f      # double-buffered output chunk (f32)
    gx = Tc * Bt * 4 * H * bpe_f         # hoisted gate-projection scratch
    state = 8 * L * Bt * H * bpe_f       # h/c scratch + h0/c0 + hn/cn blocks
    return w + x_buf + o_buf + gx + state


def _pick_time_chunk(T, Bt, D, H, L, vmem_budget):
    """Largest multiple-of-8 time chunk (<=128, <=round_up(T,8)) in budget."""
    cap = min(128, ((T + 7) // 8) * 8)
    tc = 8
    for cand in range(8, cap + 1, 8):
        if _vmem_bytes_estimate(Bt, cand, D, H, L) <= vmem_budget:
            tc = cand
    return tc


def _const_spec(shape, index_map, single_buffer):
    """BlockSpec for a grid-invariant operand (optionally single-buffered)."""
    if single_buffer:
        return pl.BlockSpec(shape, index_map, pipeline_mode=pl.Buffered(1))
    return pl.BlockSpec(shape, index_map)


# ----------------------------------------------------------------------------
# Fused multi-layer LSTM kernel.  Grid = (batch blocks [parallel],
# time chunks [arbitrary/sequential]).
# ----------------------------------------------------------------------------
def _fused_lstm_kernel(x_ref, h0_ref, c0_ref, *rest, num_layers, hidden, chunk,
                       batch_tile, seq_len, compute_dtype, time_unroll):
    """rest = 3*L weight refs (W_ih^T, W_hh^T, fused bias), then
       (out_ref, hn_ref, cn_ref, h_sc, c_sc, gx_sc)."""
    H, Tc, L, Bt = hidden, chunk, num_layers, batch_tile
    w_refs = rest[:3 * L]
    out_ref, hn_ref, cn_ref, h_sc, c_sc, gx_sc = rest[3 * L:]

    n = pl.program_id(1)                     # time-chunk axis (sequential)

    # Load the initial hidden / cell state on the first time chunk.
    @pl.when(n == 0)
    def _init():
        h_sc[...] = h0_ref[...]
        c_sc[...] = c0_ref[...]

    # sigmoid(z) = 0.5*tanh(0.5*z) + 0.5.  The 0.5 pre-scale on the i|f|o gate
    # columns is folded into the weights / bias on the wrapper side, so only
    # this post-affine remains (hoisted out of the time loop).  PyTorch gate
    # order along lanes: i | f | g | o, each H lanes wide.
    lane = jax.lax.broadcasted_iota(jnp.int32, (Bt, 4 * H), 1)
    is_g = (lane >= 2 * H) & (lane < 3 * H)
    post_scale = jnp.where(is_g, 1.0, 0.5).astype(jnp.float32)
    post_shift = jnp.where(is_g, 0.0, 0.5).astype(jnp.float32)

    needs_mask = (seq_len % Tc) != 0         # static: padded tail steps exist
    t_base = n * Tc

    for layer in range(L):                   # static Python loop, small L
        wih_ref, whh_ref, b_ref = w_refs[3 * layer:3 * layer + 3]

        # ---- Hoisted input projection: ONE matmul over the whole chunk -----
        # Rows are time-major (row = t*Bt + b).  For layers >= 1 the source is
        # the previous layer's output, still resident in the out VMEM block.
        src = (x_ref[0] if layer == 0 else out_ref[0]).astype(compute_dtype)
        gx_sc[...] = (jnp.dot(src, wih_ref[...],
                              preferred_element_type=jnp.float32)
                      + b_ref[...])          # fused, pre-scaled (b_ih + b_hh)

        whh = whh_ref[...]                   # (H, 4H) bf16, VMEM resident

        # ---- Serial recurrence over the chunk (latency-bound) --------------
        def step(t, carry):
            h, c = carry
            row = pl.multiple_of(t * Bt, Bt)
            gates = gx_sc[pl.ds(row, Bt), :] + jnp.dot(
                h.astype(compute_dtype), whh,
                preferred_element_type=jnp.float32)
            a = jnp.tanh(gates) * post_scale + post_shift
            i_g = a[:, 0 * H:1 * H]
            f_g = a[:, 1 * H:2 * H]
            g_g = a[:, 2 * H:3 * H]
            o_g = a[:, 3 * H:4 * H]
            c_n = f_g * c + i_g * g_g
            h_n = o_g * jnp.tanh(c_n)
            if needs_mask:                   # freeze state on padded steps
                valid = (t_base + t) < seq_len
                h_n = jnp.where(valid, h_n, h)
                c_n = jnp.where(valid, c_n, c)
            out_ref[0, pl.ds(row, Bt), :] = h_n
            return h_n, c_n

        h_f, c_f = jax.lax.fori_loop(0, Tc, step, (h_sc[layer], c_sc[layer]),
                                     unroll=time_unroll)
        h_sc[layer] = h_f
        c_sc[layer] = c_f

    # Emit final per-layer states after the last time chunk of this batch block.
    @pl.when(n == pl.num_programs(1) - 1)
    def _emit_final():
        hn_ref[...] = h_sc[...]
        cn_ref[...] = c_sc[...]


# ----------------------------------------------------------------------------
# WindowLSTM forward (whole stack in one pallas_call).
# ----------------------------------------------------------------------------
def window_lstm_forward(x, params, h0, c0, *, compute_dtype=jnp.bfloat16,
                        single_buffer_consts=True):
    """x: (B, T, D_in).  params: [(W_ih, W_hh, b_ih, b_hh)] per layer with
       PyTorch layouts W_ih:(4H, D_in), W_hh:(4H, H).  h0, c0: (L, B, H).
       Returns (output (B, T, H), hn (L, B, H), cn (L, B, H))."""
    assert x.ndim == 3
    B, T, D = x.shape
    L = len(params)
    H = params[0][1].shape[1]

    # --- Megacore batch split (only when each block keeps >= 8 rows) --------
    cores = _num_tensorcores()
    nb = cores if (cores > 1 and B % cores == 0 and (B // cores) % 8 == 0) else 1
    Bt = B // nb

    # --- Generation-aware time chunk / VMEM budgeting -----------------------
    vmem_cap = _vmem_capacity_bytes()
    Tc = _pick_time_chunk(T, Bt, D, H, L, int(vmem_cap * 0.7))
    T_pad = ((T + Tc - 1) // Tc) * Tc
    num_chunks = T_pad // Tc
    vmem_limit = int(min(vmem_cap,
                         max(2 * _vmem_bytes_estimate(Bt, Tc, D, H, L),
                             32 * 1024 * 1024)))

    # --- Input re-layout: bf16, pad T, time-major, flattened per batch block.
    xq = x.astype(compute_dtype)
    if T_pad != T:
        xq = jnp.pad(xq, ((0, 0), (0, T_pad - T), (0, 0)))
    x_flat = (xq.reshape(nb, Bt, T_pad, D)
                .transpose(0, 2, 1, 3)
                .reshape(nb, T_pad * Bt, D))          # row = t*Bt + b_local
    h0 = h0.astype(jnp.float32)
    c0 = c0.astype(jnp.float32)

    # --- Weights: transpose, fold fused bias and the 0.5 sigmoid pre-scale. -
    col = jnp.arange(4 * H)
    pre = jnp.where((col >= 2 * H) & (col < 3 * H), 1.0, 0.5).astype(jnp.float32)
    flat_w = []
    for (w_ih, w_hh, b_ih, b_hh) in params:
        flat_w += [
            (w_ih.T.astype(jnp.float32) * pre).astype(compute_dtype),  # (d_in,4H)
            (w_hh.T.astype(jnp.float32) * pre).astype(compute_dtype),  # (H,4H)
            ((b_ih + b_hh).astype(jnp.float32) * pre).reshape(1, 4 * H),
        ]

    kernel = functools.partial(
        _fused_lstm_kernel, num_layers=L, hidden=H, chunk=Tc, batch_tile=Bt,
        seq_len=T, compute_dtype=compute_dtype, time_unroll=8)

    def _build(single_buffer):
        in_specs = [
            pl.BlockSpec((1, Tc * Bt, D), lambda b, n: (b, n, 0)),  # x chunk
            _const_spec((L, Bt, H), lambda b, n: (0, b, 0),
                        single_buffer and nb == 1),                 # h0
            _const_spec((L, Bt, H), lambda b, n: (0, b, 0),
                        single_buffer and nb == 1),                 # c0
        ]
        for (w_ih, _, _, _) in params:
            d_in = w_ih.shape[1]
            in_specs += [
                _const_spec((d_in, 4 * H), lambda b, n: (0, 0), single_buffer),
                _const_spec((H, 4 * H), lambda b, n: (0, 0), single_buffer),
                _const_spec((1, 4 * H), lambda b, n: (0, 0), single_buffer),
            ]
        out_shape = (
            jax.ShapeDtypeStruct((nb, T_pad * Bt, H), jnp.float32),  # sequence
            jax.ShapeDtypeStruct((L, B, H), jnp.float32),            # hn
            jax.ShapeDtypeStruct((L, B, H), jnp.float32),            # cn
        )
        out_specs = [
            pl.BlockSpec((1, Tc * Bt, H), lambda b, n: (b, n, 0)),
            pl.BlockSpec((L, Bt, H), lambda b, n: (0, b, 0)),
            pl.BlockSpec((L, Bt, H), lambda b, n: (0, b, 0)),
        ]
        return pl.pallas_call(
            kernel,
            out_shape=out_shape,
            grid_spec=pltpu.PrefetchScalarGridSpec(
                num_scalar_prefetch=0,
                grid=(nb, num_chunks),               # time axis last = fastest
                in_specs=in_specs,
                out_specs=out_specs,
                scratch_shapes=[
                    pltpu.VMEM((L, Bt, H), jnp.float32),         # h carry
                    pltpu.VMEM((L, Bt, H), jnp.float32),         # c carry
                    pltpu.VMEM((Tc * Bt, 4 * H), jnp.float32),   # gate proj.
                ]),
            compiler_params=pltpu.CompilerParams(
                dimension_semantics=("parallel", "arbitrary"),
                vmem_limit_bytes=vmem_limit),
        )(x_flat, h0, c0, *flat_w)

    try:
        out_flat, hn, cn = _build(single_buffer_consts)
    except Exception:
        if not single_buffer_consts:
            raise
        # Fallback if this JAX build rejects pl.Buffered(1) single-buffering.
        out_flat, hn, cn = _build(False)

    out = (out_flat.reshape(nb, T_pad, Bt, H)
                   .transpose(0, 2, 1, 3)
                   .reshape(B, T_pad, H)[:, :T, :])
    return out, hn, cn


# ----------------------------------------------------------------------------
# Pure-JAX reference (for correctness checks).
# ----------------------------------------------------------------------------
def window_lstm_reference(x, params, h0, c0, matmul_dtype=None):
    """Step-by-step reference.  If matmul_dtype is given, matmul operands are
       cast to it (f32 accumulation), mirroring the kernel's bf16 matmuls."""
    seq = jnp.transpose(x, (1, 0, 2)).astype(jnp.float32)   # (T, B, D)
    hn_list, cn_list = [], []
    for l, (w_ih, w_hh, b_ih, b_hh) in enumerate(params):
        H = w_hh.shape[1]
        wih_t, whh_t = w_ih.T, w_hh.T
        if matmul_dtype is not None:
            wih_t = wih_t.astype(matmul_dtype)
            whh_t = whh_t.astype(matmul_dtype)
        bias = (b_ih + b_hh).astype(jnp.float32)
        h, c = h0[l], c0[l]
        outs = []
        for t in range(seq.shape[0]):
            xt, hh = seq[t], h
            if matmul_dtype is not None:
                xt, hh = xt.astype(matmul_dtype), hh.astype(matmul_dtype)
            gates = (jnp.dot(xt, wih_t, preferred_element_type=jnp.float32)
                     + jnp.dot(hh, whh_t, preferred_element_type=jnp.float32)
                     + bias)
            i = jax.nn.sigmoid(gates[:, 0 * H:1 * H])
            f = jax.nn.sigmoid(gates[:, 1 * H:2 * H])
            g = jnp.tanh(gates[:, 2 * H:3 * H])
            o = jax.nn.sigmoid(gates[:, 3 * H:4 * H])
            c = f * c + i * g
            h = o * jnp.tanh(c)
            outs.append(h)
        seq = jnp.stack(outs)
        hn_list.append(h)
        cn_list.append(c)
    return jnp.transpose(seq, (1, 0, 2)), jnp.stack(hn_list), jnp.stack(cn_list)


if __name__ == "__main__":
    # Module config (batch == num_layers so the original PyTorch code runs).
    input_dim, hidden_dim, num_layers = 16, 32, 2
    B, T = 2, 8

    key = jax.random.PRNGKey(0)
    k_x, k_h, k_c, k_p = jax.random.split(key, 4)

    x = jax.random.normal(k_x, (B, T, input_dim), dtype=jnp.float32)
    h0 = jax.random.normal(k_h, (num_layers, B, hidden_dim), dtype=jnp.float32)
    c0 = jax.random.normal(k_c, (num_layers, B, hidden_dim), dtype=jnp.float32)

    # Deterministic parameter init, PyTorch-style U(-1/sqrt(H), 1/sqrt(H)).
    bound = 1.0 / (hidden_dim ** 0.5)
    params = []
    for l in range(num_layers):
        d_in = input_dim if l == 0 else hidden_dim
        k_p, k1, k2, k3, k4 = jax.random.split(k_p, 5)
        w_ih = jax.random.uniform(k1, (4 * hidden_dim, d_in),
                                  minval=-bound, maxval=bound, dtype=jnp.float32)
        w_hh = jax.random.uniform(k2, (4 * hidden_dim, hidden_dim),
                                  minval=-bound, maxval=bound, dtype=jnp.float32)
        b_ih = jax.random.uniform(k3, (4 * hidden_dim,),
                                  minval=-bound, maxval=bound, dtype=jnp.float32)
        b_hh = jax.random.uniform(k4, (4 * hidden_dim,),
                                  minval=-bound, maxval=bound, dtype=jnp.float32)
        params.append((w_ih, w_hh, b_ih, b_hh))

    output, hn, cn = window_lstm_forward(x, params, h0, c0)
    jax.block_until_ready((output, hn, cn))

    assert output.shape == (B, T, hidden_dim)
    assert hn.shape == (num_layers, B, hidden_dim)
    assert cn.shape == (num_layers, B, hidden_dim)

    # Tight check vs a reference using the same bf16 matmul operands.
    ref_out, ref_hn, ref_cn = window_lstm_reference(
        x, params, h0, c0, matmul_dtype=jnp.bfloat16)
    assert jnp.allclose(output, ref_out, atol=2e-3, rtol=2e-3)
    assert jnp.allclose(hn, ref_hn, atol=2e-3, rtol=2e-3)
    assert jnp.allclose(cn, ref_cn, atol=2e-3, rtol=2e-3)

    # Loose sanity check vs the full-f32 reference (bf16 matmuls shift numerics).
    f32_out, f32_hn, f32_cn = window_lstm_reference(x, params, h0, c0)
    assert jnp.allclose(output, f32_out, atol=1e-1)
    assert jnp.allclose(hn, f32_hn, atol=1e-1)
    assert jnp.allclose(cn, f32_cn, atol=1e-1)

    print("KERNEL_OK")
</pallas_src>

<mosaic_0001>
module attributes {stable_mosaic.version = 11 : i64} {
  func.func @_fused_lstm_kernel(%arg0: i32, %arg1: i32, %arg2: memref<1x16x16xbf16, #tpu.memory_space<vmem>>, %arg3: memref<2x2x32xf32, #tpu.memory_space<vmem>>, %arg4: memref<2x2x32xf32, #tpu.memory_space<vmem>>, %arg5: memref<16x128xbf16, #tpu.memory_space<vmem>>, %arg6: memref<32x128xbf16, #tpu.memory_space<vmem>>, %arg7: memref<1x128xf32, #tpu.memory_space<vmem>>, %arg8: memref<32x128xbf16, #tpu.memory_space<vmem>>, %arg9: memref<32x128xbf16, #tpu.memory_space<vmem>>, %arg10: memref<1x128xf32, #tpu.memory_space<vmem>>, %arg11: memref<1x16x32xf32, #tpu.memory_space<vmem>>, %arg12: memref<2x2x32xf32, #tpu.memory_space<vmem>>, %arg13: memref<2x2x32xf32, #tpu.memory_space<vmem>>, %arg14: memref<2x2x32xf32, #tpu.memory_space<vmem>>, %arg15: memref<2x2x32xf32, #tpu.memory_space<vmem>>, %arg16: memref<16x128xf32, #tpu.memory_space<vmem>>) attributes {dimension_semantics = [#tpu.dimension_semantics<parallel>, #tpu.dimension_semantics<arbitrary>], iteration_bounds = array<i64: 1, 1>, scalar_prefetch = 0 : i64, scratch_operands = 3 : i64, tpu.core_type = #tpu.core_type<tc>, window_params = [{transform_indices = @transform_0, window_bounds = array<i64: 1, 16, 16>}, {pipeline_mode = #tpu.pipeline_mode<synchronous>, transform_indices = @transform_1, window_bounds = array<i64: 2, 2, 32>}, {pipeline_mode = #tpu.pipeline_mode<synchronous>, transform_indices = @transform_2, window_bounds = array<i64: 2, 2, 32>}, {pipeline_mode = #tpu.pipeline_mode<synchronous>, transform_indices = @transform_3, window_bounds = array<i64: 16, 128>}, {pipeline_mode = #tpu.pipeline_mode<synchronous>, transform_indices = @transform_4, window_bounds = array<i64: 32, 128>}, {pipeline_mode = #tpu.pipeline_mode<synchronous>, transform_indices = @transform_5, window_bounds = array<i64: 1, 128>}, {pipeline_mode = #tpu.pipeline_mode<synchronous>, transform_indices = @transform_6, window_bounds = array<i64: 32, 128>}, {pipeline_mode = #tpu.pipeline_mode<synchronous>, transform_indices = @transform_7, window_bounds = array<i64: 32, 128>}, {pipeline_mode = #tpu.pipeline_mode<synchronous>, transform_indices = @transform_8, window_bounds = array<i64: 1, 128>}, {transform_indices = @transform_9, window_bounds = array<i64: 1, 16, 32>}, {transform_indices = @transform_10, window_bounds = array<i64: 2, 2, 32>}, {transform_indices = @transform_11, window_bounds = array<i64: 2, 2, 32>}]} {
    %c0_i32 = arith.constant 0 : i32
    %0 = arith.cmpi eq, %arg1, %c0_i32 : i32
    %1 = arith.extui %0 : i1 to i32
    %c0_i32_0 = arith.constant 0 : i32
    %2 = arith.cmpi ne, %1, %c0_i32_0 : i32
    scf.if %2 {
      %c0_142 = arith.constant 0 : index
      %c0_143 = arith.constant 0 : index
      %c0_144 = arith.constant 0 : index
      %425 = vector.load %arg3[%c0_142, %c0_143, %c0_144] : memref<2x2x32xf32, #tpu.memory_space<vmem>>, vector<2x2x32xf32>
      %c0_145 = arith.constant 0 : index
      %c0_146 = arith.constant 0 : index
      %c0_147 = arith.constant 0 : index
      %426 = vector.load %arg14[%c0_145, %c0_146, %c0_147] : memref<2x2x32xf32, #tpu.memory_space<vmem>>, vector<2x2x32xf32>
      tpu.vector_store %arg14[%c0_145, %c0_146, %c0_147], %425 {strides = array<i32>} : memref<2x2x32xf32, #tpu.memory_space<vmem>>, vector<2x2x32xf32>,
      %c0_148 = arith.constant 0 : index
      %c0_149 = arith.constant 0 : index
      %c0_150 = arith.constant 0 : index
      %427 = vector.load %arg4[%c0_148, %c0_149, %c0_150] : memref<2x2x32xf32, #tpu.memory_space<vmem>>, vector<2x2x32xf32>
      %c0_151 = arith.constant 0 : index
      %c0_152 = arith.constant 0 : index
      %c0_153 = arith.constant 0 : index
      %428 = vector.load %arg15[%c0_151, %c0_152, %c0_153] : memref<2x2x32xf32, #tpu.memory_space<vmem>>, vector<2x2x32xf32>
      tpu.vector_store %arg15[%c0_151, %c0_152, %c0_153], %427 {strides = array<i32>} : memref<2x2x32xf32, #tpu.memory_space<vmem>>, vector<2x2x32xf32>,
    } else {
    }
    %3 = tpu.iota {dimensions = array<i32: 1>} : vector<2x128xi32>
    %c64_i32 = arith.constant 64 : i32
    %4 = vector.broadcast %c64_i32 : i32 to vector<2x128xi32>
    %5 = arith.cmpi sge, %3, %4 : vector<2x128xi32>
    %c96_i32 = arith.constant 96 : i32
    %6 = vector.broadcast %c96_i32 : i32 to vector<2x128xi32>
    %7 = arith.cmpi slt, %3, %6 : vector<2x128xi32>
    %8 = arith.andi %5, %7 : vector<2x128xi1>
    %cst = arith.constant 1.000000e+00 : f32
    %cst_1 = arith.constant 5.000000e-01 : f32
    %9 = vector.broadcast %cst : f32 to vector<2x128xf32>
    %10 = vector.broadcast %cst_1 : f32 to vector<2x128xf32>
    %11 = arith.select %8, %9, %10 : vector<2x128xi1>, vector<2x128xf32>
    %cst_2 = arith.constant 0.000000e+00 : f32
    %cst_3 = arith.constant 5.000000e-01 : f32
    %12 = vector.broadcast %cst_2 : f32 to vector<2x128xf32>
    %13 = vector.broadcast %cst_3 : f32 to vector<2x128xf32>
    %14 = arith.select %8, %12, %13 : vector<2x128xi1>, vector<2x128xf32>
    %c0 = arith.constant 0 : index
    %c0_4 = arith.constant 0 : index
    %c0_5 = arith.constant 0 : index
    %15 = vector.load %arg2[%c0, %c0_4, %c0_5] : memref<1x16x16xbf16, #tpu.memory_space<vmem>>, vector<1x16x16xbf16>
    %16 = vector.shape_cast %15 : vector<1x16x16xbf16> to vector<16x16xbf16>
    %c0_6 = arith.constant 0 : index
    %c0_7 = arith.constant 0 : index
    %17 = vector.load %arg5[%c0_6, %c0_7] : memref<16x128xbf16, #tpu.memory_space<vmem>>, vector<16x128xbf16>
    %cst_8 = arith.constant dense<0.000000e+00> : vector<16x128xf32>
    %18 = tpu.matmul %16, %17, %cst_8 {dimension_numbers = #tpu.dot_dimension_numbers<[1], [0], [0], [1], [0, 0, 1, 1], [], []>} : vector<16x16xbf16>, vector<16x128xbf16>, vector<16x128xf32> -> vector<16x128xf32>
    %c0_9 = arith.constant 0 : index
    %c0_10 = arith.constant 0 : index
    %19 = vector.load %arg7[%c0_9, %c0_10] : memref<1x128xf32, #tpu.memory_space<vmem>>, vector<1x128xf32>
    %20 = vector.broadcast %19 : vector<1x128xf32> to vector<16x128xf32>
    %21 = arith.addf %18, %20 : vector<16x128xf32>
    %c0_11 = arith.constant 0 : index
    %c0_12 = arith.constant 0 : index
    %22 = vector.load %arg16[%c0_11, %c0_12] : memref<16x128xf32, #tpu.memory_space<vmem>>, vector<16x128xf32>
    tpu.vector_store %arg16[%c0_11, %c0_12], %21 {strides = array<i32>} : memref<16x128xf32, #tpu.memory_space<vmem>>, vector<16x128xf32>,
    %c0_13 = arith.constant 0 : index
    %c0_14 = arith.constant 0 : index
    %23 = vector.load %arg6[%c0_13, %c0_14] : memref<32x128xbf16, #tpu.memory_space<vmem>>, vector<32x128xbf16>
    %c0_15 = arith.constant 0 : index
    %c0_16 = arith.constant 0 : index
    %c0_17 = arith.constant 0 : index
    %24 = vector.load %arg14[%c0_15, %c0_16, %c0_17] : memref<2x2x32xf32, #tpu.memory_space<vmem>>, vector<1x2x32xf32>
    %25 = vector.shape_cast %24 : vector<1x2x32xf32> to vector<2x32xf32>
    %c0_18 = arith.constant 0 : index
    %c0_19 = arith.constant 0 : index
    %c0_20 = arith.constant 0 : index
    %26 = vector.load %arg15[%c0_18, %c0_19, %c0_20] : memref<2x2x32xf32, #tpu.memory_space<vmem>>, vector<1x2x32xf32>
    %27 = vector.shape_cast %26 : vector<1x2x32xf32> to vector<2x32xf32>
    %c0_i32_21 = arith.constant 0 : i32
    %c2_i32 = arith.constant 2 : i32
    %28 = arith.muli %c0_i32_21, %c2_i32 : i32
    %29 = tpu.assume_multiple %28, 2 : i32
    %30 = arith.index_cast %29 : i32 to index
    %c0_22 = arith.constant 0 : index
    %31 = vector.load %arg16[%30, %c0_22] : memref<16x128xf32, #tpu.memory_space<vmem>>, vector<2x128xf32>
    %32 = arith.truncf %25 : vector<2x32xf32> to vector<2x32xbf16>
    %cst_23 = arith.constant dense<0.000000e+00> : vector<2x128xf32>
    %33 = tpu.matmul %32, %23, %cst_23 {dimension_numbers = #tpu.dot_dimension_numbers<[1], [0], [0], [1], [0, 0, 1, 1], [], []>} : vector<2x32xbf16>, vector<32x128xbf16>, vector<2x128xf32> -> vector<2x128xf32>
    %34 = arith.addf %31, %33 : vector<2x128xf32>
    %35 = math.tanh %34 : vector<2x128xf32>
    %36 = arith.mulf %35, %11 : vector<2x128xf32>
    %37 = arith.addf %36, %14 : vector<2x128xf32>
    %38 = vector.extract_strided_slice %37 {offsets = [0, 0], sizes = [2, 32], strides = [1, 1]} : vector<2x128xf32> to vector<2x32xf32>
    %39 = vector.extract_strided_slice %37 {offsets = [0, 32], sizes = [2, 32], strides = [1, 1]} : vector<2x128xf32> to vector<2x32xf32>
    %40 = vector.extract_strided_slice %37 {offsets = [0, 64], sizes = [2, 32], strides = [1, 1]} : vector<2x128xf32> to vector<2x32xf32>
    %41 = vector.extract_strided_slice %37 {offsets = [0, 96], sizes = [2, 32], strides = [1, 1]} : vector<2x128xf32> to vector<2x32xf32>
    %42 = arith.mulf %39, %27 : vector<2x32xf32>
    %43 = arith.mulf %38, %40 : vector<2x32xf32>
    %44 = arith.addf %42, %43 : vector<2x32xf32>
    %45 = math.tanh %44 : vector<2x32xf32>
    %46 = arith.mulf %41, %45 : vector<2x32xf32>
    %c0_24 = arith.constant 0 : index
    %47 = arith.index_cast %29 : i32 to index
    %c0_25 = arith.constant 0 : index
    %48 = vector.load %arg11[%c0_24, %47, %c0_25] : memref<1x16x32xf32, #tpu.memory_space<vmem>>, vector<1x2x32xf32>
    %49 = vector.shape_cast %48 : vector<1x2x32xf32> to vector<2x32xf32>
    %50 = vector.shape_cast %46 : vector<2x32xf32> to vector<1x2x32xf32>
    tpu.vector_store %arg11[%c0_24, %47, %c0_25], %50 {strides = array<i32>} : memref<1x16x32xf32, #tpu.memory_space<vmem>>, vector<1x2x32xf32>,
    %c1_i32 = arith.constant 1 : i32
    %c2_i32_26 = arith.constant 2 : i32
    %51 = arith.muli %c1_i32, %c2_i32_26 : i32
    %52 = tpu.assume_multiple %51, 2 : i32
    %53 = arith.index_cast %52 : i32 to index
    %c0_27 = arith.constant 0 : index
    %54 = vector.load %arg16[%53, %c0_27] : memref<16x128xf32, #tpu.memory_space<vmem>>, vector<2x128xf32>
    %55 = arith.truncf %46 : vector<2x32xf32> to vector<2x32xbf16>
    %cst_28 = arith.constant dense<0.000000e+00> : vector<2x128xf32>
    %56 = tpu.matmul %55, %23, %cst_28 {dimension_numbers = #tpu.dot_dimension_numbers<[1], [0], [0], [1], [0, 0, 1, 1], [], []>} : vector<2x32xbf16>, vector<32x128xbf16>, vector<2x128xf32> -> vector<2x128xf32>
    %57 = arith.addf %54, %56 : vector<2x128xf32>
    %58 = math.tanh %57 : vector<2x128xf32>
    %59 = arith.mulf %58, %11 : vector<2x128xf32>
    %60 = arith.addf %59, %14 : vector<2x128xf32>
    %61 = vector.extract_strided_slice %60 {offsets = [0, 0], sizes = [2, 32], strides = [1, 1]} : vector<2x128xf32> to vector<2x32xf32>
    %62 = vector.extract_strided_slice %60 {offsets = [0, 32], sizes = [2, 32], strides = [1, 1]} : vector<2x128xf32> to vector<2x32xf32>
    %63 = vector.extract_strided_slice %60 {offsets = [0, 64], sizes = [2, 32], strides = [1, 1]} : vector<2x128xf32> to vector<2x32xf32>
    %64 = vector.extract_strided_slice %60 {offsets = [0, 96], sizes = [2, 32], strides = [1, 1]} : vector<2x128xf32> to vector<2x32xf32>
    %65 = arith.mulf %62, %44 : vector<2x32xf32>
    %66 = arith.mulf %61, %63 : vector<2x32xf32>
    %67 = arith.addf %65, %66 : vector<2x32xf32>
    %68 = math.tanh %67 : vector<2x32xf32>
    %69 = arith.mulf %64, %68 : vector<2x32xf32>
    %c0_29 = arith.constant 0 : index
    %70 = arith.index_cast %52 : i32 to index
    %c0_30 = arith.constant 0 : index
    %71 = vector.load %arg11[%c0_29, %70, %c0_30] : memref<1x16x32xf32, #tpu.memory_space<vmem>>, vector<1x2x32xf32>
    %72 = vector.shape_cast %71 : vector<1x2x32xf32> to vector<2x32xf32>
    %73 = vector.shape_cast %69 : vector<2x32xf32> to vector<1x2x32xf32>
    tpu.vector_store %arg11[%c0_29, %70, %c0_30], %73 {strides = array<i32>} : memref<1x16x32xf32, #tpu.memory_space<vmem>>, vector<1x2x32xf32>,
    %c2_i32_31 = arith.constant 2 : i32
    %c2_i32_32 = arith.constant 2 : i32
    %74 = arith.muli %c2_i32_31, %c2_i32_32 : i32
    %75 = tpu.assume_multiple %74, 2 : i32
    %76 = arith.index_cast %75 : i32 to index
    %c0_33 = arith.constant 0 : index
    %77 = vector.load %arg16[%76, %c0_33] : memref<16x128xf32, #tpu.memory_space<vmem>>, vector<2x128xf32>
    %78 = arith.truncf %69 : vector<2x32xf32> to vector<2x32xbf16>
    %cst_34 = arith.constant dense<0.000000e+00> : vector<2x128xf32>
    %79 = tpu.matmul %78, %23, %cst_34 {dimension_numbers = #tpu.dot_dimension_numbers<[1], [0], [0], [1], [0, 0, 1, 1], [], []>} : vector<2x32xbf16>, vector<32x128xbf16>, vector<2x128xf32> -> vector<2x128xf32>
    %80 = arith.addf %77, %79 : vector<2x128xf32>
    %81 = math.tanh %80 : vector<2x128xf32>
    %82 = arith.mulf %81, %11 : vector<2x128xf32>
    %83 = arith.addf %82, %14 : vector<2x128xf32>
    %84 = vector.extract_strided_slice %83 {offsets = [0, 0], sizes = [2, 32], strides = [1, 1]} : vector<2x128xf32> to vector<2x32xf32>
    %85 = vector.extract_strided_slice %83 {offsets = [0, 32], sizes = [2, 32], strides = [1, 1]} : vector<2x128xf32> to vector<2x32xf32>
    %86 = vector.extract_strided_slice %83 {offsets = [0, 64], sizes = [2, 32], strides = [1, 1]} : vector<2x128xf32> to vector<2x32xf32>
    %87 = vector.extract_strided_slice %83 {offsets = [0, 96], sizes = [2, 32], strides = [1, 1]} : vector<2x128xf32> to vector<2x32xf32>
    %88 = arith.mulf %85, %67 : vector<2x32xf32>
    %89 = arith.mulf %84, %86 : vector<2x32xf32>
    %90 = arith.addf %88, %89 : vector<2x32xf32>
    %91 = math.tanh %90 : vector<2x32xf32>
    %92 = arith.mulf %87, %91 : vector<2x32xf32>
    %c0_35 = arith.constant 0 : index
    %93 = arith.index_cast %75 : i32 to index
    %c0_36 = arith.constant 0 : index
    %94 = vector.load %arg11[%c0_35, %93, %c0_36] : memref<1x16x32xf32, #tpu.memory_space<vmem>>, vector<1x2x32xf32>
    %95 = vector.shape_cast %94 : vector<1x2x32xf32> to vector<2x32xf32>
    %96 = vector.shape_cast %92 : vector<2x32xf32> to vector<1x2x32xf32>
    tpu.vector_store %arg11[%c0_35, %93, %c0_36], %96 {strides = array<i32>} : memref<1x16x32xf32, #tpu.memory_space<vmem>>, vector<1x2x32xf32>,
    %c3_i32 = arith.constant 3 : i32
    %c2_i32_37 = arith.constant 2 : i32
    %97 = arith.muli %c3_i32, %c2_i32_37 : i32
    %98 = tpu.assume_multiple %97, 2 : i32
    %99 = arith.index_cast %98 : i32 to index
    %c0_38 = arith.constant 0 : index
    %100 = vector.load %arg16[%99, %c0_38] : memref<16x128xf32, #tpu.memory_space<vmem>>, vector<2x128xf32>
    %101 = arith.truncf %92 : vector<2x32xf32> to vector<2x32xbf16>
    %cst_39 = arith.constant dense<0.000000e+00> : vector<2x128xf32>
    %102 = tpu.matmul %101, %23, %cst_39 {dimension_numbers = #tpu.dot_dimension_numbers<[1], [0], [0], [1], [0, 0, 1, 1], [], []>} : vector<2x32xbf16>, vector<32x128xbf16>, vector<2x128xf32> -> vector<2x128xf32>
    %103 = arith.addf %100, %102 : vector<2x128xf32>
    %104 = math.tanh %103 : vector<2x128xf32>
    %105 = arith.mulf %104, %11 : vector<2x128xf32>
    %106 = arith.addf %105, %14 : vector<2x128xf32>
    %107 = vector.extract_strided_slice %106 {offsets = [0, 0], sizes = [2, 32], strides = [1, 1]} : vector<2x128xf32> to vector<2x32xf32>
    %108 = vector.extract_strided_slice %106 {offsets = [0, 32], sizes = [2, 32], strides = [1, 1]} : vector<2x128xf32> to vector<2x32xf32>
    %109 = vector.extract_strided_slice %106 {offsets = [0, 64], sizes = [2, 32], strides = [1, 1]} : vector<2x128xf32> to vector<2x32xf32>
    %110 = vector.extract_strided_slice %106 {offsets = [0, 96], sizes = [2, 32], strides = [1, 1]} : vector<2x128xf32> to vector<2x32xf32>
    %111 = arith.mulf %108, %90 : vector<2x32xf32>
    %112 = arith.mulf %107, %109 : vector<2x32xf32>
    %113 = arith.addf %111, %112 : vector<2x32xf32>
    %114 = math.tanh %113 : vector<2x32xf32>
    %115 = arith.mulf %110, %114 : vector<2x32xf32>
    %c0_40 = arith.constant 0 : index
    %116 = arith.index_cast %98 : i32 to index
    %c0_41 = arith.constant 0 : index
    %117 = vector.load %arg11[%c0_40, %116, %c0_41] : memref<1x16x32xf32, #tpu.memory_space<vmem>>, vector<1x2x32xf32>
    %118 = vector.shape_cast %117 : vector<1x2x32xf32> to vector<2x32xf32>
    %119 = vector.shape_cast %115 : vector<2x32xf32> to vector<1x2x32xf32>
    tpu.vector_store %arg11[%c0_40, %116, %c0_41], %119 {strides = array<i32>} : memref<1x16x32xf32, #tpu.memory_space<vmem>>, vector<1x2x32xf32>,
    %c4_i32 = arith.constant 4 : i32
    %c2_i32_42 = arith.constant 2 : i32
    %120 = arith.muli %c4_i32, %c2_i32_42 : i32
    %121 = tpu.assume_multiple %120, 2 : i32
    %122 = arith.index_cast %121 : i32 to index
    %c0_43 = arith.constant 0 : index
    %123 = vector.load %arg16[%122, %c0_43] : memref<16x128xf32, #tpu.memory_space<vmem>>, vector<2x128xf32>
    %124 = arith.truncf %115 : vector<2x32xf32> to vector<2x32xbf16>
    %cst_44 = arith.constant dense<0.000000e+00> : vector<2x128xf32>
    %125 = tpu.matmul %124, %23, %cst_44 {dimension_numbers = #tpu.dot_dimension_numbers<[1], [0], [0], [1], [0, 0, 1, 1], [], []>} : vector<2x32xbf16>, vector<32x128xbf16>, vector<2x128xf32> -> vector<2x128xf32>
    %126 = arith.addf %123, %125 : vector<2x128xf32>
    %127 = math.tanh %126 : vector<2x128xf32>
    %128 = arith.mulf %127, %11 : vector<2x128xf32>
    %129 = arith.addf %128, %14 : vector<2x128xf32>
    %130 = vector.extract_strided_slice %129 {offsets = [0, 0], sizes = [2, 32], strides = [1, 1]} : vector<2x128xf32> to vector<2x32xf32>
    %131 = vector.extract_strided_slice %129 {offsets = [0, 32], sizes = [2, 32], strides = [1, 1]} : vector<2x128xf32> to vector<2x32xf32>
    %132 = vector.extract_strided_slice %129 {offsets = [0, 64], sizes = [2, 32], strides = [1, 1]} : vector<2x128xf32> to vector<2x32xf32>
    %133 = vector.extract_strided_slice %129 {offsets = [0, 96], sizes = [2, 32], strides = [1, 1]} : vector<2x128xf32> to vector<2x32xf32>
    %134 = arith.mulf %131, %113 : vector<2x32xf32>
    %135 = arith.mulf %130, %132 : vector<2x32xf32>
    %136 = arith.addf %134, %135 : vector<2x32xf32>
    %137 = math.tanh %136 : vector<2x32xf32>
    %138 = arith.mulf %133, %137 : vector<2x32xf32>
    %c0_45 = arith.constant 0 : index
    %139 = arith.index_cast %121 : i32 to index
    %c0_46 = arith.constant 0 : index
    %140 = vector.load %arg11[%c0_45, %139, %c0_46] : memref<1x16x32xf32, #tpu.memory_space<vmem>>, vector<1x2x32xf32>
    %141 = vector.shape_cast %140 : vector<1x2x32xf32> to vector<2x32xf32>
    %142 = vector.shape_cast %138 : vector<2x32xf32> to vector<1x2x32xf32>
    tpu.vector_store %arg11[%c0_45, %139, %c0_46], %142 {strides = array<i32>} : memref<1x16x32xf32, #tpu.memory_space<vmem>>, vector<1x2x32xf32>,
    %c5_i32 = arith.constant 5 : i32
    %c2_i32_47 = arith.constant 2 : i32
    %143 = arith.muli %c5_i32, %c2_i32_47 : i32
    %144 = tpu.assume_multiple %143, 2 : i32
    %145 = arith.index_cast %144 : i32 to index
    %c0_48 = arith.constant 0 : index
    %146 = vector.load %arg16[%145, %c0_48] : memref<16x128xf32, #tpu.memory_space<vmem>>, vector<2x128xf32>
    %147 = arith.truncf %138 : vector<2x32xf32> to vector<2x32xbf16>
    %cst_49 = arith.constant dense<0.000000e+00> : vector<2x128xf32>
    %148 = tpu.matmul %147, %23, %cst_49 {dimension_numbers = #tpu.dot_dimension_numbers<[1], [0], [0], [1], [0, 0, 1, 1], [], []>} : vector<2x32xbf16>, vector<32x128xbf16>, vector<2x128xf32> -> vector<2x128xf32>
    %149 = arith.addf %146, %148 : vector<2x128xf32>
    %150 = math.tanh %149 : vector<2x128xf32>
    %151 = arith.mulf %150, %11 : vector<2x128xf32>
    %152 = arith.addf %151, %14 : vector<2x128xf32>
    %153 = vector.extract_strided_slice %152 {offsets = [0, 0], sizes = [2, 32], strides = [1, 1]} : vector<2x128xf32> to vector<2x32xf32>
    %154 = vector.extract_strided_slice %152 {offsets = [0, 32], sizes = [2, 32], strides = [1, 1]} : vector<2x128xf32> to vector<2x32xf32>
    %155 = vector.extract_strided_slice %152 {offsets = [0, 64], sizes = [2, 32], strides = [1, 1]} : vector<2x128xf32> to vector<2x32xf32>
    %156 = vector.extract_strided_slice %152 {offsets = [0, 96], sizes = [2, 32], strides = [1, 1]} : vector<2x128xf32> to vector<2x32xf32>
    %157 = arith.mulf %154, %136 : vector<2x32xf32>
    %158 = arith.mulf %153, %155 : vector<2x32xf32>
    %159 = arith.addf %157, %158 : vector<2x32xf32>
    %160 = math.tanh %159 : vector<2x32xf32>
    %161 = arith.mulf %156, %160 : vector<2x32xf32>
    %c0_50 = arith.constant 0 : index
    %162 = arith.index_cast %144 : i32 to index
    %c0_51 = arith.constant 0 : index
    %163 = vector.load %arg11[%c0_50, %162, %c0_51] : memref<1x16x32xf32, #tpu.memory_space<vmem>>, vector<1x2x32xf32>
    %164 = vector.shape_cast %163 : vector<1x2x32xf32> to vector<2x32xf32>
    %165 = vector.shape_cast %161 : vector<2x32xf32> to vector<1x2x32xf32>
    tpu.vector_store %arg11[%c0_50, %162, %c0_51], %165 {strides = array<i32>} : memref<1x16x32xf32, #tpu.memory_space<vmem>>, vector<1x2x32xf32>,
    %c6_i32 = arith.constant 6 : i32
    %c2_i32_52 = arith.constant 2 : i32
    %166 = arith.muli %c6_i32, %c2_i32_52 : i32
    %167 = tpu.assume_multiple %166, 2 : i32
    %168 = arith.index_cast %167 : i32 to index
    %c0_53 = arith.constant 0 : index
    %169 = vector.load %arg16[%168, %c0_53] : memref<16x128xf32, #tpu.memory_space<vmem>>, vector<2x128xf32>
    %170 = arith.truncf %161 : vector<2x32xf32> to vector<2x32xbf16>
    %cst_54 = arith.constant dense<0.000000e+00> : vector<2x128xf32>
    %171 = tpu.matmul %170, %23, %cst_54 {dimension_numbers = #tpu.dot_dimension_numbers<[1], [0], [0], [1], [0, 0, 1, 1], [], []>} : vector<2x32xbf16>, vector<32x128xbf16>, vector<2x128xf32> -> vector<2x128xf32>
    %172 = arith.addf %169, %171 : vector<2x128xf32>
    %173 = math.tanh %172 : vector<2x128xf32>
    %174 = arith.mulf %173, %11 : vector<2x128xf32>
    %175 = arith.addf %174, %14 : vector<2x128xf32>
    %176 = vector.extract_strided_slice %175 {offsets = [0, 0], sizes = [2, 32], strides = [1, 1]} : vector<2x128xf32> to vector<2x32xf32>
    %177 = vector.extract_strided_slice %175 {offsets = [0, 32], sizes = [2, 32], strides = [1, 1]} : vector<2x128xf32> to vector<2x32xf32>
    %178 = vector.extract_strided_slice %175 {offsets = [0, 64], sizes = [2, 32], strides = [1, 1]} : vector<2x128xf32> to vector<2x32xf32>
    %179 = vector.extract_strided_slice %175 {offsets = [0, 96], sizes = [2, 32], strides = [1, 1]} : vector<2x128xf32> to vector<2x32xf32>
    %180 = arith.mulf %177, %159 : vector<2x32xf32>
    %181 = arith.mulf %176, %178 : vector<2x32xf32>
    %182 = arith.addf %180, %181 : vector<2x32xf32>
    %183 = math.tanh %182 : vector<2x32xf32>
    %184 = arith.mulf %179, %183 : vector<2x32xf32>
    %c0_55 = arith.constant 0 : index
    %185 = arith.index_cast %167 : i32 to index
    %c0_56 = arith.constant 0 : index
    %186 = vector.load %arg11[%c0_55, %185, %c0_56] : memref<1x16x32xf32, #tpu.memory_space<vmem>>, vector<1x2x32xf32>
    %187 = vector.shape_cast %186 : vector<1x2x32xf32> to vector<2x32xf32>
    %188 = vector.shape_cast %184 : vector<2x32xf32> to vector<1x2x32xf32>
    tpu.vector_store %arg11[%c0_55, %185, %c0_56], %188 {strides = array<i32>} : memref<1x16x32xf32, #tpu.memory_space<vmem>>, vector<1x2x32xf32>,
    %c7_i32 = arith.constant 7 : i32
    %c2_i32_57 = arith.constant 2 : i32
    %189 = arith.muli %c7_i32, %c2_i32_57 : i32
    %190 = tpu.assume_multiple %189, 2 : i32
    %191 = arith.index_cast %190 : i32 to index
    %c0_58 = arith.constant 0 : index
    %192 = vector.load %arg16[%191, %c0_58] : memref<16x128xf32, #tpu.memory_space<vmem>>, vector<2x128xf32>
    %193 = arith.truncf %184 : vector<2x32xf32> to vector<2x32xbf16>
    %cst_59 = arith.constant dense<0.000000e+00> : vector<2x128xf32>
    %194 = tpu.matmul %193, %23, %cst_59 {dimension_numbers = #tpu.dot_dimension_numbers<[1], [0], [0], [1], [0, 0, 1, 1], [], []>} : vector<2x32xbf16>, vector<32x128xbf16>, vector<2x128xf32> -> vector<2x128xf32>
    %195 = arith.addf %192, %194 : vector<2x128xf32>
    %196 = math.tanh %195 : vector<2x128xf32>
    %197 = arith.mulf %196, %11 : vector<2x128xf32>
    %198 = arith.addf %197, %14 : vector<2x128xf32>
    %199 = vector.extract_strided_slice %198 {offsets = [0, 0], sizes = [2, 32], strides = [1, 1]} : vector<2x128xf32> to vector<2x32xf32>
    %200 = vector.extract_strided_slice %198 {offsets = [0, 32], sizes = [2, 32], strides = [1, 1]} : vector<2x128xf32> to vector<2x32xf32>
    %201 = vector.extract_strided_slice %198 {offsets = [0, 64], sizes = [2, 32], strides = [1, 1]} : vector<2x128xf32> to vector<2x32xf32>
    %202 = vector.extract_strided_slice %198 {offsets = [0, 96], sizes = [2, 32], strides = [1, 1]} : vector<2x128xf32> to vector<2x32xf32>
    %203 = arith.mulf %200, %182 : vector<2x32xf32>
    %204 = arith.mulf %199, %201 : vector<2x32xf32>
    %205 = arith.addf %203, %204 : vector<2x32xf32>
    %206 = math.tanh %205 : vector<2x32xf32>
    %207 = arith.mulf %202, %206 : vector<2x32xf32>
    %c0_60 = arith.constant 0 : index
    %208 = arith.index_cast %190 : i32 to index
    %c0_61 = arith.constant 0 : index
    %209 = vector.load %arg11[%c0_60, %208, %c0_61] : memref<1x16x32xf32, #tpu.memory_space<vmem>>, vector<1x2x32xf32>
    %210 = vector.shape_cast %209 : vector<1x2x32xf32> to vector<2x32xf32>
    %211 = vector.shape_cast %207 : vector<2x32xf32> to vector<1x2x32xf32>
    tpu.vector_store %arg11[%c0_60, %208, %c0_61], %211 {strides = array<i32>} : memref<1x16x32xf32, #tpu.memory_space<vmem>>, vector<1x2x32xf32>,
    %c8_i32 = arith.constant 8 : i32
    %c0_62 = arith.constant 0 : index
    %c0_63 = arith.constant 0 : index
    %c0_64 = arith.constant 0 : index
    %212 = vector.load %arg14[%c0_62, %c0_63, %c0_64] : memref<2x2x32xf32, #tpu.memory_space<vmem>>, vector<1x2x32xf32>
    %213 = vector.shape_cast %212 : vector<1x2x32xf32> to vector<2x32xf32>
    %214 = vector.shape_cast %207 : vector<2x32xf32> to vector<1x2x32xf32>
    tpu.vector_store %arg14[%c0_62, %c0_63, %c0_64], %214 {strides = array<i32>} : memref<2x2x32xf32, #tpu.memory_space<vmem>>, vector<1x2x32xf32>,
    %c0_65 = arith.constant 0 : index
    %c0_66 = arith.constant 0 : index
    %c0_67 = arith.constant 0 : index
    %215 = vector.load %arg15[%c0_65, %c0_66, %c0_67] : memref<2x2x32xf32, #tpu.memory_space<vmem>>, vector<1x2x32xf32>
    %216 = vector.shape_cast %215 : vector<1x2x32xf32> to vector<2x32xf32>
    %217 = vector.shape_cast %205 : vector<2x32xf32> to vector<1x2x32xf32>
    tpu.vector_store %arg15[%c0_65, %c0_66, %c0_67], %217 {strides = array<i32>} : memref<2x2x32xf32, #tpu.memory_space<vmem>>, vector<1x2x32xf32>,
    %c0_68 = arith.constant 0 : index
    %c0_69 = arith.constant 0 : index
    %c0_70 = arith.constant 0 : index
    %218 = vector.load %arg11[%c0_68, %c0_69, %c0_70] : memref<1x16x32xf32, #tpu.memory_space<vmem>>, vector<1x16x32xf32>
    %219 = vector.shape_cast %218 : vector<1x16x32xf32> to vector<16x32xf32>
    %220 = arith.truncf %219 : vector<16x32xf32> to vector<16x32xbf16>
    %c0_71 = arith.constant 0 : index
    %c0_72 = arith.constant 0 : index
    %221 = vector.load %arg8[%c0_71, %c0_72] : memref<32x128xbf16, #tpu.memory_space<vmem>>, vector<32x128xbf16>
    %cst_73 = arith.constant dense<0.000000e+00> : vector<16x128xf32>
    %222 = tpu.matmul %220, %221, %cst_73 {dimension_numbers = #tpu.dot_dimension_numbers<[1], [0], [0], [1], [0, 0, 1, 1], [], []>} : vector<16x32xbf16>, vector<32x128xbf16>, vector<16x128xf32> -> vector<16x128xf32>
    %c0_74 = arith.constant 0 : index
    %c0_75 = arith.constant 0 : index
    %223 = vector.load %arg10[%c0_74, %c0_75] : memref<1x128xf32, #tpu.memory_space<vmem>>, vector<1x128xf32>
    %224 = vector.broadcast %223 : vector<1x128xf32> to vector<16x128xf32>
    %225 = arith.addf %222, %224 : vector<16x128xf32>
    %c0_76 = arith.constant 0 : index
    %c0_77 = arith.constant 0 : index
    %226 = vector.load %arg16[%c0_76, %c0_77] : memref<16x128xf32, #tpu.memory_space<vmem>>, vector<16x128xf32>
    tpu.vector_store %arg16[%c0_76, %c0_77], %225 {strides = array<i32>} : memref<16x128xf32, #tpu.memory_space<vmem>>, vector<16x128xf32>,
    %c0_78 = arith.constant 0 : index
    %c0_79 = arith.constant 0 : index
    %227 = vector.load %arg9[%c0_78, %c0_79] : memref<32x128xbf16, #tpu.memory_space<vmem>>, vector<32x128xbf16>
    %c1 = arith.constant 1 : index
    %c0_80 = arith.constant 0 : index
    %c0_81 = arith.constant 0 : index
    %228 = vector.load %arg14[%c1, %c0_80, %c0_81] : memref<2x2x32xf32, #tpu.memory_space<vmem>>, vector<1x2x32xf32>
    %229 = vector.shape_cast %228 : vector<1x2x32xf32> to vector<2x32xf32>
    %c1_82 = arith.constant 1 : index
    %c0_83 = arith.constant 0 : index
    %c0_84 = arith.constant 0 : index
    %230 = vector.load %arg15[%c1_82, %c0_83, %c0_84] : memref<2x2x32xf32, #tpu.memory_space<vmem>>, vector<1x2x32xf32>
    %231 = vector.shape_cast %230 : vector<1x2x32xf32> to vector<2x32xf32>
    %c0_i32_85 = arith.constant 0 : i32
    %c2_i32_86 = arith.constant 2 : i32
    %232 = arith.muli %c0_i32_85, %c2_i32_86 : i32
    %233 = tpu.assume_multiple %232, 2 : i32
    %234 = arith.index_cast %233 : i32 to index
    %c0_87 = arith.constant 0 : index
    %235 = vector.load %arg16[%234, %c0_87] : memref<16x128xf32, #tpu.memory_space<vmem>>, vector<2x128xf32>
    %236 = arith.truncf %229 : vector<2x32xf32> to vector<2x32xbf16>
    %cst_88 = arith.constant dense<0.000000e+00> : vector<2x128xf32>
    %237 = tpu.matmul %236, %227, %cst_88 {dimension_numbers = #tpu.dot_dimension_numbers<[1], [0], [0], [1], [0, 0, 1, 1], [], []>} : vector<2x32xbf16>, vector<32x128xbf16>, vector<2x128xf32> -> vector<2x128xf32>
    %238 = arith.addf %235, %237 : vector<2x128xf32>
    %239 = math.tanh %238 : vector<2x128xf32>
    %240 = arith.mulf %239, %11 : vector<2x128xf32>
    %241 = arith.addf %240, %14 : vector<2x128xf32>
    %242 = vector.extract_strided_slice %241 {offsets = [0, 0], sizes = [2, 32], strides = [1, 1]} : vector<2x128xf32> to vector<2x32xf32>
    %243 = vector.extract_strided_slice %241 {offsets = [0, 32], sizes = [2, 32], strides = [1, 1]} : vector<2x128xf32> to vector<2x32xf32>
    %244 = vector.extract_strided_slice %241 {offsets = [0, 64], sizes = [2, 32], strides = [1, 1]} : vector<2x128xf32> to vector<2x32xf32>
    %245 = vector.extract_strided_slice %241 {offsets = [0, 96], sizes = [2, 32], strides = [1, 1]} : vector<2x128xf32> to vector<2x32xf32>
    %246 = arith.mulf %243, %231 : vector<2x32xf32>
    %247 = arith.mulf %242, %244 : vector<2x32xf32>
    %248 = arith.addf %246, %247 : vector<2x32xf32>
    %249 = math.tanh %248 : vector<2x32xf32>
    %250 = arith.mulf %245, %249 : vector<2x32xf32>
    %c0_89 = arith.constant 0 : index
    %251 = arith.index_cast %233 : i32 to index
    %c0_90 = arith.constant 0 : index
    %252 = vector.load %arg11[%c0_89, %251, %c0_90] : memref<1x16x32xf32, #tpu.memory_space<vmem>>, vector<1x2x32xf32>
    %253 = vector.shape_cast %252 : vector<1x2x32xf32> to vector<2x32xf32>
    %254 = vector.shape_cast %250 : vector<2x32xf32> to vector<1x2x32xf32>
    tpu.vector_store %arg11[%c0_89, %251, %c0_90], %254 {strides = array<i32>} : memref<1x16x32xf32, #tpu.memory_space<vmem>>, vector<1x2x32xf32>,
    %c1_i32_91 = arith.constant 1 : i32
    %c2_i32_92 = arith.constant 2 : i32
    %255 = arith.muli %c1_i32_91, %c2_i32_92 : i32
    %256 = tpu.assume_multiple %255, 2 : i32
    %257 = arith.index_cast %256 : i32 to index
    %c0_93 = arith.constant 0 : index
    %258 = vector.load %arg16[%257, %c0_93] : memref<16x128xf32, #tpu.memory_space<vmem>>, vector<2x128xf32>
    %259 = arith.truncf %250 : vector<2x32xf32> to vector<2x32xbf16>
    %cst_94 = arith.constant dense<0.000000e+00> : vector<2x128xf32>
    %260 = tpu.matmul %259, %227, %cst_94 {dimension_numbers = #tpu.dot_dimension_numbers<[1], [0], [0], [1], [0, 0, 1, 1], [], []>} : vector<2x32xbf16>, vector<32x128xbf16>, vector<2x128xf32> -> vector<2x128xf32>
    %261 = arith.addf %258, %260 : vector<2x128xf32>
    %262 = math.tanh %261 : vector<2x128xf32>
    %263 = arith.mulf %262, %11 : vector<2x128xf32>
    %264 = arith.addf %263, %14 : vector<2x128xf32>
    %265 = vector.extract_strided_slice %264 {offsets = [0, 0], sizes = [2, 32], strides = [1, 1]} : vector<2x128xf32> to vector<2x32xf32>
    %266 = vector.extract_strided_slice %264 {offsets = [0, 32], sizes = [2, 32], strides = [1, 1]} : vector<2x128xf32> to vector<2x32xf32>
    %267 = vector.extract_strided_slice %264 {offsets = [0, 64], sizes = [2, 32], strides = [1, 1]} : vector<2x128xf32> to vector<2x32xf32>
    %268 = vector.extract_strided_slice %264 {offsets = [0, 96], sizes = [2, 32], strides = [1, 1]} : vector<2x128xf32> to vector<2x32xf32>
    %269 = arith.mulf %266, %248 : vector<2x32xf32>
    %270 = arith.mulf %265, %267 : vector<2x32xf32>
    %271 = arith.addf %269, %270 : vector<2x32xf32>
    %272 = math.tanh %271 : vector<2x32xf32>
    %273 = arith.mulf %268, %272 : vector<2x32xf32>
    %c0_95 = arith.constant 0 : index
    %274 = arith.index_cast %256 : i32 to index
    %c0_96 = arith.constant 0 : index
    %275 = vector.load %arg11[%c0_95, %274, %c0_96] : memref<1x16x32xf32, #tpu.memory_space<vmem>>, vector<1x2x32xf32>
    %276 = vector.shape_cast %275 : vector<1x2x32xf32> to vector<2x32xf32>
    %277 = vector.shape_cast %273 : vector<2x32xf32> to vector<1x2x32xf32>
    tpu.vector_store %arg11[%c0_95, %274, %c0_96], %277 {strides = array<i32>} : memref<1x16x32xf32, #tpu.memory_space<vmem>>, vector<1x2x32xf32>,
    %c2_i32_97 = arith.constant 2 : i32
    %c2_i32_98 = arith.constant 2 : i32
    %278 = arith.muli %c2_i32_97, %c2_i32_98 : i32
    %279 = tpu.assume_multiple %278, 2 : i32
    %280 = arith.index_cast %279 : i32 to index
    %c0_99 = arith.constant 0 : index
    %281 = vector.load %arg16[%280, %c0_99] : memref<16x128xf32, #tpu.memory_space<vmem>>, vector<2x128xf32>
    %282 = arith.truncf %273 : vector<2x32xf32> to vector<2x32xbf16>
    %cst_100 = arith.constant dense<0.000000e+00> : vector<2x128xf32>
    %283 = tpu.matmul %282, %227, %cst_100 {dimension_numbers = #tpu.dot_dimension_numbers<[1], [0], [0], [1], [0, 0, 1, 1], [], []>} : vector<2x32xbf16>, vector<32x128xbf16>, vector<2x128xf32> -> vector<2x128xf32>
    %284 = arith.addf %281, %283 : vector<2x128xf32>
    %285 = math.tanh %284 : vector<2x128xf32>
    %286 = arith.mulf %285, %11 : vector<2x128xf32>
    %287 = arith.addf %286, %14 : vector<2x128xf32>
    %288 = vector.extract_strided_slice %287 {offsets = [0, 0], sizes = [2, 32], strides = [1, 1]} : vector<2x128xf32> to vector<2x32xf32>
    %289 = vector.extract_strided_slice %287 {offsets = [0, 32], sizes = [2, 32], strides = [1, 1]} : vector<2x128xf32> to vector<2x32xf32>
    %290 = vector.extract_strided_slice %287 {offsets = [0, 64], sizes = [2, 32], strides = [1, 1]} : vector<2x128xf32> to vector<2x32xf32>
    %291 = vector.extract_strided_slice %287 {offsets = [0, 96], sizes = [2, 32], strides = [1, 1]} : vector<2x128xf32> to vector<2x32xf32>
    %292 = arith.mulf %289, %271 : vector<2x32xf32>
    %293 = arith.mulf %288, %290 : vector<2x32xf32>
    %294 = arith.addf %292, %293 : vector<2x32xf32>
    %295 = math.tanh %294 : vector<2x32xf32>
    %296 = arith.mulf %291, %295 : vector<2x32xf32>
    %c0_101 = arith.constant 0 : index
    %297 = arith.index_cast %279 : i32 to index
    %c0_102 = arith.constant 0 : index
    %298 = vector.load %arg11[%c0_101, %297, %c0_102] : memref<1x16x32xf32, #tpu.memory_space<vmem>>, vector<1x2x32xf32>
    %299 = vector.shape_cast %298 : vector<1x2x32xf32> to vector<2x32xf32>
    %300 = vector.shape_cast %296 : vector<2x32xf32> to vector<1x2x32xf32>
    tpu.vector_store %arg11[%c0_101, %297, %c0_102], %300 {strides = array<i32>} : memref<1x16x32xf32, #tpu.memory_space<vmem>>, vector<1x2x32xf32>,
    %c3_i32_103 = arith.constant 3 : i32
    %c2_i32_104 = arith.constant 2 : i32
    %301 = arith.muli %c3_i32_103, %c2_i32_104 : i32
    %302 = tpu.assume_multiple %301, 2 : i32
    %303 = arith.index_cast %302 : i32 to index
    %c0_105 = arith.constant 0 : index
    %304 = vector.load %arg16[%303, %c0_105] : memref<16x128xf32, #tpu.memory_space<vmem>>, vector<2x128xf32>
    %305 = arith.truncf %296 : vector<2x32xf32> to vector<2x32xbf16>
    %cst_106 = arith.constant dense<0.000000e+00> : vector<2x128xf32>
    %306 = tpu.matmul %305, %227, %cst_106 {dimension_numbers = #tpu.dot_dimension_numbers<[1], [0], [0], [1], [0, 0, 1, 1], [], []>} : vector<2x32xbf16>, vector<32x128xbf16>, vector<2x128xf32> -> vector<2x128xf32>
    %307 = arith.addf %304, %306 : vector<2x128xf32>
    %308 = math.tanh %307 : vector<2x128xf32>
    %309 = arith.mulf %308, %11 : vector<2x128xf32>
    %310 = arith.addf %309, %14 : vector<2x128xf32>
    %311 = vector.extract_strided_slice %310 {offsets = [0, 0], sizes = [2, 32], strides = [1, 1]} : vector<2x128xf32> to vector<2x32xf32>
    %312 = vector.extract_strided_slice %310 {offsets = [0, 32], sizes = [2, 32], strides = [1, 1]} : vector<2x128xf32> to vector<2x32xf32>
    %313 = vector.extract_strided_slice %310 {offsets = [0, 64], sizes = [2, 32], strides = [1, 1]} : vector<2x128xf32> to vector<2x32xf32>
    %314 = vector.extract_strided_slice %310 {offsets = [0, 96], sizes = [2, 32], strides = [1, 1]} : vector<2x128xf32> to vector<2x32xf32>
    %315 = arith.mulf %312, %294 : vector<2x32xf32>
    %316 = arith.mulf %311, %313 : vector<2x32xf32>
    %317 = arith.addf %315, %316 : vector<2x32xf32>
    %318 = math.tanh %317 : vector<2x32xf32>
    %319 = arith.mulf %314, %318 : vector<2x32xf32>
    %c0_107 = arith.constant 0 : index
    %320 = arith.index_cast %302 : i32 to index
    %c0_108 = arith.constant 0 : index
    %321 = vector.load %arg11[%c0_107, %320, %c0_108] : memref<1x16x32xf32, #tpu.memory_space<vmem>>, vector<1x2x32xf32>
    %322 = vector.shape_cast %321 : vector<1x2x32xf32> to vector<2x32xf32>
    %323 = vector.shape_cast %319 : vector<2x32xf32> to vector<1x2x32xf32>
    tpu.vector_store %arg11[%c0_107, %320, %c0_108], %323 {strides = array<i32>} : memref<1x16x32xf32, #tpu.memory_space<vmem>>, vector<1x2x32xf32>,
    %c4_i32_109 = arith.constant 4 : i32
    %c2_i32_110 = arith.constant 2 : i32
    %324 = arith.muli %c4_i32_109, %c2_i32_110 : i32
    %325 = tpu.assume_multiple %324, 2 : i32
    %326 = arith.index_cast %325 : i32 to index
    %c0_111 = arith.constant 0 : index
    %327 = vector.load %arg16[%326, %c0_111] : memref<16x128xf32, #tpu.memory_space<vmem>>, vector<2x128xf32>
    %328 = arith.truncf %319 : vector<2x32xf32> to vector<2x32xbf16>
    %cst_112 = arith.constant dense<0.000000e+00> : vector<2x128xf32>
    %329 = tpu.matmul %328, %227, %cst_112 {dimension_numbers = #tpu.dot_dimension_numbers<[1], [0], [0], [1], [0, 0, 1, 1], [], []>} : vector<2x32xbf16>, vector<32x128xbf16>, vector<2x128xf32> -> vector<2x128xf32>
    %330 = arith.addf %327, %329 : vector<2x128xf32>
    %331 = math.tanh %330 : vector<2x128xf32>
    %332 = arith.mulf %331, %11 : vector<2x128xf32>
    %333 = arith.addf %332, %14 : vector<2x128xf32>
    %334 = vector.extract_strided_slice %333 {offsets = [0, 0], sizes = [2, 32], strides = [1, 1]} : vector<2x128xf32> to vector<2x32xf32>
    %335 = vector.extract_strided_slice %333 {offsets = [0, 32], sizes = [2, 32], strides = [1, 1]} : vector<2x128xf32> to vector<2x32xf32>
    %336 = vector.extract_strided_slice %333 {offsets = [0, 64], sizes = [2, 32], strides = [1, 1]} : vector<2x128xf32> to vector<2x32xf32>
    %337 = vector.extract_strided_slice %333 {offsets = [0, 96], sizes = [2, 32], strides = [1, 1]} : vector<2x128xf32> to vector<2x32xf32>
    %338 = arith.mulf %335, %317 : vector<2x32xf32>
    %339 = arith.mulf %334, %336 : vector<2x32xf32>
    %340 = arith.addf %338, %339 : vector<2x32xf32>
    %341 = math.tanh %340 : vector<2x32xf32>
    %342 = arith.mulf %337, %341 : vector<2x32xf32>
    %c0_113 = arith.constant 0 : index
    %343 = arith.index_cast %325 : i32 to index
    %c0_114 = arith.constant 0 : index
    %344 = vector.load %arg11[%c0_113, %343, %c0_114] : memref<1x16x32xf32, #tpu.memory_space<vmem>>, vector<1x2x32xf32>
    %345 = vector.shape_cast %344 : vector<1x2x32xf32> to vector<2x32xf32>
    %346 = vector.shape_cast %342 : vector<2x32xf32> to vector<1x2x32xf32>
    tpu.vector_store %arg11[%c0_113, %343, %c0_114], %346 {strides = array<i32>} : memref<1x16x32xf32, #tpu.memory_space<vmem>>, vector<1x2x32xf32>,
    %c5_i32_115 = arith.constant 5 : i32
    %c2_i32_116 = arith.constant 2 : i32
    %347 = arith.muli %c5_i32_115, %c2_i32_116 : i32
    %348 = tpu.assume_multiple %347, 2 : i32
    %349 = arith.index_cast %348 : i32 to index
    %c0_117 = arith.constant 0 : index
    %350 = vector.load %arg16[%349, %c0_117] : memref<16x128xf32, #tpu.memory_space<vmem>>, vector<2x128xf32>
    %351 = arith.truncf %342 : vector<2x32xf32> to vector<2x32xbf16>
    %cst_118 = arith.constant dense<0.000000e+00> : vector<2x128xf32>
    %352 = tpu.matmul %351, %227, %cst_118 {dimension_numbers = #tpu.dot_dimension_numbers<[1], [0], [0], [1], [0, 0, 1, 1], [], []>} : vector<2x32xbf16>, vector<32x128xbf16>, vector<2x128xf32> -> vector<2x128xf32>
    %353 = arith.addf %350, %352 : vector<2x128xf32>
    %354 = math.tanh %353 : vector<2x128xf32>
    %355 = arith.mulf %354, %11 : vector<2x128xf32>
    %356 = arith.addf %355, %14 : vector<2x128xf32>
    %357 = vector.extract_strided_slice %356 {offsets = [0, 0], sizes = [2, 32], strides = [1, 1]} : vector<2x128xf32> to vector<2x32xf32>
    %358 = vector.extract_strided_slice %356 {offsets = [0, 32], sizes = [2, 32], strides = [1, 1]} : vector<2x128xf32> to vector<2x32xf32>
    %359 = vector.extract_strided_slice %356 {offsets = [0, 64], sizes = [2, 32], strides = [1, 1]} : vector<2x128xf32> to vector<2x32xf32>
    %360 = vector.extract_strided_slice %356 {offsets = [0, 96], sizes = [2, 32], strides = [1, 1]} : vector<2x128xf32> to vector<2x32xf32>
    %361 = arith.mulf %358, %340 : vector<2x32xf32>
    %362 = arith.mulf %357, %359 : vector<2x32xf32>
    %363 = arith.addf %361, %362 : vector<2x32xf32>
    %364 = math.tanh %363 : vector<2x32xf32>
    %365 = arith.mulf %360, %364 : vector<2x32xf32>
    %c0_119 = arith.constant 0 : index
    %366 = arith.index_cast %348 : i32 to index
    %c0_120 = arith.constant 0 : index
    %367 = vector.load %arg11[%c0_119, %366, %c0_120] : memref<1x16x32xf32, #tpu.memory_space<vmem>>, vector<1x2x32xf32>
    %368 = vector.shape_cast %367 : vector<1x2x32xf32> to vector<2x32xf32>
    %369 = vector.shape_cast %365 : vector<2x32xf32> to vector<1x2x32xf32>
    tpu.vector_store %arg11[%c0_119, %366, %c0_120], %369 {strides = array<i32>} : memref<1x16x32xf32, #tpu.memory_space<vmem>>, vector<1x2x32xf32>,
    %c6_i32_121 = arith.constant 6 : i32
    %c2_i32_122 = arith.constant 2 : i32
    %370 = arith.muli %c6_i32_121, %c2_i32_122 : i32
    %371 = tpu.assume_multiple %370, 2 : i32
    %372 = arith.index_cast %371 : i32 to index
    %c0_123 = arith.constant 0 : index
    %373 = vector.load %arg16[%372, %c0_123] : memref<16x128xf32, #tpu.memory_space<vmem>>, vector<2x128xf32>
    %374 = arith.truncf %365 : vector<2x32xf32> to vector<2x32xbf16>
    %cst_124 = arith.constant dense<0.000000e+00> : vector<2x128xf32>
    %375 = tpu.matmul %374, %227, %cst_124 {dimension_numbers = #tpu.dot_dimension_numbers<[1], [0], [0], [1], [0, 0, 1, 1], [], []>} : vector<2x32xbf16>, vector<32x128xbf16>, vector<2x128xf32> -> vector<2x128xf32>
    %376 = arith.addf %373, %375 : vector<2x128xf32>
    %377 = math.tanh %376 : vector<2x128xf32>
    %378 = arith.mulf %377, %11 : vector<2x128xf32>
    %379 = arith.addf %378, %14 : vector<2x128xf32>
    %380 = vector.extract_strided_slice %379 {offsets = [0, 0], sizes = [2, 32], strides = [1, 1]} : vector<2x128xf32> to vector<2x32xf32>
    %381 = vector.extract_strided_slice %379 {offsets = [0, 32], sizes = [2, 32], strides = [1, 1]} : vector<2x128xf32> to vector<2x32xf32>
    %382 = vector.extract_strided_slice %379 {offsets = [0, 64], sizes = [2, 32], strides = [1, 1]} : vector<2x128xf32> to vector<2x32xf32>
    %383 = vector.extract_strided_slice %379 {offsets = [0, 96], sizes = [2, 32], strides = [1, 1]} : vector<2x128xf32> to vector<2x32xf32>
    %384 = arith.mulf %381, %363 : vector<2x32xf32>
    %385 = arith.mulf %380, %382 : vector<2x32xf32>
    %386 = arith.addf %384, %385 : vector<2x32xf32>
    %387 = math.tanh %386 : vector<2x32xf32>
    %388 = arith.mulf %383, %387 : vector<2x32xf32>
    %c0_125 = arith.constant 0 : index
    %389 = arith.index_cast %371 : i32 to index
    %c0_126 = arith.constant 0 : index
    %390 = vector.load %arg11[%c0_125, %389, %c0_126] : memref<1x16x32xf32, #tpu.memory_space<vmem>>, vector<1x2x32xf32>
    %391 = vector.shape_cast %390 : vector<1x2x32xf32> to vector<2x32xf32>
    %392 = vector.shape_cast %388 : vector<2x32xf32> to vector<1x2x32xf32>
    tpu.vector_store %arg11[%c0_125, %389, %c0_126], %392 {strides = array<i32>} : memref<1x16x32xf32, #tpu.memory_space<vmem>>, vector<1x2x32xf32>,
    %c7_i32_127 = arith.constant 7 : i32
    %c2_i32_128 = arith.constant 2 : i32
    %393 = arith.muli %c7_i32_127, %c2_i32_128 : i32
    %394 = tpu.assume_multiple %393, 2 : i32
    %395 = arith.index_cast %394 : i32 to index
    %c0_129 = arith.constant 0 : index
    %396 = vector.load %arg16[%395, %c0_129] : memref<16x128xf32, #tpu.memory_space<vmem>>, vector<2x128xf32>
    %397 = arith.truncf %388 : vector<2x32xf32> to vector<2x32xbf16>
    %cst_130 = arith.constant dense<0.000000e+00> : vector<2x128xf32>
    %398 = tpu.matmul %397, %227, %cst_130 {dimension_numbers = #tpu.dot_dimension_numbers<[1], [0], [0], [1], [0, 0, 1, 1], [], []>} : vector<2x32xbf16>, vector<32x128xbf16>, vector<2x128xf32> -> vector<2x128xf32>
    %399 = arith.addf %396, %398 : vector<2x128xf32>
    %400 = math.tanh %399 : vector<2x128xf32>
    %401 = arith.mulf %400, %11 : vector<2x128xf32>
    %402 = arith.addf %401, %14 : vector<2x128xf32>
    %403 = vector.extract_strided_slice %402 {offsets = [0, 0], sizes = [2, 32], strides = [1, 1]} : vector<2x128xf32> to vector<2x32xf32>
    %404 = vector.extract_strided_slice %402 {offsets = [0, 32], sizes = [2, 32], strides = [1, 1]} : vector<2x128xf32> to vector<2x32xf32>
    %405 = vector.extract_strided_slice %402 {offsets = [0, 64], sizes = [2, 32], strides = [1, 1]} : vector<2x128xf32> to vector<2x32xf32>
    %406 = vector.extract_strided_slice %402 {offsets = [0, 96], sizes = [2, 32], strides = [1, 1]} : vector<2x128xf32> to vector<2x32xf32>
    %407 = arith.mulf %404, %386 : vector<2x32xf32>
    %408 = arith.mulf %403, %405 : vector<2x32xf32>
    %409 = arith.addf %407, %408 : vector<2x32xf32>
    %410 = math.tanh %409 : vector<2x32xf32>
    %411 = arith.mulf %406, %410 : vector<2x32xf32>
    %c0_131 = arith.constant 0 : index
    %412 = arith.index_cast %394 : i32 to index
    %c0_132 = arith.constant 0 : index
    %413 = vector.load %arg11[%c0_131, %412, %c0_132] : memref<1x16x32xf32, #tpu.memory_space<vmem>>, vector<1x2x32xf32>
    %414 = vector.shape_cast %413 : vector<1x2x32xf32> to vector<2x32xf32>
    %415 = vector.shape_cast %411 : vector<2x32xf32> to vector<1x2x32xf32>
    tpu.vector_store %arg11[%c0_131, %412, %c0_132], %415 {strides = array<i32>} : memref<1x16x32xf32, #tpu.memory_space<vmem>>, vector<1x2x32xf32>,
    %c8_i32_133 = arith.constant 8 : i32
    %c1_134 = arith.constant 1 : index
    %c0_135 = arith.constant 0 : index
    %c0_136 = arith.constant 0 : index
    %416 = vector.load %arg14[%c1_134, %c0_135, %c0_136] : memref<2x2x32xf32, #tpu.memory_space<vmem>>, vector<1x2x32xf32>
    %417 = vector.shape_cast %416 : vector<1x2x32xf32> to vector<2x32xf32>
    %418 = vector.shape_cast %411 : vector<2x32xf32> to vector<1x2x32xf32>
    tpu.vector_store %arg14[%c1_134, %c0_135, %c0_136], %418 {strides = array<i32>} : memref<2x2x32xf32, #tpu.memory_space<vmem>>, vector<1x2x32xf32>,
    %c1_137 = arith.constant 1 : index
    %c0_138 = arith.constant 0 : index
    %c0_139 = arith.constant 0 : index
    %419 = vector.load %arg15[%c1_137, %c0_138, %c0_139] : memref<2x2x32xf32, #tpu.memory_space<vmem>>, vector<1x2x32xf32>
    %420 = vector.shape_cast %419 : vector<1x2x32xf32> to vector<2x32xf32>
    %421 = vector.shape_cast %409 : vector<2x32xf32> to vector<1x2x32xf32>
    tpu.vector_store %arg15[%c1_137, %c0_138, %c0_139], %421 {strides = array<i32>} : memref<2x2x32xf32, #tpu.memory_space<vmem>>, vector<1x2x32xf32>,
    %c0_i32_140 = arith.constant 0 : i32
    %422 = arith.cmpi eq, %arg1, %c0_i32_140 : i32
    %423 = arith.extui %422 : i1 to i32
    %c0_i32_141 = arith.constant 0 : i32
    %424 = arith.cmpi ne, %423, %c0_i32_141 : i32
    scf.if %424 {
      %c0_142 = arith.constant 0 : index
      %c0_143 = arith.constant 0 : index
      %c0_144 = arith.constant 0 : index
      %425 = vector.load %arg14[%c0_142, %c0_143, %c0_144] : memref<2x2x32xf32, #tpu.memory_space<vmem>>, vector<2x2x32xf32>
      %c0_145 = arith.constant 0 : index
      %c0_146 = arith.constant 0 : index
      %c0_147 = arith.constant 0 : index
      %426 = vector.load %arg12[%c0_145, %c0_146, %c0_147] : memref<2x2x32xf32, #tpu.memory_space<vmem>>, vector<2x2x32xf32>
      tpu.vector_store %arg12[%c0_145, %c0_146, %c0_147], %425 {strides = array<i32>} : memref<2x2x32xf32, #tpu.memory_space<vmem>>, vector<2x2x32xf32>,
      %c0_148 = arith.constant 0 : index
      %c0_149 = arith.constant 0 : index
      %c0_150 = arith.constant 0 : index
      %427 = vector.load %arg15[%c0_148, %c0_149, %c0_150] : memref<2x2x32xf32, #tpu.memory_space<vmem>>, vector<2x2x32xf32>
      %c0_151 = arith.constant 0 : index
      %c0_152 = arith.constant 0 : index
      %c0_153 = arith.constant 0 : index
      %428 = vector.load %arg13[%c0_151, %c0_152, %c0_153] : memref<2x2x32xf32, #tpu.memory_space<vmem>>, vector<2x2x32xf32>
      tpu.vector_store %arg13[%c0_151, %c0_152, %c0_153], %427 {strides = array<i32>} : memref<2x2x32xf32, #tpu.memory_space<vmem>>, vector<2x2x32xf32>,
    } else {
    }
    return
  }
  func.func @transform_0(%arg0: i32, %arg1: i32) -> (i32, i32, i32) {
    %c0_i32 = arith.constant 0 : i32
    %c0_i32_0 = arith.constant 0 : i32
    return %arg0, %arg1, %c0_i32 : i32, i32, i32
  }
  func.func @transform_1(%arg0: i32, %arg1: i32) -> (i32, i32, i32) {
    %c0_i32 = arith.constant 0 : i32
    %c0_i32_0 = arith.constant 0 : i32
    %c0_i32_1 = arith.constant 0 : i32
    return %c0_i32, %arg0, %c0_i32_0 : i32, i32, i32
  }
  func.func @transform_2(%arg0: i32, %arg1: i32) -> (i32, i32, i32) {
    %c0_i32 = arith.constant 0 : i32
    %c0_i32_0 = arith.constant 0 : i32
    %c0_i32_1 = arith.constant 0 : i32
    return %c0_i32, %arg0, %c0_i32_0 : i32, i32, i32
  }
  func.func @transform_3(%arg0: i32, %arg1: i32) -> (i32, i32) {
    %c0_i32 = arith.constant 0 : i32
    %c0_i32_0 = arith.constant 0 : i32
    %c0_i32_1 = arith.constant 0 : i32
    return %c0_i32, %c0_i32_0 : i32, i32
  }
  func.func @transform_4(%arg0: i32, %arg1: i32) -> (i32, i32) {
    %c0_i32 = arith.constant 0 : i32
    %c0_i32_0 = arith.constant 0 : i32
    %c0_i32_1 = arith.constant 0 : i32
    return %c0_i32, %c0_i32_0 : i32, i32
  }
  func.func @transform_5(%arg0: i32, %arg1: i32) -> (i32, i32) {
    %c0_i32 = arith.constant 0 : i32
    %c0_i32_0 = arith.constant 0 : i32
    %c0_i32_1 = arith.constant 0 : i32
    return %c0_i32, %c0_i32_0 : i32, i32
  }
  func.func @transform_6(%arg0: i32, %arg1: i32) -> (i32, i32) {
    %c0_i32 = arith.constant 0 : i32
    %c0_i32_0 = arith.constant 0 : i32
    %c0_i32_1 = arith.constant 0 : i32
    return %c0_i32, %c0_i32_0 : i32, i32
  }
  func.func @transform_7(%arg0: i32, %arg1: i32) -> (i32, i32) {
    %c0_i32 = arith.constant 0 : i32
    %c0_i32_0 = arith.constant 0 : i32
    %c0_i32_1 = arith.constant 0 : i32
    return %c0_i32, %c0_i32_0 : i32, i32
  }
  func.func @transform_8(%arg0: i32, %arg1: i32) -> (i32, i32) {
    %c0_i32 = arith.constant 0 : i32
    %c0_i32_0 = arith.constant 0 : i32
    %c0_i32_1 = arith.constant 0 : i32
    return %c0_i32, %c0_i32_0 : i32, i32
  }
  func.func @transform_9(%arg0: i32, %arg1: i32) -> (i32, i32, i32) {
    %c0_i32 = arith.constant 0 : i32
    %c0_i32_0 = arith.constant 0 : i32
    return %arg0, %arg1, %c0_i32 : i32, i32, i32
  }
  func.func @transform_10(%arg0: i32, %arg1: i32) -> (i32, i32, i32) {
    %c0_i32 = arith.constant 0 : i32
    %c0_i32_0 = arith.constant 0 : i32
    %c0_i32_1 = arith.constant 0 : i32
    return %c0_i32, %arg0, %c0_i32_0 : i32, i32, i32
  }
  func.func @transform_11(%arg0: i32, %arg1: i32) -> (i32, i32, i32) {
    %c0_i32 = arith.constant 0 : i32
    %c0_i32_0 = arith.constant 0 : i32
    %c0_i32_1 = arith.constant 0 : i32
    return %c0_i32, %arg0, %c0_i32_0 : i32, i32, i32
  }
}

module attributes {stable_mosaic.version = 11 : i64} {
  func.func @_fused_lstm_kernel(%arg0: i32, %arg1: i32, %arg2: memref<1x16x16xbf16, #tpu.memory_space<vmem>>, %arg3: memref<2x2x32xf32, #tpu.memory_space<vmem>>, %arg4: memref<2x2x32xf32, #tpu.memory_space<vmem>>, %arg5: memref<16x128xbf16, #tpu.memory_space<vmem>>, %arg6: memref<32x128xbf16, #tpu.memory_space<vmem>>, %arg7: memref<1x128xf32, #tpu.memory_space<vmem>>, %arg8: memref<32x128xbf16, #tpu.memory_space<vmem>>, %arg9: memref<32x128xbf16, #tpu.memory_space<vmem>>, %arg10: memref<1x128xf32, #tpu.memory_space<vmem>>, %arg11: memref<1x16x32xf32, #tpu.memory_space<vmem>>, %arg12: memref<2x2x32xf32, #tpu.memory_space<vmem>>, %arg13: memref<2x2x32xf32, #tpu.memory_space<vmem>>, %arg14: memref<2x2x32xf32, #tpu.memory_space<vmem>>, %arg15: memref<2x2x32xf32, #tpu.memory_space<vmem>>, %arg16: memref<16x128xf32, #tpu.memory_space<vmem>>) attributes {dimension_semantics = [#tpu.dimension_semantics<parallel>, #tpu.dimension_semantics<arbitrary>], iteration_bounds = array<i64: 1, 1>, scalar_prefetch = 0 : i64, scratch_operands = 3 : i64, tpu.core_type = #tpu.core_type<tc>, window_params = [{transform_indices = @transform_0, window_bounds = array<i64: 1, 16, 16>}, {transform_indices = @transform_1, window_bounds = array<i64: 2, 2, 32>}, {transform_indices = @transform_2, window_bounds = array<i64: 2, 2, 32>}, {pipeline_mode = #tpu.pipeline_mode<synchronous>, transform_indices = @transform_3, window_bounds = array<i64: 16, 128>}, {pipeline_mode = #tpu.pipeline_mode<synchronous>, transform_indices = @transform_4, window_bounds = array<i64: 32, 128>}, {pipeline_mode = #tpu.pipeline_mode<synchronous>, transform_indices = @transform_5, window_bounds = array<i64: 1, 128>}, {pipeline_mode = #tpu.pipeline_mode<synchronous>, transform_indices = @transform_6, window_bounds = array<i64: 32, 128>}, {pipeline_mode = #tpu.pipeline_mode<synchronous>, transform_indices = @transform_7, window_bounds = array<i64: 32, 128>}, {pipeline_mode = #tpu.pipeline_mode<synchronous>, transform_indices = @transform_8, window_bounds = array<i64: 1, 128>}, {transform_indices = @transform_9, window_bounds = array<i64: 1, 16, 32>}, {transform_indices = @transform_10, window_bounds = array<i64: 2, 2, 32>}, {transform_indices = @transform_11, window_bounds = array<i64: 2, 2, 32>}]} {
    %c0_i32 = arith.constant 0 : i32
    %0 = arith.cmpi eq, %arg1, %c0_i32 : i32
    %1 = arith.extui %0 : i1 to i32
    %c0_i32_0 = arith.constant 0 : i32
    %2 = arith.cmpi ne, %1, %c0_i32_0 : i32
    scf.if %2 {
      %c0_142 = arith.constant 0 : index
      %c0_143 = arith.constant 0 : index
      %c0_144 = arith.constant 0 : index
      %425 = vector.load %arg3[%c0_142, %c0_143, %c0_144] : memref<2x2x32xf32, #tpu.memory_space<vmem>>, vector<2x2x32xf32>
      %c0_145 = arith.constant 0 : index
      %c0_146 = arith.constant 0 : index
      %c0_147 = arith.constant 0 : index
      %426 = vector.load %arg14[%c0_145, %c0_146, %c0_147] : memref<2x2x32xf32, #tpu.memory_space<vmem>>, vector<2x2x32xf32>
      tpu.vector_store %arg14[%c0_145, %c0_146, %c0_147], %425 {strides = array<i32>} : memref<2x2x32xf32, #tpu.memory_space<vmem>>, vector<2x2x32xf32>,
      %c0_148 = arith.constant 0 : index
      %c0_149 = arith.constant 0 : index
      %c0_150 = arith.constant 0 : index
      %427 = vector.load %arg4[%c0_148, %c0_149, %c0_150] : memref<2x2x32xf32, #tpu.memory_space<vmem>>, vector<2x2x32xf32>
      %c0_151 = arith.constant 0 : index
      %c0_152 = arith.constant 0 : index
      %c0_153 = arith.constant 0 : index
      %428 = vector.load %arg15[%c0_151, %c0_152, %c0_153] : memref<2x2x32xf32, #tpu.memory_space<vmem>>, vector<2x2x32xf32>
      tpu.vector_store %arg15[%c0_151, %c0_152, %c0_153], %427 {strides = array<i32>} : memref<2x2x32xf32, #tpu.memory_space<vmem>>, vector<2x2x32xf32>,
    } else {
    }
    %3 = tpu.iota {dimensions = array<i32: 1>} : vector<2x128xi32>
    %c64_i32 = arith.constant 64 : i32
    %4 = vector.broadcast %c64_i32 : i32 to vector<2x128xi32>
    %5 = arith.cmpi sge, %3, %4 : vector<2x128xi32>
    %c96_i32 = arith.constant 96 : i32
    %6 = vector.broadcast %c96_i32 : i32 to vector<2x128xi32>
    %7 = arith.cmpi slt, %3, %6 : vector<2x128xi32>
    %8 = arith.andi %5, %7 : vector<2x128xi1>
    %cst = arith.constant 1.000000e+00 : f32
    %cst_1 = arith.constant 5.000000e-01 : f32
    %9 = vector.broadcast %cst : f32 to vector<2x128xf32>
    %10 = vector.broadcast %cst_1 : f32 to vector<2x128xf32>
    %11 = arith.select %8, %9, %10 : vector<2x128xi1>, vector<2x128xf32>
    %cst_2 = arith.constant 0.000000e+00 : f32
    %cst_3 = arith.constant 5.000000e-01 : f32
    %12 = vector.broadcast %cst_2 : f32 to vector<2x128xf32>
    %13 = vector.broadcast %cst_3 : f32 to vector<2x128xf32>
    %14 = arith.select %8, %12, %13 : vector<2x128xi1>, vector<2x128xf32>
    %c0 = arith.constant 0 : index
    %c0_4 = arith.constant 0 : index
    %c0_5 = arith.constant 0 : index
    %15 = vector.load %arg2[%c0, %c0_4, %c0_5] : memref<1x16x16xbf16, #tpu.memory_space<vmem>>, vector<1x16x16xbf16>
    %16 = vector.shape_cast %15 : vector<1x16x16xbf16> to vector<16x16xbf16>
    %c0_6 = arith.constant 0 : index
    %c0_7 = arith.constant 0 : index
    %17 = vector.load %arg5[%c0_6, %c0_7] : memref<16x128xbf16, #tpu.memory_space<vmem>>, vector<16x128xbf16>
    %cst_8 = arith.constant dense<0.000000e+00> : vector<16x128xf32>
    %18 = tpu.matmul %16, %17, %cst_8 {dimension_numbers = #tpu.dot_dimension_numbers<[1], [0], [0], [1], [0, 0, 1, 1], [], []>} : vector<16x16xbf16>, vector<16x128xbf16>, vector<16x128xf32> -> vector<16x128xf32>
    %c0_9 = arith.constant 0 : index
    %c0_10 = arith.constant 0 : index
    %19 = vector.load %arg7[%c0_9, %c0_10] : memref<1x128xf32, #tpu.memory_space<vmem>>, vector<1x128xf32>
    %20 = vector.broadcast %19 : vector<1x128xf32> to vector<16x128xf32>
    %21 = arith.addf %18, %20 : vector<16x128xf32>
    %c0_11 = arith.constant 0 : index
    %c0_12 = arith.constant 0 : index
    %22 = vector.load %arg16[%c0_11, %c0_12] : memref<16x128xf32, #tpu.memory_space<vmem>>, vector<16x128xf32>
    tpu.vector_store %arg16[%c0_11, %c0_12], %21 {strides = array<i32>} : memref<16x128xf32, #tpu.memory_space<vmem>>, vector<16x128xf32>,
    %c0_13 = arith.constant 0 : index
    %c0_14 = arith.constant 0 : index
    %23 = vector.load %arg6[%c0_13, %c0_14] : memref<32x128xbf16, #tpu.memory_space<vmem>>, vector<32x128xbf16>
    %c0_15 = arith.constant 0 : index
    %c0_16 = arith.constant 0 : index
    %c0_17 = arith.constant 0 : index
    %24 = vector.load %arg14[%c0_15, %c0_16, %c0_17] : memref<2x2x32xf32, #tpu.memory_space<vmem>>, vector<1x2x32xf32>
    %25 = vector.shape_cast %24 : vector<1x2x32xf32> to vector<2x32xf32>
    %c0_18 = arith.constant 0 : index
    %c0_19 = arith.constant 0 : index
    %c0_20 = arith.constant 0 : index
    %26 = vector.load %arg15[%c0_18, %c0_19, %c0_20] : memref<2x2x32xf32, #tpu.memory_space<vmem>>, vector<1x2x32xf32>
    %27 = vector.shape_cast %26 : vector<1x2x32xf32> to vector<2x32xf32>
    %c0_i32_21 = arith.constant 0 : i32
    %c2_i32 = arith.constant 2 : i32
    %28 = arith.muli %c0_i32_21, %c2_i32 : i32
    %29 = tpu.assume_multiple %28, 2 : i32
    %30 = arith.index_cast %29 : i32 to index
    %c0_22 = arith.constant 0 : index
    %31 = vector.load %arg16[%30, %c0_22] : memref<16x128xf32, #tpu.memory_space<vmem>>, vector<2x128xf32>
    %32 = arith.truncf %25 : vector<2x32xf32> to vector<2x32xbf16>
    %cst_23 = arith.constant dense<0.000000e+00> : vector<2x128xf32>
    %33 = tpu.matmul %32, %23, %cst_23 {dimension_numbers = #tpu.dot_dimension_numbers<[1], [0], [0], [1], [0, 0, 1, 1], [], []>} : vector<2x32xbf16>, vector<32x128xbf16>, vector<2x128xf32> -> vector<2x128xf32>
    %34 = arith.addf %31, %33 : vector<2x128xf32>
    %35 = math.tanh %34 : vector<2x128xf32>
    %36 = arith.mulf %35, %11 : vector<2x128xf32>
    %37 = arith.addf %36, %14 : vector<2x128xf32>
    %38 = vector.extract_strided_slice %37 {offsets = [0, 0], sizes = [2, 32], strides = [1, 1]} : vector<2x128xf32> to vector<2x32xf32>
    %39 = vector.extract_strided_slice %37 {offsets = [0, 32], sizes = [2, 32], strides = [1, 1]} : vector<2x128xf32> to vector<2x32xf32>
    %40 = vector.extract_strided_slice %37 {offsets = [0, 64], sizes = [2, 32], strides = [1, 1]} : vector<2x128xf32> to vector<2x32xf32>
    %41 = vector.extract_strided_slice %37 {offsets = [0, 96], sizes = [2, 32], strides = [1, 1]} : vector<2x128xf32> to vector<2x32xf32>
    %42 = arith.mulf %39, %27 : vector<2x32xf32>
    %43 = arith.mulf %38, %40 : vector<2x32xf32>
    %44 = arith.addf %42, %43 : vector<2x32xf32>
    %45 = math.tanh %44 : vector<2x32xf32>
    %46 = arith.mulf %41, %45 : vector<2x32xf32>
    %c0_24 = arith.constant 0 : index
    %47 = arith.index_cast %29 : i32 to index
    %c0_25 = arith.constant 0 : index
    %48 = vector.load %arg11[%c0_24, %47, %c0_25] : memref<1x16x32xf32, #tpu.memory_space<vmem>>, vector<1x2x32xf32>
    %49 = vector.shape_cast %48 : vector<1x2x32xf32> to vector<2x32xf32>
    %50 = vector.shape_cast %46 : vector<2x32xf32> to vector<1x2x32xf32>
    tpu.vector_store %arg11[%c0_24, %47, %c0_25], %50 {strides = array<i32>} : memref<1x16x32xf32, #tpu.memory_space<vmem>>, vector<1x2x32xf32>,
    %c1_i32 = arith.constant 1 : i32
    %c2_i32_26 = arith.constant 2 : i32
    %51 = arith.muli %c1_i32, %c2_i32_26 : i32
    %52 = tpu.assume_multiple %51, 2 : i32
    %53 = arith.index_cast %52 : i32 to index
    %c0_27 = arith.constant 0 : index
    %54 = vector.load %arg16[%53, %c0_27] : memref<16x128xf32, #tpu.memory_space<vmem>>, vector<2x128xf32>
    %55 = arith.truncf %46 : vector<2x32xf32> to vector<2x32xbf16>
    %cst_28 = arith.constant dense<0.000000e+00> : vector<2x128xf32>
    %56 = tpu.matmul %55, %23, %cst_28 {dimension_numbers = #tpu.dot_dimension_numbers<[1], [0], [0], [1], [0, 0, 1, 1], [], []>} : vector<2x32xbf16>, vector<32x128xbf16>, vector<2x128xf32> -> vector<2x128xf32>
    %57 = arith.addf %54, %56 : vector<2x128xf32>
    %58 = math.tanh %57 : vector<2x128xf32>
    %59 = arith.mulf %58, %11 : vector<2x128xf32>
    %60 = arith.addf %59, %14 : vector<2x128xf32>
    %61 = vector.extract_strided_slice %60 {offsets = [0, 0], sizes = [2, 32], strides = [1, 1]} : vector<2x128xf32> to vector<2x32xf32>
    %62 = vector.extract_strided_slice %60 {offsets = [0, 32], sizes = [2, 32], strides = [1, 1]} : vector<2x128xf32> to vector<2x32xf32>
    %63 = vector.extract_strided_slice %60 {offsets = [0, 64], sizes = [2, 32], strides = [1, 1]} : vector<2x128xf32> to vector<2x32xf32>
    %64 = vector.extract_strided_slice %60 {offsets = [0, 96], sizes = [2, 32], strides = [1, 1]} : vector<2x128xf32> to vector<2x32xf32>
    %65 = arith.mulf %62, %44 : vector<2x32xf32>
    %66 = arith.mulf %61, %63 : vector<2x32xf32>
    %67 = arith.addf %65, %66 : vector<2x32xf32>
    %68 = math.tanh %67 : vector<2x32xf32>
    %69 = arith.mulf %64, %68 : vector<2x32xf32>
    %c0_29 = arith.constant 0 : index
    %70 = arith.index_cast %52 : i32 to index
    %c0_30 = arith.constant 0 : index
    %71 = vector.load %arg11[%c0_29, %70, %c0_30] : memref<1x16x32xf32, #tpu.memory_space<vmem>>, vector<1x2x32xf32>
    %72 = vector.shape_cast %71 : vector<1x2x32xf32> to vector<2x32xf32>
    %73 = vector.shape_cast %69 : vector<2x32xf32> to vector<1x2x32xf32>
    tpu.vector_store %arg11[%c0_29, %70, %c0_30], %73 {strides = array<i32>} : memref<1x16x32xf32, #tpu.memory_space<vmem>>, vector<1x2x32xf32>,
    %c2_i32_31 = arith.constant 2 : i32
    %c2_i32_32 = arith.constant 2 : i32
    %74 = arith.muli %c2_i32_31, %c2_i32_32 : i32
    %75 = tpu.assume_multiple %74, 2 : i32
    %76 = arith.index_cast %75 : i32 to index
    %c0_33 = arith.constant 0 : index
    %77 = vector.load %arg16[%76, %c0_33] : memref<16x128xf32, #tpu.memory_space<vmem>>, vector<2x128xf32>
    %78 = arith.truncf %69 : vector<2x32xf32> to vector<2x32xbf16>
    %cst_34 = arith.constant dense<0.000000e+00> : vector<2x128xf32>
    %79 = tpu.matmul %78, %23, %cst_34 {dimension_numbers = #tpu.dot_dimension_numbers<[1], [0], [0], [1], [0, 0, 1, 1], [], []>} : vector<2x32xbf16>, vector<32x128xbf16>, vector<2x128xf32> -> vector<2x128xf32>
    %80 = arith.addf %77, %79 : vector<2x128xf32>
    %81 = math.tanh %80 : vector<2x128xf32>
    %82 = arith.mulf %81, %11 : vector<2x128xf32>
    %83 = arith.addf %82, %14 : vector<2x128xf32>
    %84 = vector.extract_strided_slice %83 {offsets = [0, 0], sizes = [2, 32], strides = [1, 1]} : vector<2x128xf32> to vector<2x32xf32>
    %85 = vector.extract_strided_slice %83 {offsets = [0, 32], sizes = [2, 32], strides = [1, 1]} : vector<2x128xf32> to vector<2x32xf32>
    %86 = vector.extract_strided_slice %83 {offsets = [0, 64], sizes = [2, 32], strides = [1, 1]} : vector<2x128xf32> to vector<2x32xf32>
    %87 = vector.extract_strided_slice %83 {offsets = [0, 96], sizes = [2, 32], strides = [1, 1]} : vector<2x128xf32> to vector<2x32xf32>
    %88 = arith.mulf %85, %67 : vector<2x32xf32>
    %89 = arith.mulf %84, %86 : vector<2x32xf32>
    %90 = arith.addf %88, %89 : vector<2x32xf32>
    %91 = math.tanh %90 : vector<2x32xf32>
    %92 = arith.mulf %87, %91 : vector<2x32xf32>
    %c0_35 = arith.constant 0 : index
    %93 = arith.index_cast %75 : i32 to index
    %c0_36 = arith.constant 0 : index
    %94 = vector.load %arg11[%c0_35, %93, %c0_36] : memref<1x16x32xf32, #tpu.memory_space<vmem>>, vector<1x2x32xf32>
    %95 = vector.shape_cast %94 : vector<1x2x32xf32> to vector<2x32xf32>
    %96 = vector.shape_cast %92 : vector<2x32xf32> to vector<1x2x32xf32>
    tpu.vector_store %arg11[%c0_35, %93, %c0_36], %96 {strides = array<i32>} : memref<1x16x32xf32, #tpu.memory_space<vmem>>, vector<1x2x32xf32>,
    %c3_i32 = arith.constant 3 : i32
    %c2_i32_37 = arith.constant 2 : i32
    %97 = arith.muli %c3_i32, %c2_i32_37 : i32
    %98 = tpu.assume_multiple %97, 2 : i32
    %99 = arith.index_cast %98 : i32 to index
    %c0_38 = arith.constant 0 : index
    %100 = vector.load %arg16[%99, %c0_38] : memref<16x128xf32, #tpu.memory_space<vmem>>, vector<2x128xf32>
    %101 = arith.truncf %92 : vector<2x32xf32> to vector<2x32xbf16>
    %cst_39 = arith.constant dense<0.000000e+00> : vector<2x128xf32>
    %102 = tpu.matmul %101, %23, %cst_39 {dimension_numbers = #tpu.dot_dimension_numbers<[1], [0], [0], [1], [0, 0, 1, 1], [], []>} : vector<2x32xbf16>, vector<32x128xbf16>, vector<2x128xf32> -> vector<2x128xf32>
    %103 = arith.addf %100, %102 : vector<2x128xf32>
    %104 = math.tanh %103 : vector<2x128xf32>
    %105 = arith.mulf %104, %11 : vector<2x128xf32>
    %106 = arith.addf %105, %14 : vector<2x128xf32>
    %107 = vector.extract_strided_slice %106 {offsets = [0, 0], sizes = [2, 32], strides = [1, 1]} : vector<2x128xf32> to vector<2x32xf32>
    %108 = vector.extract_strided_slice %106 {offsets = [0, 32], sizes = [2, 32], strides = [1, 1]} : vector<2x128xf32> to vector<2x32xf32>
    %109 = vector.extract_strided_slice %106 {offsets = [0, 64], sizes = [2, 32], strides = [1, 1]} : vector<2x128xf32> to vector<2x32xf32>
    %110 = vector.extract_strided_slice %106 {offsets = [0, 96], sizes = [2, 32], strides = [1, 1]} : vector<2x128xf32> to vector<2x32xf32>
    %111 = arith.mulf %108, %90 : vector<2x32xf32>
    %112 = arith.mulf %107, %109 : vector<2x32xf32>
    %113 = arith.addf %111, %112 : vector<2x32xf32>
    %114 = math.tanh %113 : vector<2x32xf32>
    %115 = arith.mulf %110, %114 : vector<2x32xf32>
    %c0_40 = arith.constant 0 : index
    %116 = arith.index_cast %98 : i32 to index
    %c0_41 = arith.constant 0 : index
    %117 = vector.load %arg11[%c0_40, %116, %c0_41] : memref<1x16x32xf32, #tpu.memory_space<vmem>>, vector<1x2x32xf32>
    %118 = vector.shape_cast %117 : vector<1x2x32xf32> to vector<2x32xf32>
    %119 = vector.shape_cast %115 : vector<2x32xf32> to vector<1x2x32xf32>
    tpu.vector_store %arg11[%c0_40, %116, %c0_41], %119 {strides = array<i32>} : memref<1x16x32xf32, #tpu.memory_space<vmem>>, vector<1x2x32xf32>,
    %c4_i32 = arith.constant 4 : i32
    %c2_i32_42 = arith.constant 2 : i32
    %120 = arith.muli %c4_i32, %c2_i32_42 : i32
    %121 = tpu.assume_multiple %120, 2 : i32
    %122 = arith.index_cast %121 : i32 to index
    %c0_43 = arith.constant 0 : index
    %123 = vector.load %arg16[%122, %c0_43] : memref<16x128xf32, #tpu.memory_space<vmem>>, vector<2x128xf32>
    %124 = arith.truncf %115 : vector<2x32xf32> to vector<2x32xbf16>
    %cst_44 = arith.constant dense<0.000000e+00> : vector<2x128xf32>
    %125 = tpu.matmul %124, %23, %cst_44 {dimension_numbers = #tpu.dot_dimension_numbers<[1], [0], [0], [1], [0, 0, 1, 1], [], []>} : vector<2x32xbf16>, vector<32x128xbf16>, vector<2x128xf32> -> vector<2x128xf32>
    %126 = arith.addf %123, %125 : vector<2x128xf32>
    %127 = math.tanh %126 : vector<2x128xf32>
    %128 = arith.mulf %127, %11 : vector<2x128xf32>
    %129 = arith.addf %128, %14 : vector<2x128xf32>
    %130 = vector.extract_strided_slice %129 {offsets = [0, 0], sizes = [2, 32], strides = [1, 1]} : vector<2x128xf32> to vector<2x32xf32>
    %131 = vector.extract_strided_slice %129 {offsets = [0, 32], sizes = [2, 32], strides = [1, 1]} : vector<2x128xf32> to vector<2x32xf32>
    %132 = vector.extract_strided_slice %129 {offsets = [0, 64], sizes = [2, 32], strides = [1, 1]} : vector<2x128xf32> to vector<2x32xf32>
    %133 = vector.extract_strided_slice %129 {offsets = [0, 96], sizes = [2, 32], strides = [1, 1]} : vector<2x128xf32> to vector<2x32xf32>
    %134 = arith.mulf %131, %113 : vector<2x32xf32>
    %135 = arith.mulf %130, %132 : vector<2x32xf32>
    %136 = arith.addf %134, %135 : vector<2x32xf32>
    %137 = math.tanh %136 : vector<2x32xf32>
    %138 = arith.mulf %133, %137 : vector<2x32xf32>
    %c0_45 = arith.constant 0 : index
    %139 = arith.index_cast %121 : i32 to index
    %c0_46 = arith.constant 0 : index
    %140 = vector.load %arg11[%c0_45, %139, %c0_46] : memref<1x16x32xf32, #tpu.memory_space<vmem>>, vector<1x2x32xf32>
    %141 = vector.shape_cast %140 : vector<1x2x32xf32> to vector<2x32xf32>
    %142 = vector.shape_cast %138 : vector<2x32xf32> to vector<1x2x32xf32>
    tpu.vector_store %arg11[%c0_45, %139, %c0_46], %142 {strides = array<i32>} : memref<1x16x32xf32, #tpu.memory_space<vmem>>, vector<1x2x32xf32>,
    %c5_i32 = arith.constant 5 : i32
    %c2_i32_47 = arith.constant 2 : i32
    %143 = arith.muli %c5_i32, %c2_i32_47 : i32
    %144 = tpu.assume_multiple %143, 2 : i32
    %145 = arith.index_cast %144 : i32 to index
    %c0_48 = arith.constant 0 : index
    %146 = vector.load %arg16[%145, %c0_48] : memref<16x128xf32, #tpu.memory_space<vmem>>, vector<2x128xf32>
    %147 = arith.truncf %138 : vector<2x32xf32> to vector<2x32xbf16>
    %cst_49 = arith.constant dense<0.000000e+00> : vector<2x128xf32>
    %148 = tpu.matmul %147, %23, %cst_49 {dimension_numbers = #tpu.dot_dimension_numbers<[1], [0], [0], [1], [0, 0, 1, 1], [], []>} : vector<2x32xbf16>, vector<32x128xbf16>, vector<2x128xf32> -> vector<2x128xf32>
    %149 = arith.addf %146, %148 : vector<2x128xf32>
    %150 = math.tanh %149 : vector<2x128xf32>
    %151 = arith.mulf %150, %11 : vector<2x128xf32>
    %152 = arith.addf %151, %14 : vector<2x128xf32>
    %153 = vector.extract_strided_slice %152 {offsets = [0, 0], sizes = [2, 32], strides = [1, 1]} : vector<2x128xf32> to vector<2x32xf32>
    %154 = vector.extract_strided_slice %152 {offsets = [0, 32], sizes = [2, 32], strides = [1, 1]} : vector<2x128xf32> to vector<2x32xf32>
    %155 = vector.extract_strided_slice %152 {offsets = [0, 64], sizes = [2, 32], strides = [1, 1]} : vector<2x128xf32> to vector<2x32xf32>
    %156 = vector.extract_strided_slice %152 {offsets = [0, 96], sizes = [2, 32], strides = [1, 1]} : vector<2x128xf32> to vector<2x32xf32>
    %157 = arith.mulf %154, %136 : vector<2x32xf32>
    %158 = arith.mulf %153, %155 : vector<2x32xf32>
    %159 = arith.addf %157, %158 : vector<2x32xf32>
    %160 = math.tanh %159 : vector<2x32xf32>
    %161 = arith.mulf %156, %160 : vector<2x32xf32>
    %c0_50 = arith.constant 0 : index
    %162 = arith.index_cast %144 : i32 to index
    %c0_51 = arith.constant 0 : index
    %163 = vector.load %arg11[%c0_50, %162, %c0_51] : memref<1x16x32xf32, #tpu.memory_space<vmem>>, vector<1x2x32xf32>
    %164 = vector.shape_cast %163 : vector<1x2x32xf32> to vector<2x32xf32>
    %165 = vector.shape_cast %161 : vector<2x32xf32> to vector<1x2x32xf32>
    tpu.vector_store %arg11[%c0_50, %162, %c0_51], %165 {strides = array<i32>} : memref<1x16x32xf32, #tpu.memory_space<vmem>>, vector<1x2x32xf32>,
    %c6_i32 = arith.constant 6 : i32
    %c2_i32_52 = arith.constant 2 : i32
    %166 = arith.muli %c6_i32, %c2_i32_52 : i32
    %167 = tpu.assume_multiple %166, 2 : i32
    %168 = arith.index_cast %167 : i32 to index
    %c0_53 = arith.constant 0 : index
    %169 = vector.load %arg16[%168, %c0_53] : memref<16x128xf32, #tpu.memory_space<vmem>>, vector<2x128xf32>
    %170 = arith.truncf %161 : vector<2x32xf32> to vector<2x32xbf16>
    %cst_54 = arith.constant dense<0.000000e+00> : vector<2x128xf32>
    %171 = tpu.matmul %170, %23, %cst_54 {dimension_numbers = #tpu.dot_dimension_numbers<[1], [0], [0], [1], [0, 0, 1, 1], [], []>} : vector<2x32xbf16>, vector<32x128xbf16>, vector<2x128xf32> -> vector<2x128xf32>
    %172 = arith.addf %169, %171 : vector<2x128xf32>
    %173 = math.tanh %172 : vector<2x128xf32>
    %174 = arith.mulf %173, %11 : vector<2x128xf32>
    %175 = arith.addf %174, %14 : vector<2x128xf32>
    %176 = vector.extract_strided_slice %175 {offsets = [0, 0], sizes = [2, 32], strides = [1, 1]} : vector<2x128xf32> to vector<2x32xf32>
    %177 = vector.extract_strided_slice %175 {offsets = [0, 32], sizes = [2, 32], strides = [1, 1]} : vector<2x128xf32> to vector<2x32xf32>
    %178 = vector.extract_strided_slice %175 {offsets = [0, 64], sizes = [2, 32], strides = [1, 1]} : vector<2x128xf32> to vector<2x32xf32>
    %179 = vector.extract_strided_slice %175 {offsets = [0, 96], sizes = [2, 32], strides = [1, 1]} : vector<2x128xf32> to vector<2x32xf32>
    %180 = arith.mulf %177, %159 : vector<2x32xf32>
    %181 = arith.mulf %176, %178 : vector<2x32xf32>
    %182 = arith.addf %180, %181 : vector<2x32xf32>
    %183 = math.tanh %182 : vector<2x32xf32>
    %184 = arith.mulf %179, %183 : vector<2x32xf32>
    %c0_55 = arith.constant 0 : index
    %185 = arith.index_cast %167 : i32 to index
    %c0_56 = arith.constant 0 : index
    %186 = vector.load %arg11[%c0_55, %185, %c0_56] : memref<1x16x32xf32, #tpu.memory_space<vmem>>, vector<1x2x32xf32>
    %187 = vector.shape_cast %186 : vector<1x2x32xf32> to vector<2x32xf32>
    %188 = vector.shape_cast %184 : vector<2x32xf32> to vector<1x2x32xf32>
    tpu.vector_store %arg11[%c0_55, %185, %c0_56], %188 {strides = array<i32>} : memref<1x16x32xf32, #tpu.memory_space<vmem>>, vector<1x2x32xf32>,
    %c7_i32 = arith.constant 7 : i32
    %c2_i32_57 = arith.constant 2 : i32
    %189 = arith.muli %c7_i32, %c2_i32_57 : i32
    %190 = tpu.assume_multiple %189, 2 : i32
    %191 = arith.index_cast %190 : i32 to index
    %c0_58 = arith.constant 0 : index
    %192 = vector.load %arg16[%191, %c0_58] : memref<16x128xf32, #tpu.memory_space<vmem>>, vector<2x128xf32>
    %193 = arith.truncf %184 : vector<2x32xf32> to vector<2x32xbf16>
    %cst_59 = arith.constant dense<0.000000e+00> : vector<2x128xf32>
    %194 = tpu.matmul %193, %23, %cst_59 {dimension_numbers = #tpu.dot_dimension_numbers<[1], [0], [0], [1], [0, 0, 1, 1], [], []>} : vector<2x32xbf16>, vector<32x128xbf16>, vector<2x128xf32> -> vector<2x128xf32>
    %195 = arith.addf %192, %194 : vector<2x128xf32>
    %196 = math.tanh %195 : vector<2x128xf32>
    %197 = arith.mulf %196, %11 : vector<2x128xf32>
    %198 = arith.addf %197, %14 : vector<2x128xf32>
    %199 = vector.extract_strided_slice %198 {offsets = [0, 0], sizes = [2, 32], strides = [1, 1]} : vector<2x128xf32> to vector<2x32xf32>
    %200 = vector.extract_strided_slice %198 {offsets = [0, 32], sizes = [2, 32], strides = [1, 1]} : vector<2x128xf32> to vector<2x32xf32>
    %201 = vector.extract_strided_slice %198 {offsets = [0, 64], sizes = [2, 32], strides = [1, 1]} : vector<2x128xf32> to vector<2x32xf32>
    %202 = vector.extract_strided_slice %198 {offsets = [0, 96], sizes = [2, 32], strides = [1, 1]} : vector<2x128xf32> to vector<2x32xf32>
    %203 = arith.mulf %200, %182 : vector<2x32xf32>
    %204 = arith.mulf %199, %201 : vector<2x32xf32>
    %205 = arith.addf %203, %204 : vector<2x32xf32>
    %206 = math.tanh %205 : vector<2x32xf32>
    %207 = arith.mulf %202, %206 : vector<2x32xf32>
    %c0_60 = arith.constant 0 : index
    %208 = arith.index_cast %190 : i32 to index
    %c0_61 = arith.constant 0 : index
    %209 = vector.load %arg11[%c0_60, %208, %c0_61] : memref<1x16x32xf32, #tpu.memory_space<vmem>>, vector<1x2x32xf32>
    %210 = vector.shape_cast %209 : vector<1x2x32xf32> to vector<2x32xf32>
    %211 = vector.shape_cast %207 : vector<2x32xf32> to vector<1x2x32xf32>
    tpu.vector_store %arg11[%c0_60, %208, %c0_61], %211 {strides = array<i32>} : memref<1x16x32xf32, #tpu.memory_space<vmem>>, vector<1x2x32xf32>,
    %c8_i32 = arith.constant 8 : i32
    %c0_62 = arith.constant 0 : index
    %c0_63 = arith.constant 0 : index
    %c0_64 = arith.constant 0 : index
    %212 = vector.load %arg14[%c0_62, %c0_63, %c0_64] : memref<2x2x32xf32, #tpu.memory_space<vmem>>, vector<1x2x32xf32>
    %213 = vector.shape_cast %212 : vector<1x2x32xf32> to vector<2x32xf32>
    %214 = vector.shape_cast %207 : vector<2x32xf32> to vector<1x2x32xf32>
    tpu.vector_store %arg14[%c0_62, %c0_63, %c0_64], %214 {strides = array<i32>} : memref<2x2x32xf32, #tpu.memory_space<vmem>>, vector<1x2x32xf32>,
    %c0_65 = arith.constant 0 : index
    %c0_66 = arith.constant 0 : index
    %c0_67 = arith.constant 0 : index
    %215 = vector.load %arg15[%c0_65, %c0_66, %c0_67] : memref<2x2x32xf32, #tpu.memory_space<vmem>>, vector<1x2x32xf32>
    %216 = vector.shape_cast %215 : vector<1x2x32xf32> to vector<2x32xf32>
    %217 = vector.shape_cast %205 : vector<2x32xf32> to vector<1x2x32xf32>
    tpu.vector_store %arg15[%c0_65, %c0_66, %c0_67], %217 {strides = array<i32>} : memref<2x2x32xf32, #tpu.memory_space<vmem>>, vector<1x2x32xf32>,
    %c0_68 = arith.constant 0 : index
    %c0_69 = arith.constant 0 : index
    %c0_70 = arith.constant 0 : index
    %218 = vector.load %arg11[%c0_68, %c0_69, %c0_70] : memref<1x16x32xf32, #tpu.memory_space<vmem>>, vector<1x16x32xf32>
    %219 = vector.shape_cast %218 : vector<1x16x32xf32> to vector<16x32xf32>
    %220 = arith.truncf %219 : vector<16x32xf32> to vector<16x32xbf16>
    %c0_71 = arith.constant 0 : index
    %c0_72 = arith.constant 0 : index
    %221 = vector.load %arg8[%c0_71, %c0_72] : memref<32x128xbf16, #tpu.memory_space<vmem>>, vector<32x128xbf16>
    %cst_73 = arith.constant dense<0.000000e+00> : vector<16x128xf32>
    %222 = tpu.matmul %220, %221, %cst_73 {dimension_numbers = #tpu.dot_dimension_numbers<[1], [0], [0], [1], [0, 0, 1, 1], [], []>} : vector<16x32xbf16>, vector<32x128xbf16>, vector<16x128xf32> -> vector<16x128xf32>
    %c0_74 = arith.constant 0 : index
    %c0_75 = arith.constant 0 : index
    %223 = vector.load %arg10[%c0_74, %c0_75] : memref<1x128xf32, #tpu.memory_space<vmem>>, vector<1x128xf32>
    %224 = vector.broadcast %223 : vector<1x128xf32> to vector<16x128xf32>
    %225 = arith.addf %222, %224 : vector<16x128xf32>
    %c0_76 = arith.constant 0 : index
    %c0_77 = arith.constant 0 : index
    %226 = vector.load %arg16[%c0_76, %c0_77] : memref<16x128xf32, #tpu.memory_space<vmem>>, vector<16x128xf32>
    tpu.vector_store %arg16[%c0_76, %c0_77], %225 {strides = array<i32>} : memref<16x128xf32, #tpu.memory_space<vmem>>, vector<16x128xf32>,
    %c0_78 = arith.constant 0 : index
    %c0_79 = arith.constant 0 : index
    %227 = vector.load %arg9[%c0_78, %c0_79] : memref<32x128xbf16, #tpu.memory_space<vmem>>, vector<32x128xbf16>
    %c1 = arith.constant 1 : index
    %c0_80 = arith.constant 0 : index
    %c0_81 = arith.constant 0 : index
    %228 = vector.load %arg14[%c1, %c0_80, %c0_81] : memref<2x2x32xf32, #tpu.memory_space<vmem>>, vector<1x2x32xf32>
    %229 = vector.shape_cast %228 : vector<1x2x32xf32> to vector<2x32xf32>
    %c1_82 = arith.constant 1 : index
    %c0_83 = arith.constant 0 : index
    %c0_84 = arith.constant 0 : index
    %230 = vector.load %arg15[%c1_82, %c0_83, %c0_84] : memref<2x2x32xf32, #tpu.memory_space<vmem>>, vector<1x2x32xf32>
    %231 = vector.shape_cast %230 : vector<1x2x32xf32> to vector<2x32xf32>
    %c0_i32_85 = arith.constant 0 : i32
    %c2_i32_86 = arith.constant 2 : i32
    %232 = arith.muli %c0_i32_85, %c2_i32_86 : i32
    %233 = tpu.assume_multiple %232, 2 : i32
    %234 = arith.index_cast %233 : i32 to index
    %c0_87 = arith.constant 0 : index
    %235 = vector.load %arg16[%234, %c0_87] : memref<16x128xf32, #tpu.memory_space<vmem>>, vector<2x128xf32>
    %236 = arith.truncf %229 : vector<2x32xf32> to vector<2x32xbf16>
    %cst_88 = arith.constant dense<0.000000e+00> : vector<2x128xf32>
    %237 = tpu.matmul %236, %227, %cst_88 {dimension_numbers = #tpu.dot_dimension_numbers<[1], [0], [0], [1], [0, 0, 1, 1], [], []>} : vector<2x32xbf16>, vector<32x128xbf16>, vector<2x128xf32> -> vector<2x128xf32>
    %238 = arith.addf %235, %237 : vector<2x128xf32>
    %239 = math.tanh %238 : vector<2x128xf32>
    %240 = arith.mulf %239, %11 : vector<2x128xf32>
    %241 = arith.addf %240, %14 : vector<2x128xf32>
    %242 = vector.extract_strided_slice %241 {offsets = [0, 0], sizes = [2, 32], strides = [1, 1]} : vector<2x128xf32> to vector<2x32xf32>
    %243 = vector.extract_strided_slice %241 {offsets = [0, 32], sizes = [2, 32], strides = [1, 1]} : vector<2x128xf32> to vector<2x32xf32>
    %244 = vector.extract_strided_slice %241 {offsets = [0, 64], sizes = [2, 32], strides = [1, 1]} : vector<2x128xf32> to vector<2x32xf32>
    %245 = vector.extract_strided_slice %241 {offsets = [0, 96], sizes = [2, 32], strides = [1, 1]} : vector<2x128xf32> to vector<2x32xf32>
    %246 = arith.mulf %243, %231 : vector<2x32xf32>
    %247 = arith.mulf %242, %244 : vector<2x32xf32>
    %248 = arith.addf %246, %247 : vector<2x32xf32>
    %249 = math.tanh %248 : vector<2x32xf32>
    %250 = arith.mulf %245, %249 : vector<2x32xf32>
    %c0_89 = arith.constant 0 : index
    %251 = arith.index_cast %233 : i32 to index
    %c0_90 = arith.constant 0 : index
    %252 = vector.load %arg11[%c0_89, %251, %c0_90] : memref<1x16x32xf32, #tpu.memory_space<vmem>>, vector<1x2x32xf32>
    %253 = vector.shape_cast %252 : vector<1x2x32xf32> to vector<2x32xf32>
    %254 = vector.shape_cast %250 : vector<2x32xf32> to vector<1x2x32xf32>
    tpu.vector_store %arg11[%c0_89, %251, %c0_90], %254 {strides = array<i32>} : memref<1x16x32xf32, #tpu.memory_space<vmem>>, vector<1x2x32xf32>,
    %c1_i32_91 = arith.constant 1 : i32
    %c2_i32_92 = arith.constant 2 : i32
    %255 = arith.muli %c1_i32_91, %c2_i32_92 : i32
    %256 = tpu.assume_multiple %255, 2 : i32
    %257 = arith.index_cast %256 : i32 to index
    %c0_93 = arith.constant 0 : index
    %258 = vector.load %arg16[%257, %c0_93] : memref<16x128xf32, #tpu.memory_space<vmem>>, vector<2x128xf32>
    %259 = arith.truncf %250 : vector<2x32xf32> to vector<2x32xbf16>
    %cst_94 = arith.constant dense<0.000000e+00> : vector<2x128xf32>
    %260 = tpu.matmul %259, %227, %cst_94 {dimension_numbers = #tpu.dot_dimension_numbers<[1], [0], [0], [1], [0, 0, 1, 1], [], []>} : vector<2x32xbf16>, vector<32x128xbf16>, vector<2x128xf32> -> vector<2x128xf32>
    %261 = arith.addf %258, %260 : vector<2x128xf32>
    %262 = math.tanh %261 : vector<2x128xf32>
    %263 = arith.mulf %262, %11 : vector<2x128xf32>
    %264 = arith.addf %263, %14 : vector<2x128xf32>
    %265 = vector.extract_strided_slice %264 {offsets = [0, 0], sizes = [2, 32], strides = [1, 1]} : vector<2x128xf32> to vector<2x32xf32>
    %266 = vector.extract_strided_slice %264 {offsets = [0, 32], sizes = [2, 32], strides = [1, 1]} : vector<2x128xf32> to vector<2x32xf32>
    %267 = vector.extract_strided_slice %264 {offsets = [0, 64], sizes = [2, 32], strides = [1, 1]} : vector<2x128xf32> to vector<2x32xf32>
    %268 = vector.extract_strided_slice %264 {offsets = [0, 96], sizes = [2, 32], strides = [1, 1]} : vector<2x128xf32> to vector<2x32xf32>
    %269 = arith.mulf %266, %248 : vector<2x32xf32>
    %270 = arith.mulf %265, %267 : vector<2x32xf32>
    %271 = arith.addf %269, %270 : vector<2x32xf32>
    %272 = math.tanh %271 : vector<2x32xf32>
    %273 = arith.mulf %268, %272 : vector<2x32xf32>
    %c0_95 = arith.constant 0 : index
    %274 = arith.index_cast %256 : i32 to index
    %c0_96 = arith.constant 0 : index
    %275 = vector.load %arg11[%c0_95, %274, %c0_96] : memref<1x16x32xf32, #tpu.memory_space<vmem>>, vector<1x2x32xf32>
    %276 = vector.shape_cast %275 : vector<1x2x32xf32> to vector<2x32xf32>
    %277 = vector.shape_cast %273 : vector<2x32xf32> to vector<1x2x32xf32>
    tpu.vector_store %arg11[%c0_95, %274, %c0_96], %277 {strides = array<i32>} : memref<1x16x32xf32, #tpu.memory_space<vmem>>, vector<1x2x32xf32>,
    %c2_i32_97 = arith.constant 2 : i32
    %c2_i32_98 = arith.constant 2 : i32
    %278 = arith.muli %c2_i32_97, %c2_i32_98 : i32
    %279 = tpu.assume_multiple %278, 2 : i32
    %280 = arith.index_cast %279 : i32 to index
    %c0_99 = arith.constant 0 : index
    %281 = vector.load %arg16[%280, %c0_99] : memref<16x128xf32, #tpu.memory_space<vmem>>, vector<2x128xf32>
    %282 = arith.truncf %273 : vector<2x32xf32> to vector<2x32xbf16>
    %cst_100 = arith.constant dense<0.000000e+00> : vector<2x128xf32>
    %283 = tpu.matmul %282, %227, %cst_100 {dimension_numbers = #tpu.dot_dimension_numbers<[1], [0], [0], [1], [0, 0, 1, 1], [], []>} : vector<2x32xbf16>, vector<32x128xbf16>, vector<2x128xf32> -> vector<2x128xf32>
    %284 = arith.addf %281, %283 : vector<2x128xf32>
    %285 = math.tanh %284 : vector<2x128xf32>
    %286 = arith.mulf %285, %11 : vector<2x128xf32>
    %287 = arith.addf %286, %14 : vector<2x128xf32>
    %288 = vector.extract_strided_slice %287 {offsets = [0, 0], sizes = [2, 32], strides = [1, 1]} : vector<2x128xf32> to vector<2x32xf32>
    %289 = vector.extract_strided_slice %287 {offsets = [0, 32], sizes = [2, 32], strides = [1, 1]} : vector<2x128xf32> to vector<2x32xf32>
    %290 = vector.extract_strided_slice %287 {offsets = [0, 64], sizes = [2, 32], strides = [1, 1]} : vector<2x128xf32> to vector<2x32xf32>
    %291 = vector.extract_strided_slice %287 {offsets = [0, 96], sizes = [2, 32], strides = [1, 1]} : vector<2x128xf32> to vector<2x32xf32>
    %292 = arith.mulf %289, %271 : vector<2x32xf32>
    %293 = arith.mulf %288, %290 : vector<2x32xf32>
    %294 = arith.addf %292, %293 : vector<2x32xf32>
    %295 = math.tanh %294 : vector<2x32xf32>
    %296 = arith.mulf %291, %295 : vector<2x32xf32>
    %c0_101 = arith.constant 0 : index
    %297 = arith.index_cast %279 : i32 to index
    %c0_102 = arith.constant 0 : index
    %298 = vector.load %arg11[%c0_101, %297, %c0_102] : memref<1x16x32xf32, #tpu.memory_space<vmem>>, vector<1x2x32xf32>
    %299 = vector.shape_cast %298 : vector<1x2x32xf32> to vector<2x32xf32>
    %300 = vector.shape_cast %296 : vector<2x32xf32> to vector<1x2x32xf32>
    tpu.vector_store %arg11[%c0_101, %297, %c0_102], %300 {strides = array<i32>} : memref<1x16x32xf32, #tpu.memory_space<vmem>>, vector<1x2x32xf32>,
    %c3_i32_103 = arith.constant 3 : i32
    %c2_i32_104 = arith.constant 2 : i32
    %301 = arith.muli %c3_i32_103, %c2_i32_104 : i32
    %302 = tpu.assume_multiple %301, 2 : i32
    %303 = arith.index_cast %302 : i32 to index
    %c0_105 = arith.constant 0 : index
    %304 = vector.load %arg16[%303, %c0_105] : memref<16x128xf32, #tpu.memory_space<vmem>>, vector<2x128xf32>
    %305 = arith.truncf %296 : vector<2x32xf32> to vector<2x32xbf16>
    %cst_106 = arith.constant dense<0.000000e+00> : vector<2x128xf32>
    %306 = tpu.matmul %305, %227, %cst_106 {dimension_numbers = #tpu.dot_dimension_numbers<[1], [0], [0], [1], [0, 0, 1, 1], [], []>} : vector<2x32xbf16>, vector<32x128xbf16>, vector<2x128xf32> -> vector<2x128xf32>
    %307 = arith.addf %304, %306 : vector<2x128xf32>
    %308 = math.tanh %307 : vector<2x128xf32>
    %309 = arith.mulf %308, %11 : vector<2x128xf32>
    %310 = arith.addf %309, %14 : vector<2x128xf32>
    %311 = vector.extract_strided_slice %310 {offsets = [0, 0], sizes = [2, 32], strides = [1, 1]} : vector<2x128xf32> to vector<2x32xf32>
    %312 = vector.extract_strided_slice %310 {offsets = [0, 32], sizes = [2, 32], strides = [1, 1]} : vector<2x128xf32> to vector<2x32xf32>
    %313 = vector.extract_strided_slice %310 {offsets = [0, 64], sizes = [2, 32], strides = [1, 1]} : vector<2x128xf32> to vector<2x32xf32>
    %314 = vector.extract_strided_slice %310 {offsets = [0, 96], sizes = [2, 32], strides = [1, 1]} : vector<2x128xf32> to vector<2x32xf32>
    %315 = arith.mulf %312, %294 : vector<2x32xf32>
    %316 = arith.mulf %311, %313 : vector<2x32xf32>
    %317 = arith.addf %315, %316 : vector<2x32xf32>
    %318 = math.tanh %317 : vector<2x32xf32>
    %319 = arith.mulf %314, %318 : vector<2x32xf32>
    %c0_107 = arith.constant 0 : index
    %320 = arith.index_cast %302 : i32 to index
    %c0_108 = arith.constant 0 : index
    %321 = vector.load %arg11[%c0_107, %320, %c0_108] : memref<1x16x32xf32, #tpu.memory_space<vmem>>, vector<1x2x32xf32>
    %322 = vector.shape_cast %321 : vector<1x2x32xf32> to vector<2x32xf32>
    %323 = vector.shape_cast %319 : vector<2x32xf32> to vector<1x2x32xf32>
    tpu.vector_store %arg11[%c0_107, %320, %c0_108], %323 {strides = array<i32>} : memref<1x16x32xf32, #tpu.memory_space<vmem>>, vector<1x2x32xf32>,
    %c4_i32_109 = arith.constant 4 : i32
    %c2_i32_110 = arith.constant 2 : i32
    %324 = arith.muli %c4_i32_109, %c2_i32_110 : i32
    %325 = tpu.assume_multiple %324, 2 : i32
    %326 = arith.index_cast %325 : i32 to index
    %c0_111 = arith.constant 0 : index
    %327 = vector.load %arg16[%326, %c0_111] : memref<16x128xf32, #tpu.memory_space<vmem>>, vector<2x128xf32>
    %328 = arith.truncf %319 : vector<2x32xf32> to vector<2x32xbf16>
    %cst_112 = arith.constant dense<0.000000e+00> : vector<2x128xf32>
    %329 = tpu.matmul %328, %227, %cst_112 {dimension_numbers = #tpu.dot_dimension_numbers<[1], [0], [0], [1], [0, 0, 1, 1], [], []>} : vector<2x32xbf16>, vector<32x128xbf16>, vector<2x128xf32> -> vector<2x128xf32>
    %330 = arith.addf %327, %329 : vector<2x128xf32>
    %331 = math.tanh %330 : vector<2x128xf32>
    %332 = arith.mulf %331, %11 : vector<2x128xf32>
    %333 = arith.addf %332, %14 : vector<2x128xf32>
    %334 = vector.extract_strided_slice %333 {offsets = [0, 0], sizes = [2, 32], strides = [1, 1]} : vector<2x128xf32> to vector<2x32xf32>
    %335 = vector.extract_strided_slice %333 {offsets = [0, 32], sizes = [2, 32], strides = [1, 1]} : vector<2x128xf32> to vector<2x32xf32>
    %336 = vector.extract_strided_slice %333 {offsets = [0, 64], sizes = [2, 32], strides = [1, 1]} : vector<2x128xf32> to vector<2x32xf32>
    %337 = vector.extract_strided_slice %333 {offsets = [0, 96], sizes = [2, 32], strides = [1, 1]} : vector<2x128xf32> to vector<2x32xf32>
    %338 = arith.mulf %335, %317 : vector<2x32xf32>
    %339 = arith.mulf %334, %336 : vector<2x32xf32>
    %340 = arith.addf %338, %339 : vector<2x32xf32>
    %341 = math.tanh %340 : vector<2x32xf32>
    %342 = arith.mulf %337, %341 : vector<2x32xf32>
    %c0_113 = arith.constant 0 : index
    %343 = arith.index_cast %325 : i32 to index
    %c0_114 = arith.constant 0 : index
    %344 = vector.load %arg11[%c0_113, %343, %c0_114] : memref<1x16x32xf32, #tpu.memory_space<vmem>>, vector<1x2x32xf32>
    %345 = vector.shape_cast %344 : vector<1x2x32xf32> to vector<2x32xf32>
    %346 = vector.shape_cast %342 : vector<2x32xf32> to vector<1x2x32xf32>
    tpu.vector_store %arg11[%c0_113, %343, %c0_114], %346 {strides = array<i32>} : memref<1x16x32xf32, #tpu.memory_space<vmem>>, vector<1x2x32xf32>,
    %c5_i32_115 = arith.constant 5 : i32
    %c2_i32_116 = arith.constant 2 : i32
    %347 = arith.muli %c5_i32_115, %c2_i32_116 : i32
    %348 = tpu.assume_multiple %347, 2 : i32
    %349 = arith.index_cast %348 : i32 to index
    %c0_117 = arith.constant 0 : index
    %350 = vector.load %arg16[%349, %c0_117] : memref<16x128xf32, #tpu.memory_space<vmem>>, vector<2x128xf32>
    %351 = arith.truncf %342 : vector<2x32xf32> to vector<2x32xbf16>
    %cst_118 = arith.constant dense<0.000000e+00> : vector<2x128xf32>
    %352 = tpu.matmul %351, %227, %cst_118 {dimension_numbers = #tpu.dot_dimension_numbers<[1], [0], [0], [1], [0, 0, 1, 1], [], []>} : vector<2x32xbf16>, vector<32x128xbf16>, vector<2x128xf32> -> vector<2x128xf32>
    %353 = arith.addf %350, %352 : vector<2x128xf32>
    %354 = math.tanh %353 : vector<2x128xf32>
    %355 = arith.mulf %354, %11 : vector<2x128xf32>
    %356 = arith.addf %355, %14 : vector<2x128xf32>
    %357 = vector.extract_strided_slice %356 {offsets = [0, 0], sizes = [2, 32], strides = [1, 1]} : vector<2x128xf32> to vector<2x32xf32>
    %358 = vector.extract_strided_slice %356 {offsets = [0, 32], sizes = [2, 32], strides = [1, 1]} : vector<2x128xf32> to vector<2x32xf32>
    %359 = vector.extract_strided_slice %356 {offsets = [0, 64], sizes = [2, 32], strides = [1, 1]} : vector<2x128xf32> to vector<2x32xf32>
    %360 = vector.extract_strided_slice %356 {offsets = [0, 96], sizes = [2, 32], strides = [1, 1]} : vector<2x128xf32> to vector<2x32xf32>
    %361 = arith.mulf %358, %340 : vector<2x32xf32>
    %362 = arith.mulf %357, %359 : vector<2x32xf32>
    %363 = arith.addf %361, %362 : vector<2x32xf32>
    %364 = math.tanh %363 : vector<2x32xf32>
    %365 = arith.mulf %360, %364 : vector<2x32xf32>
    %c0_119 = arith.constant 0 : index
    %366 = arith.index_cast %348 : i32 to index
    %c0_120 = arith.constant 0 : index
    %367 = vector.load %arg11[%c0_119, %366, %c0_120] : memref<1x16x32xf32, #tpu.memory_space<vmem>>, vector<1x2x32xf32>
    %368 = vector.shape_cast %367 : vector<1x2x32xf32> to vector<2x32xf32>
    %369 = vector.shape_cast %365 : vector<2x32xf32> to vector<1x2x32xf32>
    tpu.vector_store %arg11[%c0_119, %366, %c0_120], %369 {strides = array<i32>} : memref<1x16x32xf32, #tpu.memory_space<vmem>>, vector<1x2x32xf32>,
    %c6_i32_121 = arith.constant 6 : i32
    %c2_i32_122 = arith.constant 2 : i32
    %370 = arith.muli %c6_i32_121, %c2_i32_122 : i32
    %371 = tpu.assume_multiple %370, 2 : i32
    %372 = arith.index_cast %371 : i32 to index
    %c0_123 = arith.constant 0 : index
    %373 = vector.load %arg16[%372, %c0_123] : memref<16x128xf32, #tpu.memory_space<vmem>>, vector<2x128xf32>
    %374 = arith.truncf %365 : vector<2x32xf32> to vector<2x32xbf16>
    %cst_124 = arith.constant dense<0.000000e+00> : vector<2x128xf32>
    %375 = tpu.matmul %374, %227, %cst_124 {dimension_numbers = #tpu.dot_dimension_numbers<[1], [0], [0], [1], [0, 0, 1, 1], [], []>} : vector<2x32xbf16>, vector<32x128xbf16>, vector<2x128xf32> -> vector<2x128xf32>
    %376 = arith.addf %373, %375 : vector<2x128xf32>
    %377 = math.tanh %376 : vector<2x128xf32>
    %378 = arith.mulf %377, %11 : vector<2x128xf32>
    %379 = arith.addf %378, %14 : vector<2x128xf32>
    %380 = vector.extract_strided_slice %379 {offsets = [0, 0], sizes = [2, 32], strides = [1, 1]} : vector<2x128xf32> to vector<2x32xf32>
    %381 = vector.extract_strided_slice %379 {offsets = [0, 32], sizes = [2, 32], strides = [1, 1]} : vector<2x128xf32> to vector<2x32xf32>
    %382 = vector.extract_strided_slice %379 {offsets = [0, 64], sizes = [2, 32], strides = [1, 1]} : vector<2x128xf32> to vector<2x32xf32>
    %383 = vector.extract_strided_slice %379 {offsets = [0, 96], sizes = [2, 32], strides = [1, 1]} : vector<2x128xf32> to vector<2x32xf32>
    %384 = arith.mulf %381, %363 : vector<2x32xf32>
    %385 = arith.mulf %380, %382 : vector<2x32xf32>
    %386 = arith.addf %384, %385 : vector<2x32xf32>
    %387 = math.tanh %386 : vector<2x32xf32>
    %388 = arith.mulf %383, %387 : vector<2x32xf32>
    %c0_125 = arith.constant 0 : index
    %389 = arith.index_cast %371 : i32 to index
    %c0_126 = arith.constant 0 : index
    %390 = vector.load %arg11[%c0_125, %389, %c0_126] : memref<1x16x32xf32, #tpu.memory_space<vmem>>, vector<1x2x32xf32>
    %391 = vector.shape_cast %390 : vector<1x2x32xf32> to vector<2x32xf32>
    %392 = vector.shape_cast %388 : vector<2x32xf32> to vector<1x2x32xf32>
    tpu.vector_store %arg11[%c0_125, %389, %c0_126], %392 {strides = array<i32>} : memref<1x16x32xf32, #tpu.memory_space<vmem>>, vector<1x2x32xf32>,
    %c7_i32_127 = arith.constant 7 : i32
    %c2_i32_128 = arith.constant 2 : i32
    %393 = arith.muli %c7_i32_127, %c2_i32_128 : i32
    %394 = tpu.assume_multiple %393, 2 : i32
    %395 = arith.index_cast %394 : i32 to index
    %c0_129 = arith.constant 0 : index
    %396 = vector.load %arg16[%395, %c0_129] : memref<16x128xf32, #tpu.memory_space<vmem>>, vector<2x128xf32>
    %397 = arith.truncf %388 : vector<2x32xf32> to vector<2x32xbf16>
    %cst_130 = arith.constant dense<0.000000e+00> : vector<2x128xf32>
    %398 = tpu.matmul %397, %227, %cst_130 {dimension_numbers = #tpu.dot_dimension_numbers<[1], [0], [0], [1], [0, 0, 1, 1], [], []>} : vector<2x32xbf16>, vector<32x128xbf16>, vector<2x128xf32> -> vector<2x128xf32>
    %399 = arith.addf %396, %398 : vector<2x128xf32>
    %400 = math.tanh %399 : vector<2x128xf32>
    %401 = arith.mulf %400, %11 : vector<2x128xf32>
    %402 = arith.addf %401, %14 : vector<2x128xf32>
    %403 = vector.extract_strided_slice %402 {offsets = [0, 0], sizes = [2, 32], strides = [1, 1]} : vector<2x128xf32> to vector<2x32xf32>
    %404 = vector.extract_strided_slice %402 {offsets = [0, 32], sizes = [2, 32], strides = [1, 1]} : vector<2x128xf32> to vector<2x32xf32>
    %405 = vector.extract_strided_slice %402 {offsets = [0, 64], sizes = [2, 32], strides = [1, 1]} : vector<2x128xf32> to vector<2x32xf32>
    %406 = vector.extract_strided_slice %402 {offsets = [0, 96], sizes = [2, 32], strides = [1, 1]} : vector<2x128xf32> to vector<2x32xf32>
    %407 = arith.mulf %404, %386 : vector<2x32xf32>
    %408 = arith.mulf %403, %405 : vector<2x32xf32>
    %409 = arith.addf %407, %408 : vector<2x32xf32>
    %410 = math.tanh %409 : vector<2x32xf32>
    %411 = arith.mulf %406, %410 : vector<2x32xf32>
    %c0_131 = arith.constant 0 : index
    %412 = arith.index_cast %394 : i32 to index
    %c0_132 = arith.constant 0 : index
    %413 = vector.load %arg11[%c0_131, %412, %c0_132] : memref<1x16x32xf32, #tpu.memory_space<vmem>>, vector<1x2x32xf32>
    %414 = vector.shape_cast %413 : vector<1x2x32xf32> to vector<2x32xf32>
    %415 = vector.shape_cast %411 : vector<2x32xf32> to vector<1x2x32xf32>
    tpu.vector_store %arg11[%c0_131, %412, %c0_132], %415 {strides = array<i32>} : memref<1x16x32xf32, #tpu.memory_space<vmem>>, vector<1x2x32xf32>,
    %c8_i32_133 = arith.constant 8 : i32
    %c1_134 = arith.constant 1 : index
    %c0_135 = arith.constant 0 : index
    %c0_136 = arith.constant 0 : index
    %416 = vector.load %arg14[%c1_134, %c0_135, %c0_136] : memref<2x2x32xf32, #tpu.memory_space<vmem>>, vector<1x2x32xf32>
    %417 = vector.shape_cast %416 : vector<1x2x32xf32> to vector<2x32xf32>
    %418 = vector.shape_cast %411 : vector<2x32xf32> to vector<1x2x32xf32>
    tpu.vector_store %arg14[%c1_134, %c0_135, %c0_136], %418 {strides = array<i32>} : memref<2x2x32xf32, #tpu.memory_space<vmem>>, vector<1x2x32xf32>,
    %c1_137 = arith.constant 1 : index
    %c0_138 = arith.constant 0 : index
    %c0_139 = arith.constant 0 : index
    %419 = vector.load %arg15[%c1_137, %c0_138, %c0_139] : memref<2x2x32xf32, #tpu.memory_space<vmem>>, vector<1x2x32xf32>
    %420 = vector.shape_cast %419 : vector<1x2x32xf32> to vector<2x32xf32>
    %421 = vector.shape_cast %409 : vector<2x32xf32> to vector<1x2x32xf32>
    tpu.vector_store %arg15[%c1_137, %c0_138, %c0_139], %421 {strides = array<i32>} : memref<2x2x32xf32, #tpu.memory_space<vmem>>, vector<1x2x32xf32>,
    %c0_i32_140 = arith.constant 0 : i32
    %422 = arith.cmpi eq, %arg1, %c0_i32_140 : i32
    %423 = arith.extui %422 : i1 to i32
    %c0_i32_141 = arith.constant 0 : i32
    %424 = arith.cmpi ne, %423, %c0_i32_141 : i32
    scf.if %424 {
      %c0_142 = arith.constant 0 : index
      %c0_143 = arith.constant 0 : index
      %c0_144 = arith.constant 0 : index
      %425 = vector.load %arg14[%c0_142, %c0_143, %c0_144] : memref<2x2x32xf32, #tpu.memory_space<vmem>>, vector<2x2x32xf32>
      %c0_145 = arith.constant 0 : index
      %c0_146 = arith.constant 0 : index
      %c0_147 = arith.constant 0 : index
      %426 = vector.load %arg12[%c0_145, %c0_146, %c0_147] : memref<2x2x32xf32, #tpu.memory_space<vmem>>, vector<2x2x32xf32>
      tpu.vector_store %arg12[%c0_145, %c0_146, %c0_147], %425 {strides = array<i32>} : memref<2x2x32xf32, #tpu.memory_space<vmem>>, vector<2x2x32xf32>,
      %c0_148 = arith.constant 0 : index
      %c0_149 = arith.constant 0 : index
      %c0_150 = arith.constant 0 : index
      %427 = vector.load %arg15[%c0_148, %c0_149, %c0_150] : memref<2x2x32xf32, #tpu.memory_space<vmem>>, vector<2x2x32xf32>
      %c0_151 = arith.constant 0 : index
      %c0_152 = arith.constant 0 : index
      %c0_153 = arith.constant 0 : index
      %428 = vector.load %arg13[%c0_151, %c0_152, %c0_153] : memref<2x2x32xf32, #tpu.memory_space<vmem>>, vector<2x2x32xf32>
      tpu.vector_store %arg13[%c0_151, %c0_152, %c0_153], %427 {strides = array<i32>} : memref<2x2x32xf32, #tpu.memory_space<vmem>>, vector<2x2x32xf32>,
    } else {
    }
    return
  }
  func.func @transform_0(%arg0: i32, %arg1: i32) -> (i32, i32, i32) {
    %c0_i32 = arith.constant 0 : i32
    %c0_i32_0 = arith.constant 0 : i32
    return %arg0, %arg1, %c0_i32 : i32, i32, i32
  }
  func.func @transform_1(%arg0: i32, %arg1: i32) -> (i32, i32, i32) {
    %c0_i32 = arith.constant 0 : i32
    %c0_i32_0 = arith.constant 0 : i32
    %c0_i32_1 = arith.constant 0 : i32
    return %c0_i32, %arg0, %c0_i32_0 : i32, i32, i32
  }
  func.func @transform_2(%arg0: i32, %arg1: i32) -> (i32, i32, i32) {
    %c0_i32 = arith.constant 0 : i32
    %c0_i32_0 = arith.constant 0 : i32
    %c0_i32_1 = arith.constant 0 : i32
    return %c0_i32, %arg0, %c0_i32_0 : i32, i32, i32
  }
  func.func @transform_3(%arg0: i32, %arg1: i32) -> (i32, i32) {
    %c0_i32 = arith.constant 0 : i32
    %c0_i32_0 = arith.constant 0 : i32
    %c0_i32_1 = arith.constant 0 : i32
    return %c0_i32, %c0_i32_0 : i32, i32
  }
  func.func @transform_4(%arg0: i32, %arg1: i32) -> (i32, i32) {
    %c0_i32 = arith.constant 0 : i32
    %c0_i32_0 = arith.constant 0 : i32
    %c0_i32_1 = arith.constant 0 : i32
    return %c0_i32, %c0_i32_0 : i32, i32
  }
  func.func @transform_5(%arg0: i32, %arg1: i32) -> (i32, i32) {
    %c0_i32 = arith.constant 0 : i32
    %c0_i32_0 = arith.constant 0 : i32
    %c0_i32_1 = arith.constant 0 : i32
    return %c0_i32, %c0_i32_0 : i32, i32
  }
  func.func @transform_6(%arg0: i32, %arg1: i32) -> (i32, i32) {
    %c0_i32 = arith.constant 0 : i32
    %c0_i32_0 = arith.constant 0 : i32
    %c0_i32_1 = arith.constant 0 : i32
    return %c0_i32, %c0_i32_0 : i32, i32
  }
  func.func @transform_7(%arg0: i32, %arg1: i32) -> (i32, i32) {
    %c0_i32 = arith.constant 0 : i32
    %c0_i32_0 = arith.constant 0 : i32
    %c0_i32_1 = arith.constant 0 : i32
    return %c0_i32, %c0_i32_0 : i32, i32
  }
  func.func @transform_8(%arg0: i32, %arg1: i32) -> (i32, i32) {
    %c0_i32 = arith.constant 0 : i32
    %c0_i32_0 = arith.constant 0 : i32
    %c0_i32_1 = arith.constant 0 : i32
    return %c0_i32, %c0_i32_0 : i32, i32
  }
  func.func @transform_9(%arg0: i32, %arg1: i32) -> (i32, i32, i32) {
    %c0_i32 = arith.constant 0 : i32
    %c0_i32_0 = arith.constant 0 : i32
    return %arg0, %arg1, %c0_i32 : i32, i32, i32
  }
  func.func @transform_10(%arg0: i32, %arg1: i32) -> (i32, i32, i32) {
    %c0_i32 = arith.constant 0 : i32
    %c0_i32_0 = arith.constant 0 : i32
    %c0_i32_1 = arith.constant 0 : i32
    return %c0_i32, %arg0, %c0_i32_0 : i32, i32, i32
  }
  func.func @transform_11(%arg0: i32, %arg1: i32) -> (i32, i32, i32) {
    %c0_i32 = arith.constant 0 : i32
    %c0_i32_0 = arith.constant 0 : i32
    %c0_i32_1 = arith.constant 0 : i32
    return %c0_i32, %arg0, %c0_i32_0 : i32, i32, i32
  }
}

</mosaic_0001>

<bundles_post_ra>
// kernel: tpu_custom_call.1
= control target key start
LH: loop header
LB: loop body
LE: loop exit
PB: predicated region body
PF: predicated region fallthrough
CT: control target
= control target key end

     0   :  { %17 = vsyncpa [#allocation6], 0  ;;  %s1891_s0 = inlined_call_operand.hbm [shape: bf16[1,16,16], index: 0, kind: input, shape index: {}]   ;;  %s1892_s1 = inlined_call_operand.hbm [shape: f32[2,2,32], index: 1, kind: input, shape index: {}]   ;;  %s1893_s2 = inlined_call_operand.hbm [shape: f32[2,2,32], index: 2, kind: input, shape index: {}]   ;;  %s1894_s3 = inlined_call_operand.hbm [shape: bf16[16,128], index: 3, kind: input, shape index: {}]   ;;  %s1895_s4 = inlined_call_operand.hbm [shape: bf16[32,128], index: 4, kind: input, shape index: {}]   ;;  %s1896_s5 = inlined_call_operand.vmem [shape: f32[1,128], index: 5, kind: input, shape index: {}]   ;;  %s1897_s6 = inlined_call_operand.hbm [shape: bf16[32,128], index: 6, kind: input, shape index: {}]   ;;  %s1898_s7 = inlined_call_operand.hbm [shape: bf16[32,128], index: 7, kind: input, shape index: {}]   ;;  %s1899_s8 = inlined_call_operand.vmem [shape: f32[1,128], index: 8, kind: input, shape index: {}]   ;;  %s1900_s9 = inlined_call_operand.hbm [shape: f32[1,16,32], index: 9, kind: output, shape index: {0}]   ;;  %s1901_s10 = inlined_call_operand.hbm [shape: f32[2,2,32], index: 10, kind: output, shape index: {1}]   ;;  %s1902_s11 = inlined_call_operand.hbm [shape: f32[2,2,32], index: 11, kind: output, shape index: {2}]  }
   0x1   :  { %18 = vsyncpa [#allocation9], 0 }
   0x2   :  { %19 = vsyncpa [#allocation12], 0 }
   0x3   :  { %20 = vsyncpa [#allocation15], 0 }
   0x4   :  { %21 = vsyncpa [#allocation7], 0  ;;  %s40_s19 = sshll.u32 %s1892_s1, 4  ;;  %s41_s19 = int_to_ptr.hbm [resolvable:$true] %s40_s19 }
   0x5   :  { %22 = vsyncpa [#allocation19], 0  ;;  %s1530_s20 = smov [#allocation8]   ;;  %s1531_s22 = smov 32  }
   0x6   :  { %s42_s21 = sshll.u32 %s1530_s20, 4  ;;  %s1532_s23 = smov 2   ;;  %s43_s21 = int_to_ptr.vmem [resolvable:$true] %s42_s21 }
   0x7   :  { %48 = dma.hbm_to_vmem [thread:$0]  %s41_s19, 64, %s43_s21, [#allocation9], %s1531_s22, %s1531_s22, %s1532_s23  }
   0x8   :  { %s66_s26 = sshll.u32 %s1894_s3, 4  ;;  %s1533_s27 = smov [#allocation11]   ;;  %s67_s26 = int_to_ptr.hbm [resolvable:$true] %s66_s26 }
   0x9   :  { %s68_s28 = sshll.u32 %s1533_s27, 4  ;;  %s94_s30 = sshll.u32 %s1897_s6, 4  ;;  %s69_s28 = int_to_ptr.vmem [resolvable:$true] %s68_s28  ;;  %s95_s30 = int_to_ptr.hbm [resolvable:$true] %s94_s30 }
   0xa   :  { %s1534_s12 = smov 64   ;;  %s1535_s13 = smov 4  }
   0xb   :  { %74 = dma.hbm_to_vmem [thread:$0]  %s67_s26, 128, %s69_s28, [#allocation12], %s1534_s12, %s1534_s12, %s1535_s13  }
   0xc   :  { %s27_s16 = sshll.u32 %s1891_s0, 4  ;;  %s1536_s3 = smov [#allocation14]   ;;  %s28_s16 = int_to_ptr.hbm [resolvable:$true] %s27_s16 }
   0xd   :  { %s96_s17 = sshll.u32 %s1536_s3, 4  ;;  %s1537_s6 = smov [#allocation5]   ;;  %s97_s17 = int_to_ptr.vmem [resolvable:$true] %s96_s17 }
   0xe   :  { %102 = dma.hbm_to_vmem [thread:$0]  %s95_s30, 256, %s97_s17, [#allocation15], %s1534_s12, %s1534_s12, %s1535_s13  }
   0xf   :  { %s29_s18 = sshll.u32 %s1537_s6, 4  ;;  %s53_s21 = sshll.u32 %s1893_s2, 4  ;;  %s30_s18 = int_to_ptr.vmem [resolvable:$true] %s29_s18  ;;  %s54_s21 = int_to_ptr.hbm [resolvable:$true] %s53_s21 }
  0x10   :  { %35 = dma.hbm_to_vmem [thread:$0]  %s28_s16, 128, %s30_s18, [#allocation6], %s1534_s12, %s1534_s12, %s1535_s13  }
  0x11   :  { %s79_s25 = sshll.u32 %s1895_s4, 4  ;;  %s1538_s26 = smov [#allocation10]   ;;  %s80_s25 = int_to_ptr.hbm [resolvable:$true] %s79_s25 }
  0x12   :  { %s55_s27 = sshll.u32 %s1538_s26, 4  ;;  %s1539_s28 = smov [#allocation13]   ;;  %s56_s27 = int_to_ptr.vmem [resolvable:$true] %s55_s27 }
  0x13   :  { %61 = dma.hbm_to_vmem [thread:$0]  %s54_s21, 64, %s56_s27, [#allocation9], %s1531_s22, %s1531_s22, %s1532_s23  }
  0x14   :  { %s81_s2 = sshll.u32 %s1539_s28, 4  ;;  %s107_s30 = sshll.u32 %s1898_s7, 4  ;;  %s82_s2 = int_to_ptr.vmem [resolvable:$true] %s81_s2  ;;  %s108_s30 = int_to_ptr.hbm [resolvable:$true] %s107_s30 }
  0x15   :  { %87 = dma.hbm_to_vmem [thread:$0]  %s80_s25, 256, %s82_s2, [#allocation12], %s1534_s12, %s1534_s12, %s1535_s13  }
  0x16   :  { %s1540_s4 = smov [#allocation16]  }
  0x17   :  { %s109_s14 = sshll.u32 %s1540_s4, 4  ;;  %s110_s14 = int_to_ptr.vmem [resolvable:$true] %s109_s14 }
  0x18   :  { %115 = dma.hbm_to_vmem [thread:$0]  %s108_s30, 256, %s110_s14, [#allocation15], %s1534_s12, %s1534_s12, %s1535_s13  }
  0x19   :  { %1518 = dma.done.wait [#allocation6], 128  }
  0x1a   :  { %1519 = vsyncadd [#allocation6], 4294967168 }
  0x1b   :  { %1520 = dma.done.wait [#allocation9], 128  }
  0x1c   :  { %1521 = vsyncadd [#allocation9], 4294967168 }
  0x1d   :  { %1522 = dma.done.wait [#allocation12], 384  }
  0x1e   :  { %1523 = vsyncadd [#allocation12], 4294966912 }
  0x1f   :  { %1524 = dma.done.wait [#allocation15], 512  }
  0x20   :  { %1525 = vsyncadd [#allocation15], 4294966784  ;;  %vm153_vm0 = vcmask 254976   ;;  %v1187_v0 = vld [vmem:[#allocation11] sm:$0xff]  ;;  %v1189_v1 = vld [vmem:[#allocation13 + $0x8] sm:$0xff]  ;;  %vm186_vm1 = vcmask 130048   ;;  %v160_v11 = vlaneseq }
  0x21   :  { %v1186_v2 = vld [vmem:[#allocation5] sm:$0xff]  ;;  %v151_v3 = vld [vmem:[#allocation8] sm:$0x3]  ;;  %197 = vmatpush.bf16.msra.mxu0 %v1187_v0  ;;  %236 = vmatpush.bf16.msra.mxu1 %v1189_v1  ;;  %v1188_v4 = vld [vmem:[#allocation13] sm:$0xff]  ;;  %vm226_vm2 = vcmask 261120   ;;  %v1541_v19 = vmov 0.5  }
  0x22   :  { %154 = vst.msk [vmem:[#allocation2] sm:$0x3] %vm153_vm0, %v151_v3  ;;  %289 = vmatpush.bf16.msra.mxu2 %v1189_v1  ;;  %338 = vmatpush.bf16.msra.mxu3 %v1189_v1  ;;  %v156_v7 = vld [vmem:[#allocation10] sm:$0x3]  ;;  %v1212_v8 = vld [vmem:[%s1896_s5] ss:$0 sm:$0xff] }
  0x23   :  { %158 = vst.msk [vmem:[#allocation3] sm:$0x3] %vm153_vm0, %v156_v7  ;;  %v161_v12 = vand.u32 127, %v160_v11  ;;  %s1098_s6 = sshll.u32 %s1901_s10, 4  ;;  %s1544_s18 = smov [#allocation20]   ;;  %s1099_s6 = int_to_ptr.hbm [resolvable:$true] %s1098_s6 }
  0x24   :  { %1144 = vmatmul.msk.bf16.vlgmr.msra.gmra.mxu0 %vm186_vm1, %v1186_v2  ;;  %s1109_s19 = sshll.u32 %s1544_s18, 4  ;;  %s1111_s0 = sshll.u32 %s1902_s11, 4  ;;  %s1110_s19 = int_to_ptr.vmem [resolvable:$true] %s1109_s19  ;;  %s1112_s0 = int_to_ptr.hbm [resolvable:$true] %s1111_s0 }
  0x25   :  { %387 = vmatpush.bf16.msrb.mxu0 %v1189_v1  ;;  %237 = vmatpush.bf16.msra.mxu1 %v1188_v4  ;;  %vm162_vm3 = vcmp.ge.s32.totalorder %v161_v12, 64  ;;  %vm163_vm4 = vcmp.lt.s32.totalorder %v161_v12, 96  ;;  %s1545_s24 = smov [#allocation17]   ;;  %s1085_s27 = sshll.u32 %s1900_s9, 4  ;;  %s1086_s27 = int_to_ptr.hbm [resolvable:$true] %s1085_s27 }
  0x26   :  { %290 = vmatpush.bf16.msra.mxu2 %v1188_v4  ;;  %339 = vmatpush.bf16.msra.mxu3 %v1188_v4  ;;  %vm164_vm5 = vmand %vm162_vm3, %vm163_vm4  ;;  %s1083_s25 = sshll.u32 %s1545_s24, 4  ;;  %s1546_s11 = smov 128   ;;  %s1084_s25 = int_to_ptr.vmem [resolvable:$true] %s1083_s25 }
  0x27   :  { %v1656_v20 = vsel %vm164_vm5, 1.0, %v1541_v19  ;;  %v1658_v22 = vsel %vm164_vm5, 0.0, %v1541_v19  ;;  %s1547_s28 = smov 8  }
  0x29   :  { %388 = vmatpush.bf16.msrb.mxu0 %v1188_v4  ;;  %436 = vmatpush.bf16.msrb.mxu1 %v1189_v1  ;;  %v210_v5 = vld [vmem:[#allocation2] sm:$0x3] }
  0x2a   :  { %485 = vmatpush.bf16.msrb.mxu2 %v1189_v1  ;;  %534 = vmatpush.bf16.msrb.mxu3 %v1189_v1  ;;  %v213_v6 = vpack.c.bf16 %v210_v5, %v210_v5  ;;  %v211_v25 = vld [vmem:[#allocation3] sm:$0x3] }
  0x2c   :  { %1153 = vmatmul.msk.bf16.vlgmr.msra.gmra.mxu1 %vm226_vm2, %v213_v6 }
  0x2d   :  { %583 = vmatpush.bf16.msra.mxu0 %v1189_v1  ;;  %437 = vmatpush.bf16.msrb.mxu1 %v1188_v4 }
  0x2e   :  { %486 = vmatpush.bf16.msrb.mxu2 %v1188_v4  ;;  %535 = vmatpush.bf16.msrb.mxu3 %v1188_v4 }
  0x31   :  { %584 = vmatpush.bf16.msra.mxu0 %v1188_v4 }
  0xa1   :  { %v199_v9 = vpop.f32.mrf.mxu0 }
  0xa2   :  { %v200_v10 = vadd.f32 %v1212_v8, %v199_v9 }
  0xa4   :  { %204 = vst [vmem:[#allocation4] sm:$0xff] %v200_v10 }
  0xa9   :  { %v239_v13 = vpop.f32.mrf.mxu1  ;;  %v201_v14 = vpop.f32.mrf.mxu0 }
  0xaa   :  { %v202_v15 = vadd.f32 %v1212_v8, %v201_v14 }
  0xab   :  { %v212_v16 = vld [vmem:[#allocation4] sm:$0x3]  ;;  %v275_v37 = vld [vmem:[#allocation4 + $0x2] sm:$0x3]  ;;  %v324_v54 = vld [vmem:[#allocation4 + $0x4] sm:$0x3] }
  0xac   :  { %v243_v17 = vadd.f32 %v239_v13, %v212_v16  ;;  %205 = vst [vmem:[#allocation4 + $0x8] sm:$0xff] %v202_v15  ;;  %v373_v7 = vld [vmem:[#allocation4 + $0x6] sm:$0x3] }
  0xae   :  { %1214 = vtanh.f32 %v243_v17 }
  0xb1   :  { %v241_v18 = vpop.f32.mrf.mxu1 }
  0xb4   :  { %v1215_v21 = vpop.eup %1214 }
  0xb5   :  { %v245_v23 = vmul.f32 %v1215_v21, %v1656_v20 }
  0xb7   :  { %v246_v24 = vadd.f32 %v245_v23, %v1658_v22 }
  0xb9   :  { %253 = vrot.lane.b32.xlu0 %v246_v24, %s1534_s12 }
  0xc1   :  { %248 = vrot.lane.b32.xlu0 %v211_v25, %s1531_s22 }
 0x12b   :  { %v254_v26 = vpop.permute.xlu0 %253 }
 0x12c   :  { %v256_v27 = vmul.f32 %v254_v26, %v246_v24  ;;  %v422_v26 = vld [vmem:[#allocation4 + $0x8] sm:$0x3] }
 0x12e   :  { %258 = vrot.lane.b32.xlu1 %v256_v27, %s1531_s22 }
 0x133   :  { %v249_v28 = vpop.permute.xlu0 %248 }
 0x134   :  { %v251_v29 = vmul.f32 %v249_v28, %v246_v24 }
 0x1a0   :  { %v259_v30 = vpop.permute.xlu1 %258 }
 0x1a1   :  { %v261_v31 = vadd.f32 %v259_v30, %v251_v29 }
 0x1a3   :  { %1216 = vtanh.f32 %v261_v31 }
 0x1a9   :  { %v1217_v32 = vpop.eup %1216 }
 0x1aa   :  { %264 = vrot.lane.b32.xlu1 %v1217_v32, %s1534_s12 }
 0x21c   :  { %v265_v33 = vpop.permute.xlu1 %264 }
 0x21d   :  { %v1666_v34 = vmul.f32 %v265_v33, %v246_v24 }
 0x21f   :  { %v276_v35 = vpack.c.bf16 %v1666_v34, %v1666_v34 }
 0x221   :  { %278 = vrot.lane.b32.xlu2 %v276_v35, %s1531_s22 }
 0x27b   :  { %v279_v36 = vpop.permute.xlu2 %278 }
 0x27c   :  { %1154 = vmatmul.msk.bf16.vlgmr.msra.gmra.mxu2 %vm226_vm2, %v279_v36 }
 0x2ff   :  { %v292_v38 = vpop.f32.mrf.mxu2 }
 0x300   :  { %v296_v39 = vadd.f32 %v292_v38, %v275_v37 }
 0x302   :  { %1218 = vtanh.f32 %v296_v39 }
 0x307   :  { %v294_v40 = vpop.f32.mrf.mxu2 }
 0x308   :  { %v1219_v41 = vpop.eup %1218 }
 0x309   :  { %v298_v42 = vmul.f32 %v1219_v41, %v1656_v20 }
 0x30b   :  { %v299_v43 = vadd.f32 %v298_v42, %v1658_v22 }
 0x30d   :  { %302 = vrot.lane.b32.xlu2 %v299_v43, %s1534_s12  ;;  %v300_v46 = vmul.f32 %v299_v43, %v261_v31 }
 0x367   :  { %v303_v44 = vpop.permute.xlu2 %302 }
 0x368   :  { %v305_v45 = vmul.f32 %v303_v44, %v299_v43  ;;  %v471_v44 = vld [vmem:[#allocation4 + $0xa] sm:$0x3] }
 0x36a   :  { %307 = vrot.lane.b32.xlu0 %v305_v45, %s1531_s22 }
 0x3dc   :  { %v308_v47 = vpop.permute.xlu0 %307 }
 0x3dd   :  { %v310_v48 = vadd.f32 %v308_v47, %v300_v46 }
 0x3df   :  { %1220 = vtanh.f32 %v310_v48 }
 0x3e5   :  { %v1221_v49 = vpop.eup %1220 }
 0x3e6   :  { %313 = vrot.lane.b32.xlu1 %v1221_v49, %s1534_s12 }
 0x458   :  { %v314_v50 = vpop.permute.xlu1 %313 }
 0x459   :  { %v1677_v51 = vmul.f32 %v314_v50, %v299_v43 }
 0x45b   :  { %v325_v52 = vpack.c.bf16 %v1677_v51, %v1677_v51 }
 0x45d   :  { %327 = vrot.lane.b32.xlu2 %v325_v52, %s1531_s22 }
 0x4b7   :  { %v328_v53 = vpop.permute.xlu2 %327 }
 0x4b8   :  { %1155 = vmatmul.msk.bf16.vlgmr.msra.gmra.mxu3 %vm226_vm2, %v328_v53 }
 0x53b   :  { %v341_v55 = vpop.f32.mrf.mxu3 }
 0x53c   :  { %v345_v56 = vadd.f32 %v341_v55, %v324_v54 }
 0x53e   :  { %1222 = vtanh.f32 %v345_v56 }
 0x543   :  { %v343_v57 = vpop.f32.mrf.mxu3 }
 0x544   :  { %v1223_v58 = vpop.eup %1222 }
 0x545   :  { %v347_v59 = vmul.f32 %v1223_v58, %v1656_v20 }
 0x547   :  { %v348_v60 = vadd.f32 %v347_v59, %v1658_v22 }
 0x549   :  { %351 = vrot.lane.b32.xlu0 %v348_v60, %s1534_s12  ;;  %v349_v63 = vmul.f32 %v348_v60, %v310_v48 }
 0x5bb   :  { %v352_v61 = vpop.permute.xlu0 %351 }
 0x5bc   :  { %v354_v62 = vmul.f32 %v352_v61, %v348_v60 }
 0x5be   :  { %356 = vrot.lane.b32.xlu1 %v354_v62, %s1531_s22  ;;  %v520_v62 = vld [vmem:[#allocation4 + $0xc] sm:$0x3] }
 0x630   :  { %v357_v0 = vpop.permute.xlu1 %356 }
 0x631   :  { %v359_v1 = vadd.f32 %v357_v0, %v349_v63 }
 0x633   :  { %1224 = vtanh.f32 %v359_v1 }
 0x639   :  { %v1225_v2 = vpop.eup %1224 }
 0x63a   :  { %362 = vrot.lane.b32.xlu2 %v1225_v2, %s1534_s12 }
 0x694   :  { %v363_v3 = vpop.permute.xlu2 %362 }
 0x695   :  { %v1688_v4 = vmul.f32 %v363_v3, %v348_v60 }
 0x697   :  { %v374_v5 = vpack.c.bf16 %v1688_v4, %v1688_v4 }
 0x699   :  { %376 = vrot.lane.b32.xlu0 %v374_v5, %s1531_s22 }
 0x70b   :  { %v377_v6 = vpop.permute.xlu0 %376 }
 0x70c   :  { %1156 = vmatmul.msk.bf16.vlgmr.msrb.gmra.mxu0 %vm226_vm2, %v377_v6 }
 0x789   :  { %v390_v8 = vpop.f32.mrf.mxu0 }
 0x78a   :  { %v394_v9 = vadd.f32 %v390_v8, %v373_v7 }
 0x78c   :  { %1226 = vtanh.f32 %v394_v9 }
 0x791   :  { %v392_v10 = vpop.f32.mrf.mxu0 }
 0x792   :  { %v1227_v11 = vpop.eup %1226 }
 0x793   :  { %v396_v12 = vmul.f32 %v1227_v11, %v1656_v20 }
 0x795   :  { %v397_v13 = vadd.f32 %v396_v12, %v1658_v22 }
 0x797   :  { %400 = vrot.lane.b32.xlu1 %v397_v13, %s1534_s12  ;;  %v398_v16 = vmul.f32 %v397_v13, %v359_v1 }
 0x809   :  { %v401_v14 = vpop.permute.xlu1 %400 }
 0x80a   :  { %v403_v15 = vmul.f32 %v401_v14, %v397_v13 }
 0x80c   :  { %405 = vrot.lane.b32.xlu2 %v403_v15, %s1531_s22 }
 0x866   :  { %v406_v17 = vpop.permute.xlu2 %405 }
 0x867   :  { %v408_v18 = vadd.f32 %v406_v17, %v398_v16  ;;  %v569_v16 = vld [vmem:[#allocation4 + $0xe] sm:$0x3] }
 0x869   :  { %1228 = vtanh.f32 %v408_v18 }
 0x86f   :  { %v1229_v19 = vpop.eup %1228 }
 0x870   :  { %411 = vrot.lane.b32.xlu0 %v1229_v19, %s1534_s12 }
 0x8e2   :  { %v412_v21 = vpop.permute.xlu0 %411 }
 0x8e3   :  { %v1699_v23 = vmul.f32 %v412_v21, %v397_v13 }
 0x8e5   :  { %v423_v24 = vpack.c.bf16 %v1699_v23, %v1699_v23 }
 0x8e7   :  { %425 = vrot.lane.b32.xlu1 %v423_v24, %s1531_s22 }
 0x959   :  { %v426_v25 = vpop.permute.xlu1 %425 }
 0x95a   :  { %1157 = vmatmul.msk.bf16.vlgmr.msrb.gmra.mxu1 %vm226_vm2, %v426_v25 }
 0x9d7   :  { %v439_v27 = vpop.f32.mrf.mxu1 }
 0x9d8   :  { %v443_v28 = vadd.f32 %v439_v27, %v422_v26 }
 0x9da   :  { %1230 = vtanh.f32 %v443_v28 }
 0x9df   :  { %v441_v29 = vpop.f32.mrf.mxu1 }
 0x9e0   :  { %v1231_v30 = vpop.eup %1230 }
 0x9e1   :  { %v445_v31 = vmul.f32 %v1231_v30, %v1656_v20 }
 0x9e3   :  { %v446_v32 = vadd.f32 %v445_v31, %v1658_v22 }
 0x9e5   :  { %449 = vrot.lane.b32.xlu2 %v446_v32, %s1534_s12  ;;  %v447_v36 = vmul.f32 %v446_v32, %v408_v18 }
 0xa3f   :  { %v450_v33 = vpop.permute.xlu2 %449 }
 0xa40   :  { %v452_v35 = vmul.f32 %v450_v33, %v446_v32 }
 0xa42   :  { %454 = vrot.lane.b32.xlu0 %v452_v35, %s1531_s22  ;;  %v1191_v35 = vld [vmem:[#allocation14 + $0x8] sm:$0xff] }
 0xa43   :  { %655 = vmatpush.bf16.msra.mxu1 %v1191_v35 }
 0xab4   :  { %v455_v37 = vpop.permute.xlu0 %454 }
 0xab5   :  { %v457_v38 = vadd.f32 %v455_v37, %v447_v36  ;;  %v1193_v36 = vld [vmem:[#allocation16 + $0x8] sm:$0xff] }
 0xab6   :  { %696 = vmatpush.bf16.msra.mxu2 %v1193_v36  ;;  %747 = vmatpush.bf16.msra.mxu3 %v1193_v36 }
 0xab7   :  { %1232 = vtanh.f32 %v457_v38  ;;  %794 = vmatpush.bf16.msrb.mxu0 %v1193_v36 }
 0xabd   :  { %v1233_v39 = vpop.eup %1232 }
 0xabe   :  { %460 = vrot.lane.b32.xlu1 %v1233_v39, %s1534_s12 }
 0xb30   :  { %v461_v40 = vpop.permute.xlu1 %460 }
 0xb31   :  { %v1710_v41 = vmul.f32 %v461_v40, %v446_v32 }
 0xb33   :  { %v472_v42 = vpack.c.bf16 %v1710_v41, %v1710_v41 }
 0xb35   :  { %474 = vrot.lane.b32.xlu2 %v472_v42, %s1531_s22  ;;  %v1192_v42 = vld [vmem:[#allocation16] sm:$0xff] }
 0xb36   :  { %697 = vmatpush.bf16.msra.mxu2 %v1192_v42  ;;  %748 = vmatpush.bf16.msra.mxu3 %v1192_v42 }
 0xb37   :  { %795 = vmatpush.bf16.msrb.mxu0 %v1192_v42 }
 0xb8f   :  { %v475_v43 = vpop.permute.xlu2 %474 }
 0xb90   :  { %1158 = vmatmul.msk.bf16.vlgmr.msrb.gmra.mxu2 %vm226_vm2, %v475_v43 }
 0xb91   :  { %888 = vmatpush.bf16.msrb.mxu2 %v1193_v36 }
 0xb95   :  { %889 = vmatpush.bf16.msrb.mxu2 %v1192_v42 }
 0xc13   :  { %v488_v45 = vpop.f32.mrf.mxu2 }
 0xc14   :  { %v492_v46 = vadd.f32 %v488_v45, %v471_v44  ;;  %v157_v45 = vld [vmem:[#allocation10 + $0x2] sm:$0x3] }
 0xc15   :  { %159 = vst.msk [vmem:[#allocation3 + $0x2] sm:$0x3] %vm153_vm0, %v157_v45 }
 0xc16   :  { %1234 = vtanh.f32 %v492_v46 }
 0xc1b   :  { %v490_v47 = vpop.f32.mrf.mxu2 }
 0xc1c   :  { %v1235_v48 = vpop.eup %1234  ;;  %v672_v46 = vld [vmem:[#allocation3 + $0x2] sm:$0x3] }
 0xc1d   :  { %v494_v49 = vmul.f32 %v1235_v48, %v1656_v20 }
 0xc1f   :  { %v495_v50 = vadd.f32 %v494_v49, %v1658_v22 }
 0xc21   :  { %498 = vrot.lane.b32.xlu0 %v495_v50, %s1534_s12  ;;  %v496_v54 = vmul.f32 %v495_v50, %v457_v38 }
 0xc93   :  { %v499_v52 = vpop.permute.xlu0 %498 }
 0xc94   :  { %v501_v53 = vmul.f32 %v499_v52, %v495_v50 }
 0xc96   :  { %503 = vrot.lane.b32.xlu1 %v501_v53, %s1531_s22 }
 0xd08   :  { %v504_v55 = vpop.permute.xlu1 %503 }
 0xd09   :  { %v506_v56 = vadd.f32 %v504_v55, %v496_v54  ;;  %v1213_v55 = vld [vmem:[%s1899_s8] ss:$0 sm:$0xff]  ;;  %s1542_s8 = smov 96  }
 0xd0b   :  { %1236 = vtanh.f32 %v506_v56 }
 0xd11   :  { %v1237_v57 = vpop.eup %1236 }
 0xd12   :  { %509 = vrot.lane.b32.xlu2 %v1237_v57, %s1534_s12 }
 0xd6c   :  { %v510_v58 = vpop.permute.xlu2 %509 }
 0xd6d   :  { %v512_v59 = vmul.f32 %v510_v58, %v495_v50 }
 0xd6f   :  { %v521_v60 = vpack.c.bf16 %v512_v59, %v512_v59 }
 0xd71   :  { %523 = vrot.lane.b32.xlu0 %v521_v60, %s1531_s22 }
 0xde3   :  { %v524_v61 = vpop.permute.xlu0 %523 }
 0xde4   :  { %1159 = vmatmul.msk.bf16.vlgmr.msrb.gmra.mxu3 %vm226_vm2, %v524_v61 }
 0xde5   :  { %935 = vmatpush.bf16.msrb.mxu3 %v1193_v36 }
 0xde9   :  { %936 = vmatpush.bf16.msrb.mxu3 %v1192_v42 }
 0xe67   :  { %v537_v63 = vpop.f32.mrf.mxu3 }
 0xe68   :  { %v541_v0 = vadd.f32 %v537_v63, %v520_v62 }
 0xe6a   :  { %1238 = vtanh.f32 %v541_v0 }
 0xe6f   :  { %v539_v1 = vpop.f32.mrf.mxu3 }
 0xe70   :  { %v1239_v2 = vpop.eup %1238 }
 0xe71   :  { %v543_v3 = vmul.f32 %v1239_v2, %v1656_v20 }
 0xe73   :  { %v544_v5 = vadd.f32 %v543_v3, %v1658_v22 }
 0xe75   :  { %547 = vrot.lane.b32.xlu1 %v544_v5, %s1534_s12  ;;  %v545_v8 = vmul.f32 %v544_v5, %v506_v56 }
 0xee7   :  { %v548_v6 = vpop.permute.xlu1 %547 }
 0xee8   :  { %v550_v7 = vmul.f32 %v548_v6, %v544_v5 }
 0xeea   :  { %552 = vrot.lane.b32.xlu2 %v550_v7, %s1531_s22 }
 0xf44   :  { %v553_v9 = vpop.permute.xlu2 %552 }
 0xf45   :  { %v555_v10 = vadd.f32 %v553_v9, %v545_v8 }
 0xf47   :  { %1240 = vtanh.f32 %v555_v10 }
 0xf4d   :  { %v1241_v11 = vpop.eup %1240 }
 0xf4e   :  { %558 = vrot.lane.b32.xlu0 %v1241_v11, %s1534_s12 }
 0xfc0   :  { %v559_v12 = vpop.permute.xlu0 %558 }
 0xfc1   :  { %v561_v13 = vmul.f32 %v559_v12, %v544_v5 }
 0xfc3   :  { %v570_v14 = vpack.c.bf16 %v561_v13, %v561_v13 }
 0xfc5   :  { %572 = vrot.lane.b32.xlu1 %v570_v14, %s1531_s22 }
0x1037   :  { %v573_v15 = vpop.permute.xlu1 %572 }
0x1038   :  { %1160 = vmatmul.msk.bf16.vlgmr.msra.gmra.mxu0 %vm226_vm2, %v573_v15 }
0x1039   :  { %982 = vmatpush.bf16.msra.mxu0 %v1193_v36 }
0x103d   :  { %983 = vmatpush.bf16.msra.mxu0 %v1192_v42 }
0x10b5   :  { %v586_v17 = vpop.f32.mrf.mxu0 }
0x10b6   :  { %v590_v18 = vadd.f32 %v586_v17, %v569_v16 }
0x10b8   :  { %1242 = vtanh.f32 %v590_v18 }
0x10bd   :  { %v588_v19 = vpop.f32.mrf.mxu0 }
0x10be   :  { %v1243_v21 = vpop.eup %1242 }
0x10bf   :  { %v592_v24 = vmul.f32 %v1243_v21, %v1656_v20 }
0x10c1   :  { %v593_v25 = vadd.f32 %v592_v24, %v1658_v22 }
0x10c3   :  { %596 = vrot.lane.b32.xlu2 %v593_v25, %s1534_s12 }
0x10cb   :  { %269 = vrot.lane.b32.xlu2 %v1666_v34, %s1531_s22 }
0x10d3   :  { %416 = vrot.lane.b32.xlu2 %v1699_v23, %s1531_s22  ;;  %v594_v23 = vmul.f32 %v593_v25, %v555_v10 }
0x10db   :  { %563 = vrot.lane.b32.xlu2 %v561_v13, %s1531_s22 }
0x10e3   :  { %708 = vrot.lane.b32.xlu2 %v672_v46, %s1531_s22 }
0x111d   :  { %v597_v26 = vpop.permute.xlu2 %596 }
0x111e   :  { %v599_v27 = vmul.f32 %v597_v26, %v593_v25 }
0x1120   :  { %601 = vrot.lane.b32.xlu0 %v599_v27, %s1531_s22 }
0x1125   :  { %v270_v28 = vpop.permute.xlu2 %269 }
0x1126   :  { %273 = vst.msk [vmem:[#allocation17] sm:$0x3] %vm153_vm0, %v270_v28 }
0x1128   :  { %318 = vrot.lane.b32.xlu0 %v1677_v51, %s1531_s22 }
0x112d   :  { %v417_v29 = vpop.permute.xlu2 %416 }
0x112e   :  { %420 = vst.msk [vmem:[#allocation17 + $0x6] sm:$0x3] %vm153_vm0, %v417_v29 }
0x1130   :  { %465 = vrot.lane.b32.xlu0 %v1710_v41, %s1531_s22  ;;  %v152_v41 = vld [vmem:[#allocation8 + $0x2] sm:$0x3] }
0x1131   :  { %155 = vst.msk [vmem:[#allocation2 + $0x2] sm:$0x3] %vm153_vm0, %v152_v41 }
0x1135   :  { %v564_v34 = vpop.permute.xlu2 %563 }
0x1136   :  { %567 = vst.msk [vmem:[#allocation17 + $0xc] sm:$0x3] %vm153_vm0, %v564_v34 }
0x1138   :  { %v670_v43 = vld [vmem:[#allocation2 + $0x2] sm:$0x3] }
0x1139   :  { %v674_v44 = vpack.c.bf16 %v670_v43, %v670_v43 }
0x113b   :  { %1178 = vmatmul.msk.bf16.vlgmr.msra.gmra.mxu2 %vm226_vm2, %v674_v44 }
0x113d   :  { %v709_v3 = vpop.permute.xlu2 %708 }
0x1192   :  { %v602_v30 = vpop.permute.xlu0 %601 }
0x1193   :  { %v1746_v31 = vadd.f32 %v602_v30, %v594_v23 }
0x1195   :  { %1244 = vtanh.f32 %v1746_v31 }
0x119a   :  { %v319_v32 = vpop.permute.xlu0 %318 }
0x119b   :  { %v1245_v33 = vpop.eup %1244  ;;  %322 = vst.msk [vmem:[#allocation17 + $0x2] sm:$0x3] %vm153_vm0, %v319_v32 }
0x119c   :  { %607 = vrot.lane.b32.xlu1 %v1245_v33, %s1534_s12 }
0x11a2   :  { %v466_v51 = vpop.permute.xlu0 %465 }
0x11a3   :  { %469 = vst.msk [vmem:[#allocation17 + $0x8] sm:$0x3] %vm153_vm0, %v466_v51 }
0x11a4   :  { %367 = vrot.lane.b32.xlu1 %v1688_v4, %s1531_s22  ;;  %v1190_v4 = vld [vmem:[#allocation14] sm:$0xff] }
0x11a5   :  { %656 = vmatpush.bf16.msra.mxu1 %v1190_v4 }
0x11a9   :  { %841 = vmatpush.bf16.msrb.mxu1 %v1193_v36 }
0x11ac   :  { %514 = vrot.lane.b32.xlu1 %v512_v59, %s1531_s22 }
0x11ad   :  { %842 = vmatpush.bf16.msrb.mxu1 %v1192_v42 }
0x11be   :  { %v699_v53 = vpop.f32.mrf.mxu2 }
0x11c6   :  { %v701_v54 = vpop.f32.mrf.mxu2 }
0x120e   :  { %v608_v37 = vpop.permute.xlu1 %607 }
0x120f   :  { %v610_v38 = vmul.f32 %v608_v37, %v593_v25 }
0x1211   :  { %612 = vrot.lane.b32.xlu0 %v610_v38, %s1531_s22 }
0x1216   :  { %v368_v39 = vpop.permute.xlu1 %367 }
0x1217   :  { %371 = vst.msk [vmem:[#allocation17 + $0x4] sm:$0x3] %vm153_vm0, %v368_v39 }
0x121e   :  { %v515_v40 = vpop.permute.xlu1 %514  ;;  %v623_v48 = vld [vmem:[#allocation17] sm:$0xff] }
0x121f   :  { %518 = vst.msk [vmem:[#allocation17 + $0xa] sm:$0x3] %vm153_vm0, %v515_v40 }
0x1283   :  { %v613_v47 = vpop.permute.xlu0 %612 }
0x1284   :  { %616 = vst.msk [vmem:[#allocation17 + $0xe] sm:$0x3] %vm153_vm0, %v613_v47 }
0x1285   :  { %617 = vst.msk [vmem:[#allocation2] sm:$0x3] %vm153_vm0, %v613_v47 }
0x128b   :  { %v624_v49 = vld [vmem:[#allocation17 + $0x8] sm:$0xff] }
0x128c   :  { %v625_v50 = vpack.c.bf16 %v624_v49, %v623_v48  ;;  %v1071_v52 = vld [vmem:[#allocation2] sm:$0x3] }
0x128d   :  { %1073 = vst.msk [vmem:[#allocation18] sm:$0x3] %vm153_vm0, %v1071_v52 }
0x128e   :  { %1169 = vmatmul.msk.bf16.vlgmr.msra.gmra.mxu1 %vm226_vm2, %v625_v50 }
0x128f   :  { %1029 = vmatpush.bf16.msra.mxu1 %v1193_v36 }
0x1293   :  { %1030 = vmatpush.bf16.msra.mxu1 %v1192_v42 }
0x130b   :  { %v658_v56 = vpop.f32.mrf.mxu1 }
0x130c   :  { %v659_v57 = vadd.f32 %v1213_v55, %v658_v56 }
0x130e   :  { %663 = vst [vmem:[#allocation4] sm:$0xff] %v659_v57 }
0x1313   :  { %v660_v58 = vpop.f32.mrf.mxu1 }
0x1314   :  { %v661_v59 = vadd.f32 %v1213_v55, %v660_v58 }
0x1315   :  { %v673_v60 = vld [vmem:[#allocation4] sm:$0x3]  ;;  %v733_v13 = vld [vmem:[#allocation4 + $0x2] sm:$0x3]  ;;  %v780_v32 = vld [vmem:[#allocation4 + $0x4] sm:$0x3] }
0x1316   :  { %v703_v61 = vadd.f32 %v699_v53, %v673_v60  ;;  %664 = vst [vmem:[#allocation4 + $0x8] sm:$0xff] %v661_v59  ;;  %v827_v48 = vld [vmem:[#allocation4 + $0x6] sm:$0x3] }
0x1318   :  { %1246 = vtanh.f32 %v703_v61 }
0x131e   :  { %v1247_v62 = vpop.eup %1246 }
0x131f   :  { %v705_v63 = vmul.f32 %v1247_v62, %v1656_v20 }
0x1321   :  { %v706_v0 = vadd.f32 %v705_v63, %v1658_v22 }
0x1323   :  { %713 = vrot.lane.b32.xlu1 %v706_v0, %s1534_s12  ;;  %v711_v5 = vmul.f32 %v709_v3, %v706_v0 }
0x1395   :  { %v714_v1 = vpop.permute.xlu1 %713 }
0x1396   :  { %v716_v2 = vmul.f32 %v714_v1, %v706_v0 }
0x1398   :  { %718 = vrot.lane.b32.xlu0 %v716_v2, %s1531_s22  ;;  %v874_v2 = vld [vmem:[#allocation4 + $0x8] sm:$0x3] }
0x140a   :  { %v719_v6 = vpop.permute.xlu0 %718 }
0x140b   :  { %v721_v7 = vadd.f32 %v719_v6, %v711_v5 }
0x140d   :  { %1248 = vtanh.f32 %v721_v7 }
0x1413   :  { %v1249_v8 = vpop.eup %1248 }
0x1414   :  { %724 = vrot.lane.b32.xlu1 %v1249_v8, %s1534_s12 }
0x1486   :  { %v725_v9 = vpop.permute.xlu1 %724 }
0x1487   :  { %v1774_v10 = vmul.f32 %v725_v9, %v706_v0 }
0x1489   :  { %v734_v11 = vpack.c.bf16 %v1774_v10, %v1774_v10 }
0x148b   :  { %736 = vrot.lane.b32.xlu2 %v734_v11, %s1531_s22 }
0x14e5   :  { %v737_v12 = vpop.permute.xlu2 %736 }
0x14e6   :  { %1179 = vmatmul.msk.bf16.vlgmr.msra.gmra.mxu3 %vm226_vm2, %v737_v12 }
0x1569   :  { %v750_v14 = vpop.f32.mrf.mxu3 }
0x156a   :  { %v754_v15 = vadd.f32 %v750_v14, %v733_v13 }
0x156c   :  { %1250 = vtanh.f32 %v754_v15 }
0x1571   :  { %v752_v16 = vpop.f32.mrf.mxu3 }
0x1572   :  { %v1251_v17 = vpop.eup %1250 }
0x1573   :  { %v756_v18 = vmul.f32 %v1251_v17, %v1656_v20 }
0x1575   :  { %v757_v19 = vadd.f32 %v756_v18, %v1658_v22 }
0x1577   :  { %760 = vrot.lane.b32.xlu0 %v757_v19, %s1534_s12  ;;  %v758_v25 = vmul.f32 %v757_v19, %v721_v7 }
0x15e9   :  { %v761_v21 = vpop.permute.xlu0 %760 }
0x15ea   :  { %v763_v24 = vmul.f32 %v761_v21, %v757_v19 }
0x15ec   :  { %765 = vrot.lane.b32.xlu1 %v763_v24, %s1531_s22  ;;  %v921_v24 = vld [vmem:[#allocation4 + $0xa] sm:$0x3] }
0x165e   :  { %v766_v26 = vpop.permute.xlu1 %765 }
0x165f   :  { %v768_v27 = vadd.f32 %v766_v26, %v758_v25 }
0x1661   :  { %1252 = vtanh.f32 %v768_v27 }
0x1667   :  { %v1253_v28 = vpop.eup %1252 }
0x1668   :  { %771 = vrot.lane.b32.xlu2 %v1253_v28, %s1534_s12 }
0x16c2   :  { %v772_v29 = vpop.permute.xlu2 %771 }
0x16c3   :  { %v1785_v34 = vmul.f32 %v772_v29, %v757_v19 }
0x16c5   :  { %v781_v23 = vpack.c.bf16 %v1785_v34, %v1785_v34 }
0x16c7   :  { %783 = vrot.lane.b32.xlu0 %v781_v23, %s1531_s22 }
0x1739   :  { %v784_v30 = vpop.permute.xlu0 %783 }
0x173a   :  { %1180 = vmatmul.msk.bf16.vlgmr.msrb.gmra.mxu0 %vm226_vm2, %v784_v30 }
0x17b7   :  { %v797_v33 = vpop.f32.mrf.mxu0 }
0x17b8   :  { %v801_v51 = vadd.f32 %v797_v33, %v780_v32 }
0x17ba   :  { %1254 = vtanh.f32 %v801_v51 }
0x17bf   :  { %v799_v35 = vpop.f32.mrf.mxu0 }
0x17c0   :  { %v1255_v36 = vpop.eup %1254 }
0x17c1   :  { %v803_v37 = vmul.f32 %v1255_v36, %v1656_v20 }
0x17c3   :  { %v804_v38 = vadd.f32 %v803_v37, %v1658_v22 }
0x17c5   :  { %807 = vrot.lane.b32.xlu1 %v804_v38, %s1534_s12  ;;  %v805_v41 = vmul.f32 %v804_v38, %v768_v27 }
0x1837   :  { %v808_v39 = vpop.permute.xlu1 %807 }
0x1838   :  { %v810_v40 = vmul.f32 %v808_v39, %v804_v38 }
0x183a   :  { %812 = vrot.lane.b32.xlu2 %v810_v40, %s1531_s22 }
0x1894   :  { %v813_v4 = vpop.permute.xlu2 %812 }
0x1895   :  { %v815_v42 = vadd.f32 %v813_v4, %v805_v41  ;;  %v968_v41 = vld [vmem:[#allocation4 + $0xc] sm:$0x3] }
0x1897   :  { %1256 = vtanh.f32 %v815_v42 }
0x189d   :  { %v1257_v43 = vpop.eup %1256 }
0x189e   :  { %818 = vrot.lane.b32.xlu0 %v1257_v43, %s1534_s12 }
0x1910   :  { %v819_v44 = vpop.permute.xlu0 %818 }
0x1911   :  { %v1796_v45 = vmul.f32 %v819_v44, %v804_v38 }
0x1913   :  { %v828_v46 = vpack.c.bf16 %v1796_v45, %v1796_v45 }
0x1915   :  { %830 = vrot.lane.b32.xlu1 %v828_v46, %s1531_s22 }
0x1987   :  { %v831_v47 = vpop.permute.xlu1 %830 }
0x1988   :  { %1181 = vmatmul.msk.bf16.vlgmr.msrb.gmra.mxu1 %vm226_vm2, %v831_v47 }
0x1a05   :  { %v844_v49 = vpop.f32.mrf.mxu1 }
0x1a06   :  { %v848_v50 = vadd.f32 %v844_v49, %v827_v48 }
0x1a08   :  { %1258 = vtanh.f32 %v848_v50 }
0x1a0d   :  { %v846_v52 = vpop.f32.mrf.mxu1 }
0x1a0e   :  { %v1259_v53 = vpop.eup %1258 }
0x1a0f   :  { %v850_v54 = vmul.f32 %v1259_v53, %v1656_v20 }
0x1a11   :  { %v851_v55 = vadd.f32 %v850_v54, %v1658_v22 }
0x1a13   :  { %854 = vrot.lane.b32.xlu2 %v851_v55, %s1534_s12  ;;  %v852_v58 = vmul.f32 %v851_v55, %v815_v42 }
0x1a6d   :  { %v855_v56 = vpop.permute.xlu2 %854 }
0x1a6e   :  { %v857_v57 = vmul.f32 %v855_v56, %v851_v55 }
0x1a70   :  { %859 = vrot.lane.b32.xlu0 %v857_v57, %s1531_s22 }
0x1ae2   :  { %v860_v59 = vpop.permute.xlu0 %859 }
0x1ae3   :  { %v862_v60 = vadd.f32 %v860_v59, %v852_v58  ;;  %v1015_v59 = vld [vmem:[#allocation4 + $0xe] sm:$0x3] }
0x1ae5   :  { %1260 = vtanh.f32 %v862_v60 }
0x1aeb   :  { %v1261_v61 = vpop.eup %1260 }
0x1aec   :  { %865 = vrot.lane.b32.xlu1 %v1261_v61, %s1534_s12 }
0x1b5e   :  { %v866_v62 = vpop.permute.xlu1 %865 }
0x1b5f   :  { %v1807_v63 = vmul.f32 %v866_v62, %v851_v55 }
0x1b61   :  { %v875_v0 = vpack.c.bf16 %v1807_v63, %v1807_v63 }
0x1b63   :  { %877 = vrot.lane.b32.xlu2 %v875_v0, %s1531_s22 }
0x1bbd   :  { %v878_v1 = vpop.permute.xlu2 %877 }
0x1bbe   :  { %1182 = vmatmul.msk.bf16.vlgmr.msrb.gmra.mxu2 %vm226_vm2, %v878_v1 }
0x1c41   :  { %v891_v3 = vpop.f32.mrf.mxu2 }
0x1c42   :  { %v895_v5 = vadd.f32 %v891_v3, %v874_v2 }
0x1c44   :  { %1262 = vtanh.f32 %v895_v5 }
0x1c49   :  { %v893_v6 = vpop.f32.mrf.mxu2 }
0x1c4a   :  { %v1263_v7 = vpop.eup %1262 }
0x1c4b   :  { %v897_v8 = vmul.f32 %v1263_v7, %v1656_v20 }
0x1c4d   :  { %v898_v9 = vadd.f32 %v897_v8, %v1658_v22 }
0x1c4f   :  { %901 = vrot.lane.b32.xlu0 %v898_v9, %s1534_s12  ;;  %v899_v13 = vmul.f32 %v898_v9, %v862_v60 }
0x1cc1   :  { %v902_v11 = vpop.permute.xlu0 %901 }
0x1cc2   :  { %v904_v12 = vmul.f32 %v902_v11, %v898_v9 }
0x1cc4   :  { %906 = vrot.lane.b32.xlu1 %v904_v12, %s1531_s22 }
0x1d36   :  { %v907_v14 = vpop.permute.xlu1 %906 }
0x1d37   :  { %v909_v15 = vadd.f32 %v907_v14, %v899_v13 }
0x1d39   :  { %1264 = vtanh.f32 %v909_v15 }
0x1d3f   :  { %v1265_v16 = vpop.eup %1264 }
0x1d40   :  { %912 = vrot.lane.b32.xlu2 %v1265_v16, %s1534_s12 }
0x1d9a   :  { %v913_v17 = vpop.permute.xlu2 %912 }
0x1d9b   :  { %v1818_v18 = vmul.f32 %v913_v17, %v898_v9 }
0x1d9d   :  { %v922_v19 = vpack.c.bf16 %v1818_v18, %v1818_v18 }
0x1d9f   :  { %924 = vrot.lane.b32.xlu0 %v922_v19, %s1531_s22 }
0x1e11   :  { %v925_v21 = vpop.permute.xlu0 %924 }
0x1e12   :  { %1183 = vmatmul.msk.bf16.vlgmr.msrb.gmra.mxu3 %vm226_vm2, %v925_v21 }
0x1e95   :  { %v938_v25 = vpop.f32.mrf.mxu3 }
0x1e96   :  { %v942_v26 = vadd.f32 %v938_v25, %v921_v24 }
0x1e98   :  { %1266 = vtanh.f32 %v942_v26 }
0x1e9d   :  { %v940_v27 = vpop.f32.mrf.mxu3 }
0x1e9e   :  { %v1267_v28 = vpop.eup %1266 }
0x1e9f   :  { %v944_v29 = vmul.f32 %v1267_v28, %v1656_v20 }
0x1ea1   :  { %v945_v23 = vadd.f32 %v944_v29, %v1658_v22 }
0x1ea3   :  { %948 = vrot.lane.b32.xlu1 %v945_v23, %s1534_s12  ;;  %v946_v33 = vmul.f32 %v945_v23, %v909_v15 }
0x1f15   :  { %v949_v30 = vpop.permute.xlu1 %948 }
0x1f16   :  { %v951_v32 = vmul.f32 %v949_v30, %v945_v23 }
0x1f18   :  { %953 = vrot.lane.b32.xlu2 %v951_v32, %s1531_s22 }
0x1f72   :  { %v954_v51 = vpop.permute.xlu2 %953 }
0x1f73   :  { %v956_v35 = vadd.f32 %v954_v51, %v946_v33 }
0x1f75   :  { %1268 = vtanh.f32 %v956_v35 }
0x1f7b   :  { %v1269_v36 = vpop.eup %1268 }
0x1f7c   :  { %959 = vrot.lane.b32.xlu0 %v1269_v36, %s1534_s12 }
0x1fee   :  { %v960_v37 = vpop.permute.xlu0 %959 }
0x1fef   :  { %v1829_v38 = vmul.f32 %v960_v37, %v945_v23 }
0x1ff1   :  { %v969_v39 = vpack.c.bf16 %v1829_v38, %v1829_v38 }
0x1ff3   :  { %971 = vrot.lane.b32.xlu1 %v969_v39, %s1531_s22 }
0x2065   :  { %v972_v40 = vpop.permute.xlu1 %971 }
0x2066   :  { %1184 = vmatmul.msk.bf16.vlgmr.msra.gmra.mxu0 %vm226_vm2, %v972_v40 }
0x20e3   :  { %v985_v4 = vpop.f32.mrf.mxu0 }
0x20e4   :  { %v989_v42 = vadd.f32 %v985_v4, %v968_v41 }
0x20e6   :  { %1270 = vtanh.f32 %v989_v42 }
0x20eb   :  { %v987_v43 = vpop.f32.mrf.mxu0 }
0x20ec   :  { %v1271_v44 = vpop.eup %1270 }
0x20ed   :  { %v991_v46 = vmul.f32 %v1271_v44, %v1656_v20 }
0x20ef   :  { %v992_v47 = vadd.f32 %v991_v46, %v1658_v22 }
0x20f1   :  { %995 = vrot.lane.b32.xlu2 %v992_v47, %s1534_s12  ;;  %v993_v50 = vmul.f32 %v992_v47, %v956_v35 }
0x214b   :  { %v996_v48 = vpop.permute.xlu2 %995 }
0x214c   :  { %v998_v49 = vmul.f32 %v996_v48, %v992_v47 }
0x214e   :  { %1000 = vrot.lane.b32.xlu0 %v998_v49, %s1531_s22 }
0x21c0   :  { %v1001_v52 = vpop.permute.xlu0 %1000 }
0x21c1   :  { %v1003_v53 = vadd.f32 %v1001_v52, %v993_v50 }
0x21c3   :  { %1272 = vtanh.f32 %v1003_v53 }
0x21c9   :  { %v1273_v54 = vpop.eup %1272 }
0x21ca   :  { %1006 = vrot.lane.b32.xlu1 %v1273_v54, %s1534_s12 }
0x223c   :  { %v1007_v55 = vpop.permute.xlu1 %1006 }
0x223d   :  { %v1009_v56 = vmul.f32 %v1007_v55, %v992_v47 }
0x223f   :  { %v1016_v57 = vpack.c.bf16 %v1009_v56, %v1009_v56 }
0x2241   :  { %1018 = vrot.lane.b32.xlu2 %v1016_v57, %s1531_s22 }
0x229b   :  { %v1019_v58 = vpop.permute.xlu2 %1018 }
0x229c   :  { %1185 = vmatmul.msk.bf16.vlgmr.msra.gmra.mxu1 %vm226_vm2, %v1019_v58 }
0x2319   :  { %v1032_v60 = vpop.f32.mrf.mxu1 }
0x231a   :  { %v1036_v61 = vadd.f32 %v1032_v60, %v1015_v59 }
0x231c   :  { %1274 = vtanh.f32 %v1036_v61 }
0x2321   :  { %v1034_v62 = vpop.f32.mrf.mxu1 }
0x2322   :  { %v1275_v0 = vpop.eup %1274 }
0x2323   :  { %v1038_v1 = vmul.f32 %v1275_v0, %v1656_v20 }
0x2325   :  { %v1039_v2 = vadd.f32 %v1038_v1, %v1658_v22 }
0x2327   :  { %1042 = vrot.lane.b32.xlu0 %v1039_v2, %s1534_s12  ;;  %v1040_v20 = vmul.f32 %v1039_v2, %v1003_v53 }
0x232f   :  { %729 = vrot.lane.b32.xlu0 %v1774_v10, %s1531_s22 }
0x2399   :  { %v1043_v3 = vpop.permute.xlu0 %1042 }
0x239a   :  { %v1045_v5 = vmul.f32 %v1043_v3, %v1039_v2 }
0x239c   :  { %1047 = vrot.lane.b32.xlu1 %v1045_v5, %s1531_s22 }
0x23a1   :  { %v730_v6 = vpop.permute.xlu0 %729 }
0x23a2   :  { %732 = vst.msk [vmem:[#allocation17] sm:$0x3] %vm153_vm0, %v730_v6 }
0x23a4   :  { %619 = vrot.lane.b32.xlu1 %v1746_v31, %s1542_s8 }
0x23ac   :  { %776 = vrot.lane.b32.xlu1 %v1785_v34, %s1531_s22 }
0x23b4   :  { %917 = vrot.lane.b32.xlu1 %v1818_v18, %s1531_s22 }
0x240e   :  { %v1048_v22 = vpop.permute.xlu1 %1047 }
0x240f   :  { %v1050_v7 = vadd.f32 %v1048_v22, %v1040_v20 }
0x2411   :  { %1276 = vtanh.f32 %v1050_v7 }
0x2416   :  { %v620_v10 = vpop.permute.xlu1 %619 }
0x2417   :  { %v1277_v8 = vpop.eup %1276  ;;  %622 = vst.msk [vmem:[#allocation3] sm:$0x3] %vm153_vm0, %v620_v10 }
0x2418   :  { %1053 = vrot.lane.b32.xlu2 %v1277_v8, %s1534_s12  ;;  %s1543_s12 = smov [#allocation18]  }
0x2419   :  { %s1096_s16 = sshll.u32 %s1543_s12, 4  ;;  %s1097_s16 = int_to_ptr.vmem [resolvable:$true] %s1096_s16 }
0x241e   :  { %v777_v9 = vpop.permute.xlu1 %776  ;;  %v1075_v11 = vld [vmem:[#allocation3] sm:$0x3] }
0x241f   :  { %779 = vst.msk [vmem:[#allocation17 + $0x2] sm:$0x3] %vm153_vm0, %v777_v9 }
0x2420   :  { %1064 = vrot.lane.b32.xlu2 %v1050_v7, %s1542_s8  ;;  %1077 = vst.msk [vmem:[#allocation20] sm:$0x3] %vm153_vm0, %v1075_v11 }
0x2426   :  { %v918_v31 = vpop.permute.xlu1 %917 }
0x2427   :  { %920 = vst.msk [vmem:[#allocation17 + $0x8] sm:$0x3] %vm153_vm0, %v918_v31 }
0x2428   :  { %823 = vrot.lane.b32.xlu2 %v1796_v45, %s1531_s22 }
0x2430   :  { %964 = vrot.lane.b32.xlu2 %v1829_v38, %s1531_s22 }
0x2472   :  { %v1054_v34 = vpop.permute.xlu2 %1053 }
0x2473   :  { %v1056_v12 = vmul.f32 %v1054_v34, %v1039_v2 }
0x2475   :  { %1058 = vrot.lane.b32.xlu0 %v1056_v12, %s1531_s22 }
0x247a   :  { %v1065_v13 = vpop.permute.xlu2 %1064 }
0x247b   :  { %1067 = vst.msk [vmem:[#allocation3 + $0x2] sm:$0x3] %vm153_vm0, %v1065_v13 }
0x247d   :  { %870 = vrot.lane.b32.xlu0 %v1807_v63, %s1531_s22 }
0x2482   :  { %v824_v14 = vpop.permute.xlu2 %823  ;;  %v1076_v15 = vld [vmem:[#allocation3 + $0x2] sm:$0x3] }
0x2483   :  { %826 = vst.msk [vmem:[#allocation17 + $0x4] sm:$0x3] %vm153_vm0, %v824_v14 }
0x2484   :  { %1078 = vst.msk [vmem:[#allocation20 + $0x2] sm:$0x3] %vm153_vm0, %v1076_v15 }
0x2485   :  { %1011 = vrot.lane.b32.xlu0 %v1009_v56, %s1531_s22 }
0x248a   :  { %v965_v45 = vpop.permute.xlu2 %964 }
0x248b   :  { %967 = vst.msk [vmem:[#allocation17 + $0xa] sm:$0x3] %vm153_vm0, %v965_v45 }
0x24e7   :  { %v1059_v16 = vpop.permute.xlu0 %1058 }
0x24e8   :  { %1061 = vst.msk [vmem:[#allocation17 + $0xe] sm:$0x3] %vm153_vm0, %v1059_v16 }
0x24e9   :  { %1062 = vst.msk [vmem:[#allocation2 + $0x2] sm:$0x3] %vm153_vm0, %v1059_v16 }
0x24ef   :  { %v871_v63 = vpop.permute.xlu0 %870 }
0x24f0   :  { %873 = vst.msk [vmem:[#allocation17 + $0x6] sm:$0x3] %vm153_vm0, %v871_v63  ;;  %v1072_v17 = vld [vmem:[#allocation2 + $0x2] sm:$0x3] }
0x24f1   :  { %1074 = vst.msk [vmem:[#allocation18 + $0x2] sm:$0x3] %vm153_vm0, %v1072_v17 }
0x24f2   :  { %1104 = dma.vmem_to_hbm [thread:$0]  %s1097_s16, 64, %s1099_s6, [#allocation19], %s1531_s22, %s1531_s22, %s1532_s23  }
0x24f3   :  { %1117 = dma.vmem_to_hbm [thread:$0]  %s1110_s19, 64, %s1112_s0, [#allocation19], %s1531_s22, %s1531_s22, %s1532_s23  }
0x24f7   :  { %v1012_v18 = vpop.permute.xlu0 %1011 }
0x24f8   :  { %1014 = vst.msk [vmem:[#allocation17 + $0xc] sm:$0x3] %vm153_vm0, %v1012_v18 }
0x24f9   :  { %1091 = dma.vmem_to_hbm [thread:$0]  %s1084_s25, 256, %s1086_s27, [#allocation7], %s1546_s11, %s1546_s11, %s1547_s28  }
0x24fa   :  { %1526 = dma.done.wait [#allocation7], 256  }
0x24fb   :  { %1527 = vsyncadd [#allocation7], 4294967040 }
0x24fc   :  { %1528 = dma.done.wait [#allocation19], 128  }
0x24fd   :  { %1529 = vsyncadd [#allocation19], 4294967168 }
0x24fe   :  { %1130 = vsyncpa [#allocation6], 1 }
0x24ff   :  { %1131 = vsyncpa [#allocation9], 1 }
0x2500   :  { %1132 = vsyncpa [#allocation12], 1 }
0x2501   :  { %1133 = vsyncpa [#allocation15], 1 }
0x2502   :  { %1134 = vsyncpa [#allocation7], 1 }
0x2503   :  { %1135 = vsyncpa [#allocation19], 1 }

// kernel: tpu_custom_call.1
= control target key start
LH: loop header
LB: loop body
LE: loop exit
PB: predicated region body
PF: predicated region fallthrough
CT: control target
= control target key end

     0   :  { %17 = vsyncpa [#allocation6], 0  ;;  %s1891_s0 = inlined_call_operand.hbm [shape: bf16[1,16,16], index: 0, kind: input, shape index: {}]   ;;  %s1892_s1 = inlined_call_operand.hbm [shape: f32[2,2,32], index: 1, kind: input, shape index: {}]   ;;  %s1893_s2 = inlined_call_operand.hbm [shape: f32[2,2,32], index: 2, kind: input, shape index: {}]   ;;  %s1894_s3 = inlined_call_operand.hbm [shape: bf16[16,128], index: 3, kind: input, shape index: {}]   ;;  %s1895_s4 = inlined_call_operand.hbm [shape: bf16[32,128], index: 4, kind: input, shape index: {}]   ;;  %s1896_s5 = inlined_call_operand.vmem [shape: f32[1,128], index: 5, kind: input, shape index: {}]   ;;  %s1897_s6 = inlined_call_operand.hbm [shape: bf16[32,128], index: 6, kind: input, shape index: {}]   ;;  %s1898_s7 = inlined_call_operand.hbm [shape: bf16[32,128], index: 7, kind: input, shape index: {}]   ;;  %s1899_s8 = inlined_call_operand.vmem [shape: f32[1,128], index: 8, kind: input, shape index: {}]   ;;  %s1900_s9 = inlined_call_operand.hbm [shape: f32[1,16,32], index: 9, kind: output, shape index: {0}]   ;;  %s1901_s10 = inlined_call_operand.hbm [shape: f32[2,2,32], index: 10, kind: output, shape index: {1}]   ;;  %s1902_s11 = inlined_call_operand.hbm [shape: f32[2,2,32], index: 11, kind: output, shape index: {2}]  }
   0x1   :  { %18 = vsyncpa [#allocation9], 0 }
   0x2   :  { %19 = vsyncpa [#allocation12], 0 }
   0x3   :  { %20 = vsyncpa [#allocation15], 0 }
   0x4   :  { %21 = vsyncpa [#allocation7], 0  ;;  %s40_s19 = sshll.u32 %s1892_s1, 4  ;;  %s41_s19 = int_to_ptr.hbm [resolvable:$true] %s40_s19 }
   0x5   :  { %22 = vsyncpa [#allocation19], 0  ;;  %s1530_s20 = smov [#allocation8]   ;;  %s1531_s22 = smov 32  }
   0x6   :  { %s42_s21 = sshll.u32 %s1530_s20, 4  ;;  %s1532_s23 = smov 2   ;;  %s43_s21 = int_to_ptr.vmem [resolvable:$true] %s42_s21 }
   0x7   :  { %48 = dma.hbm_to_vmem [thread:$0]  %s41_s19, 64, %s43_s21, [#allocation9], %s1531_s22, %s1531_s22, %s1532_s23  }
   0x8   :  { %s66_s26 = sshll.u32 %s1894_s3, 4  ;;  %s1533_s27 = smov [#allocation11]   ;;  %s67_s26 = int_to_ptr.hbm [resolvable:$true] %s66_s26 }
   0x9   :  { %s68_s28 = sshll.u32 %s1533_s27, 4  ;;  %s94_s30 = sshll.u32 %s1897_s6, 4  ;;  %s69_s28 = int_to_ptr.vmem [resolvable:$true] %s68_s28  ;;  %s95_s30 = int_to_ptr.hbm [resolvable:$true] %s94_s30 }
   0xa   :  { %s1534_s12 = smov 64   ;;  %s1535_s13 = smov 4  }
   0xb   :  { %74 = dma.hbm_to_vmem [thread:$0]  %s67_s26, 128, %s69_s28, [#allocation12], %s1534_s12, %s1534_s12, %s1535_s13  }
   0xc   :  { %s27_s16 = sshll.u32 %s1891_s0, 4  ;;  %s1536_s3 = smov [#allocation14]   ;;  %s28_s16 = int_to_ptr.hbm [resolvable:$true] %s27_s16 }
   0xd   :  { %s96_s17 = sshll.u32 %s1536_s3, 4  ;;  %s1537_s6 = smov [#allocation5]   ;;  %s97_s17 = int_to_ptr.vmem [resolvable:$true] %s96_s17 }
   0xe   :  { %102 = dma.hbm_to_vmem [thread:$0]  %s95_s30, 256, %s97_s17, [#allocation15], %s1534_s12, %s1534_s12, %s1535_s13  }
   0xf   :  { %s29_s18 = sshll.u32 %s1537_s6, 4  ;;  %s53_s21 = sshll.u32 %s1893_s2, 4  ;;  %s30_s18 = int_to_ptr.vmem [resolvable:$true] %s29_s18  ;;  %s54_s21 = int_to_ptr.hbm [resolvable:$true] %s53_s21 }
  0x10   :  { %35 = dma.hbm_to_vmem [thread:$0]  %s28_s16, 128, %s30_s18, [#allocation6], %s1534_s12, %s1534_s12, %s1535_s13  }
  0x11   :  { %s79_s25 = sshll.u32 %s1895_s4, 4  ;;  %s1538_s26 = smov [#allocation10]   ;;  %s80_s25 = int_to_ptr.hbm [resolvable:$true] %s79_s25 }
  0x12   :  { %s55_s27 = sshll.u32 %s1538_s26, 4  ;;  %s1539_s28 = smov [#allocation13]   ;;  %s56_s27 = int_to_ptr.vmem [resolvable:$true] %s55_s27 }
  0x13   :  { %61 = dma.hbm_to_vmem [thread:$0]  %s54_s21, 64, %s56_s27, [#allocation9], %s1531_s22, %s1531_s22, %s1532_s23  }
  0x14   :  { %s81_s2 = sshll.u32 %s1539_s28, 4  ;;  %s107_s30 = sshll.u32 %s1898_s7, 4  ;;  %s82_s2 = int_to_ptr.vmem [resolvable:$true] %s81_s2  ;;  %s108_s30 = int_to_ptr.hbm [resolvable:$true] %s107_s30 }
  0x15   :  { %87 = dma.hbm_to_vmem [thread:$0]  %s80_s25, 256, %s82_s2, [#allocation12], %s1534_s12, %s1534_s12, %s1535_s13  }
  0x16   :  { %s1540_s4 = smov [#allocation16]  }
  0x17   :  { %s109_s14 = sshll.u32 %s1540_s4, 4  ;;  %s110_s14 = int_to_ptr.vmem [resolvable:$true] %s109_s14 }
  0x18   :  { %115 = dma.hbm_to_vmem [thread:$0]  %s108_s30, 256, %s110_s14, [#allocation15], %s1534_s12, %s1534_s12, %s1535_s13  }
  0x19   :  { %1518 = dma.done.wait [#allocation6], 128  }
  0x1a   :  { %1519 = vsyncadd [#allocation6], 4294967168 }
  0x1b   :  { %1520 = dma.done.wait [#allocation9], 128  }
  0x1c   :  { %1521 = vsyncadd [#allocation9], 4294967168 }
  0x1d   :  { %1522 = dma.done.wait [#allocation12], 384  }
  0x1e   :  { %1523 = vsyncadd [#allocation12], 4294966912 }
  0x1f   :  { %1524 = dma.done.wait [#allocation15], 512  }
  0x20   :  { %1525 = vsyncadd [#allocation15], 4294966784  ;;  %vm153_vm0 = vcmask 254976   ;;  %v1187_v0 = vld [vmem:[#allocation11] sm:$0xff]  ;;  %v1189_v1 = vld [vmem:[#allocation13 + $0x8] sm:$0xff]  ;;  %vm186_vm1 = vcmask 130048   ;;  %v160_v11 = vlaneseq }
  0x21   :  { %v1186_v2 = vld [vmem:[#allocation5] sm:$0xff]  ;;  %v151_v3 = vld [vmem:[#allocation8] sm:$0x3]  ;;  %197 = vmatpush.bf16.msra.mxu0 %v1187_v0  ;;  %236 = vmatpush.bf16.msra.mxu1 %v1189_v1  ;;  %v1188_v4 = vld [vmem:[#allocation13] sm:$0xff]  ;;  %vm226_vm2 = vcmask 261120   ;;  %v1541_v19 = vmov 0.5  }
  0x22   :  { %154 = vst.msk [vmem:[#allocation2] sm:$0x3] %vm153_vm0, %v151_v3  ;;  %289 = vmatpush.bf16.msra.mxu2 %v1189_v1  ;;  %338 = vmatpush.bf16.msra.mxu3 %v1189_v1  ;;  %v156_v7 = vld [vmem:[#allocation10] sm:$0x3]  ;;  %v1212_v8 = vld [vmem:[%s1896_s5] ss:$0 sm:$0xff] }
  0x23   :  { %158 = vst.msk [vmem:[#allocation3] sm:$0x3] %vm153_vm0, %v156_v7  ;;  %v161_v12 = vand.u32 127, %v160_v11  ;;  %s1098_s6 = sshll.u32 %s1901_s10, 4  ;;  %s1544_s18 = smov [#allocation20]   ;;  %s1099_s6 = int_to_ptr.hbm [resolvable:$true] %s1098_s6 }
  0x24   :  { %1144 = vmatmul.msk.bf16.vlgmr.msra.gmra.mxu0 %vm186_vm1, %v1186_v2  ;;  %s1109_s19 = sshll.u32 %s1544_s18, 4  ;;  %s1111_s0 = sshll.u32 %s1902_s11, 4  ;;  %s1110_s19 = int_to_ptr.vmem [resolvable:$true] %s1109_s19  ;;  %s1112_s0 = int_to_ptr.hbm [resolvable:$true] %s1111_s0 }
  0x25   :  { %387 = vmatpush.bf16.msrb.mxu0 %v1189_v1  ;;  %237 = vmatpush.bf16.msra.mxu1 %v1188_v4  ;;  %vm162_vm3 = vcmp.ge.s32.totalorder %v161_v12, 64  ;;  %vm163_vm4 = vcmp.lt.s32.totalorder %v161_v12, 96  ;;  %s1545_s24 = smov [#allocation17]   ;;  %s1085_s27 = sshll.u32 %s1900_s9, 4  ;;  %s1086_s27 = int_to_ptr.hbm [resolvable:$true] %s1085_s27 }
  0x26   :  { %290 = vmatpush.bf16.msra.mxu2 %v1188_v4  ;;  %339 = vmatpush.bf16.msra.mxu3 %v1188_v4  ;;  %vm164_vm5 = vmand %vm162_vm3, %vm163_vm4  ;;  %s1083_s25 = sshll.u32 %s1545_s24, 4  ;;  %s1546_s11 = smov 128   ;;  %s1084_s25 = int_to_ptr.vmem [resolvable:$true] %s1083_s25 }
  0x27   :  { %v1656_v20 = vsel %vm164_vm5, 1.0, %v1541_v19  ;;  %v1658_v22 = vsel %vm164_vm5, 0.0, %v1541_v19  ;;  %s1547_s28 = smov 8  }
  0x29   :  { %388 = vmatpush.bf16.msrb.mxu0 %v1188_v4  ;;  %436 = vmatpush.bf16.msrb.mxu1 %v1189_v1  ;;  %v210_v5 = vld [vmem:[#allocation2] sm:$0x3] }
  0x2a   :  { %485 = vmatpush.bf16.msrb.mxu2 %v1189_v1  ;;  %534 = vmatpush.bf16.msrb.mxu3 %v1189_v1  ;;  %v213_v6 = vpack.c.bf16 %v210_v5, %v210_v5  ;;  %v211_v25 = vld [vmem:[#allocation3] sm:$0x3] }
  0x2c   :  { %1153 = vmatmul.msk.bf16.vlgmr.msra.gmra.mxu1 %vm226_vm2, %v213_v6 }
  0x2d   :  { %583 = vmatpush.bf16.msra.mxu0 %v1189_v1  ;;  %437 = vmatpush.bf16.msrb.mxu1 %v1188_v4 }
  0x2e   :  { %486 = vmatpush.bf16.msrb.mxu2 %v1188_v4  ;;  %535 = vmatpush.bf16.msrb.mxu3 %v1188_v4 }
  0x31   :  { %584 = vmatpush.bf16.msra.mxu0 %v1188_v4 }
  0xa1   :  { %v199_v9 = vpop.f32.mrf.mxu0 }
  0xa2   :  { %v200_v10 = vadd.f32 %v1212_v8, %v199_v9 }
  0xa4   :  { %204 = vst [vmem:[#allocation4] sm:$0xff] %v200_v10 }
  0xa9   :  { %v239_v13 = vpop.f32.mrf.mxu1  ;;  %v201_v14 = vpop.f32.mrf.mxu0 }
  0xaa   :  { %v202_v15 = vadd.f32 %v1212_v8, %v201_v14 }
  0xab   :  { %v212_v16 = vld [vmem:[#allocation4] sm:$0x3]  ;;  %v275_v37 = vld [vmem:[#allocation4 + $0x2] sm:$0x3]  ;;  %v324_v54 = vld [vmem:[#allocation4 + $0x4] sm:$0x3] }
  0xac   :  { %v243_v17 = vadd.f32 %v239_v13, %v212_v16  ;;  %205 = vst [vmem:[#allocation4 + $0x8] sm:$0xff] %v202_v15  ;;  %v373_v7 = vld [vmem:[#allocation4 + $0x6] sm:$0x3] }
  0xae   :  { %1214 = vtanh.f32 %v243_v17 }
  0xb1   :  { %v241_v18 = vpop.f32.mrf.mxu1 }
  0xb4   :  { %v1215_v21 = vpop.eup %1214 }
  0xb5   :  { %v245_v23 = vmul.f32 %v1215_v21, %v1656_v20 }
  0xb7   :  { %v246_v24 = vadd.f32 %v245_v23, %v1658_v22 }
  0xb9   :  { %253 = vrot.lane.b32.xlu0 %v246_v24, %s1534_s12 }
  0xc1   :  { %248 = vrot.lane.b32.xlu0 %v211_v25, %s1531_s22 }
 0x12b   :  { %v254_v26 = vpop.permute.xlu0 %253 }
 0x12c   :  { %v256_v27 = vmul.f32 %v254_v26, %v246_v24  ;;  %v422_v26 = vld [vmem:[#allocation4 + $0x8] sm:$0x3] }
 0x12e   :  { %258 = vrot.lane.b32.xlu1 %v256_v27, %s1531_s22 }
 0x133   :  { %v249_v28 = vpop.permute.xlu0 %248 }
 0x134   :  { %v251_v29 = vmul.f32 %v249_v28, %v246_v24 }
 0x1a0   :  { %v259_v30 = vpop.permute.xlu1 %258 }
 0x1a1   :  { %v261_v31 = vadd.f32 %v259_v30, %v251_v29 }
 0x1a3   :  { %1216 = vtanh.f32 %v261_v31 }
 0x1a9   :  { %v1217_v32 = vpop.eup %1216 }
 0x1aa   :  { %264 = vrot.lane.b32.xlu1 %v1217_v32, %s1534_s12 }
 0x21c   :  { %v265_v33 = vpop.permute.xlu1 %264 }
 0x21d   :  { %v1666_v34 = vmul.f32 %v265_v33, %v246_v24 }
 0x21f   :  { %v276_v35 = vpack.c.bf16 %v1666_v34, %v1666_v34 }
 0x221   :  { %278 = vrot.lane.b32.xlu2 %v276_v35, %s1531_s22 }
 0x27b   :  { %v279_v36 = vpop.permute.xlu2 %278 }
 0x27c   :  { %1154 = vmatmul.msk.bf16.vlgmr.msra.gmra.mxu2 %vm226_vm2, %v279_v36 }
 0x2ff   :  { %v292_v38 = vpop.f32.mrf.mxu2 }
 0x300   :  { %v296_v39 = vadd.f32 %v292_v38, %v275_v37 }
 0x302   :  { %1218 = vtanh.f32 %v296_v39 }
 0x307   :  { %v294_v40 = vpop.f32.mrf.mxu2 }
 0x308   :  { %v1219_v41 = vpop.eup %1218 }
 0x309   :  { %v298_v42 = vmul.f32 %v1219_v41, %v1656_v20 }
 0x30b   :  { %v299_v43 = vadd.f32 %v298_v42, %v1658_v22 }
 0x30d   :  { %302 = vrot.lane.b32.xlu2 %v299_v43, %s1534_s12  ;;  %v300_v46 = vmul.f32 %v299_v43, %v261_v31 }
 0x367   :  { %v303_v44 = vpop.permute.xlu2 %302 }
 0x368   :  { %v305_v45 = vmul.f32 %v303_v44, %v299_v43  ;;  %v471_v44 = vld [vmem:[#allocation4 + $0xa] sm:$0x3] }
 0x36a   :  { %307 = vrot.lane.b32.xlu0 %v305_v45, %s1531_s22 }
 0x3dc   :  { %v308_v47 = vpop.permute.xlu0 %307 }
 0x3dd   :  { %v310_v48 = vadd.f32 %v308_v47, %v300_v46 }
 0x3df   :  { %1220 = vtanh.f32 %v310_v48 }
 0x3e5   :  { %v1221_v49 = vpop.eup %1220 }
 0x3e6   :  { %313 = vrot.lane.b32.xlu1 %v1221_v49, %s1534_s12 }
 0x458   :  { %v314_v50 = vpop.permute.xlu1 %313 }
 0x459   :  { %v1677_v51 = vmul.f32 %v314_v50, %v299_v43 }
 0x45b   :  { %v325_v52 = vpack.c.bf16 %v1677_v51, %v1677_v51 }
 0x45d   :  { %327 = vrot.lane.b32.xlu2 %v325_v52, %s1531_s22 }
 0x4b7   :  { %v328_v53 = vpop.permute.xlu2 %327 }
 0x4b8   :  { %1155 = vmatmul.msk.bf16.vlgmr.msra.gmra.mxu3 %vm226_vm2, %v328_v53 }
 0x53b   :  { %v341_v55 = vpop.f32.mrf.mxu3 }
 0x53c   :  { %v345_v56 = vadd.f32 %v341_v55, %v324_v54 }
 0x53e   :  { %1222 = vtanh.f32 %v345_v56 }
 0x543   :  { %v343_v57 = vpop.f32.mrf.mxu3 }
 0x544   :  { %v1223_v58 = vpop.eup %1222 }
 0x545   :  { %v347_v59 = vmul.f32 %v1223_v58, %v1656_v20 }
 0x547   :  { %v348_v60 = vadd.f32 %v347_v59, %v1658_v22 }
 0x549   :  { %351 = vrot.lane.b32.xlu0 %v348_v60, %s1534_s12  ;;  %v349_v63 = vmul.f32 %v348_v60, %v310_v48 }
 0x5bb   :  { %v352_v61 = vpop.permute.xlu0 %351 }
 0x5bc   :  { %v354_v62 = vmul.f32 %v352_v61, %v348_v60 }
 0x5be   :  { %356 = vrot.lane.b32.xlu1 %v354_v62, %s1531_s22  ;;  %v520_v62 = vld [vmem:[#allocation4 + $0xc] sm:$0x3] }
 0x630   :  { %v357_v0 = vpop.permute.xlu1 %356 }
 0x631   :  { %v359_v1 = vadd.f32 %v357_v0, %v349_v63 }
 0x633   :  { %1224 = vtanh.f32 %v359_v1 }
 0x639   :  { %v1225_v2 = vpop.eup %1224 }
 0x63a   :  { %362 = vrot.lane.b32.xlu2 %v1225_v2, %s1534_s12 }
 0x694   :  { %v363_v3 = vpop.permute.xlu2 %362 }
 0x695   :  { %v1688_v4 = vmul.f32 %v363_v3, %v348_v60 }
 0x697   :  { %v374_v5 = vpack.c.bf16 %v1688_v4, %v1688_v4 }
 0x699   :  { %376 = vrot.lane.b32.xlu0 %v374_v5, %s1531_s22 }
 0x70b   :  { %v377_v6 = vpop.permute.xlu0 %376 }
 0x70c   :  { %1156 = vmatmul.msk.bf16.vlgmr.msrb.gmra.mxu0 %vm226_vm2, %v377_v6 }
 0x789   :  { %v390_v8 = vpop.f32.mrf.mxu0 }
 0x78a   :  { %v394_v9 = vadd.f32 %v390_v8, %v373_v7 }
 0x78c   :  { %1226 = vtanh.f32 %v394_v9 }
 0x791   :  { %v392_v10 = vpop.f32.mrf.mxu0 }
 0x792   :  { %v1227_v11 = vpop.eup %1226 }
 0x793   :  { %v396_v12 = vmul.f32 %v1227_v11, %v1656_v20 }
 0x795   :  { %v397_v13 = vadd.f32 %v396_v12, %v1658_v22 }
 0x797   :  { %400 = vrot.lane.b32.xlu1 %v397_v13, %s1534_s12  ;;  %v398_v16 = vmul.f32 %v397_v13, %v359_v1 }
 0x809   :  { %v401_v14 = vpop.permute.xlu1 %400 }
 0x80a   :  { %v403_v15 = vmul.f32 %v401_v14, %v397_v13 }
 0x80c   :  { %405 = vrot.lane.b32.xlu2 %v403_v15, %s1531_s22 }
 0x866   :  { %v406_v17 = vpop.permute.xlu2 %405 }
 0x867   :  { %v408_v18 = vadd.f32 %v406_v17, %v398_v16  ;;  %v569_v16 = vld [vmem:[#allocation4 + $0xe] sm:$0x3] }
 0x869   :  { %1228 = vtanh.f32 %v408_v18 }
 0x86f   :  { %v1229_v19 = vpop.eup %1228 }
 0x870   :  { %411 = vrot.lane.b32.xlu0 %v1229_v19, %s1534_s12 }
 0x8e2   :  { %v412_v21 = vpop.permute.xlu0 %411 }
 0x8e3   :  { %v1699_v23 = vmul.f32 %v412_v21, %v397_v13 }
 0x8e5   :  { %v423_v24 = vpack.c.bf16 %v1699_v23, %v1699_v23 }
 0x8e7   :  { %425 = vrot.lane.b32.xlu1 %v423_v24, %s1531_s22 }
 0x959   :  { %v426_v25 = vpop.permute.xlu1 %425 }
 0x95a   :  { %1157 = vmatmul.msk.bf16.vlgmr.msrb.gmra.mxu1 %vm226_vm2, %v426_v25 }
 0x9d7   :  { %v439_v27 = vpop.f32.mrf.mxu1 }
 0x9d8   :  { %v443_v28 = vadd.f32 %v439_v27, %v422_v26 }
 0x9da   :  { %1230 = vtanh.f32 %v443_v28 }
 0x9df   :  { %v441_v29 = vpop.f32.mrf.mxu1 }
 0x9e0   :  { %v1231_v30 = vpop.eup %1230 }
 0x9e1   :  { %v445_v31 = vmul.f32 %v1231_v30, %v1656_v20 }
 0x9e3   :  { %v446_v32 = vadd.f32 %v445_v31, %v1658_v22 }
 0x9e5   :  { %449 = vrot.lane.b32.xlu2 %v446_v32, %s1534_s12  ;;  %v447_v36 = vmul.f32 %v446_v32, %v408_v18 }
 0xa3f   :  { %v450_v33 = vpop.permute.xlu2 %449 }
 0xa40   :  { %v452_v35 = vmul.f32 %v450_v33, %v446_v32 }
 0xa42   :  { %454 = vrot.lane.b32.xlu0 %v452_v35, %s1531_s22  ;;  %v1191_v35 = vld [vmem:[#allocation14 + $0x8] sm:$0xff] }
 0xa43   :  { %655 = vmatpush.bf16.msra.mxu1 %v1191_v35 }
 0xab4   :  { %v455_v37 = vpop.permute.xlu0 %454 }
 0xab5   :  { %v457_v38 = vadd.f32 %v455_v37, %v447_v36  ;;  %v1193_v36 = vld [vmem:[#allocation16 + $0x8] sm:$0xff] }
 0xab6   :  { %696 = vmatpush.bf16.msra.mxu2 %v1193_v36  ;;  %747 = vmatpush.bf16.msra.mxu3 %v1193_v36 }
 0xab7   :  { %1232 = vtanh.f32 %v457_v38  ;;  %794 = vmatpush.bf16.msrb.mxu0 %v1193_v36 }
 0xabd   :  { %v1233_v39 = vpop.eup %1232 }
 0xabe   :  { %460 = vrot.lane.b32.xlu1 %v1233_v39, %s1534_s12 }
 0xb30   :  { %v461_v40 = vpop.permute.xlu1 %460 }
 0xb31   :  { %v1710_v41 = vmul.f32 %v461_v40, %v446_v32 }
 0xb33   :  { %v472_v42 = vpack.c.bf16 %v1710_v41, %v1710_v41 }
 0xb35   :  { %474 = vrot.lane.b32.xlu2 %v472_v42, %s1531_s22  ;;  %v1192_v42 = vld [vmem:[#allocation16] sm:$0xff] }
 0xb36   :  { %697 = vmatpush.bf16.msra.mxu2 %v1192_v42  ;;  %748 = vmatpush.bf16.msra.mxu3 %v1192_v42 }
 0xb37   :  { %795 = vmatpush.bf16.msrb.mxu0 %v1192_v42 }
 0xb8f   :  { %v475_v43 = vpop.permute.xlu2 %474 }
 0xb90   :  { %1158 = vmatmul.msk.bf16.vlgmr.msrb.gmra.mxu2 %vm226_vm2, %v475_v43 }
 0xb91   :  { %888 = vmatpush.bf16.msrb.mxu2 %v1193_v36 }
 0xb95   :  { %889 = vmatpush.bf16.msrb.mxu2 %v1192_v42 }
 0xc13   :  { %v488_v45 = vpop.f32.mrf.mxu2 }
 0xc14   :  { %v492_v46 = vadd.f32 %v488_v45, %v471_v44  ;;  %v157_v45 = vld [vmem:[#allocation10 + $0x2] sm:$0x3] }
 0xc15   :  { %159 = vst.msk [vmem:[#allocation3 + $0x2] sm:$0x3] %vm153_vm0, %v157_v45 }
 0xc16   :  { %1234 = vtanh.f32 %v492_v46 }
 0xc1b   :  { %v490_v47 = vpop.f32.mrf.mxu2 }
 0xc1c   :  { %v1235_v48 = vpop.eup %1234  ;;  %v672_v46 = vld [vmem:[#allocation3 + $0x2] sm:$0x3] }
 0xc1d   :  { %v494_v49 = vmul.f32 %v1235_v48, %v1656_v20 }
 0xc1f   :  { %v495_v50 = vadd.f32 %v494_v49, %v1658_v22 }
 0xc21   :  { %498 = vrot.lane.b32.xlu0 %v495_v50, %s1534_s12  ;;  %v496_v54 = vmul.f32 %v495_v50, %v457_v38 }
 0xc93   :  { %v499_v52 = vpop.permute.xlu0 %498 }
 0xc94   :  { %v501_v53 = vmul.f32 %v499_v52, %v495_v50 }
 0xc96   :  { %503 = vrot.lane.b32.xlu1 %v501_v53, %s1531_s22 }
 0xd08   :  { %v504_v55 = vpop.permute.xlu1 %503 }
 0xd09   :  { %v506_v56 = vadd.f32 %v504_v55, %v496_v54  ;;  %v1213_v55 = vld [vmem:[%s1899_s8] ss:$0 sm:$0xff]  ;;  %s1542_s8 = smov 96  }
 0xd0b   :  { %1236 = vtanh.f32 %v506_v56 }
 0xd11   :  { %v1237_v57 = vpop.eup %1236 }
 0xd12   :  { %509 = vrot.lane.b32.xlu2 %v1237_v57, %s1534_s12 }
 0xd6c   :  { %v510_v58 = vpop.permute.xlu2 %509 }
 0xd6d   :  { %v512_v59 = vmul.f32 %v510_v58, %v495_v50 }
 0xd6f   :  { %v521_v60 = vpack.c.bf16 %v512_v59, %v512_v59 }
 0xd71   :  { %523 = vrot.lane.b32.xlu0 %v521_v60, %s1531_s22 }
 0xde3   :  { %v524_v61 = vpop.permute.xlu0 %523 }
 0xde4   :  { %1159 = vmatmul.msk.bf16.vlgmr.msrb.gmra.mxu3 %vm226_vm2, %v524_v61 }
 0xde5   :  { %935 = vmatpush.bf16.msrb.mxu3 %v1193_v36 }
 0xde9   :  { %936 = vmatpush.bf16.msrb.mxu3 %v1192_v42 }
 0xe67   :  { %v537_v63 = vpop.f32.mrf.mxu3 }
 0xe68   :  { %v541_v0 = vadd.f32 %v537_v63, %v520_v62 }
 0xe6a   :  { %1238 = vtanh.f32 %v541_v0 }
 0xe6f   :  { %v539_v1 = vpop.f32.mrf.mxu3 }
 0xe70   :  { %v1239_v2 = vpop.eup %1238 }
 0xe71   :  { %v543_v3 = vmul.f32 %v1239_v2, %v1656_v20 }
 0xe73   :  { %v544_v5 = vadd.f32 %v543_v3, %v1658_v22 }
 0xe75   :  { %547 = vrot.lane.b32.xlu1 %v544_v5, %s1534_s12  ;;  %v545_v8 = vmul.f32 %v544_v5, %v506_v56 }
 0xee7   :  { %v548_v6 = vpop.permute.xlu1 %547 }
 0xee8   :  { %v550_v7 = vmul.f32 %v548_v6, %v544_v5 }
 0xeea   :  { %552 = vrot.lane.b32.xlu2 %v550_v7, %s1531_s22 }
 0xf44   :  { %v553_v9 = vpop.permute.xlu2 %552 }
 0xf45   :  { %v555_v10 = vadd.f32 %v553_v9, %v545_v8 }
 0xf47   :  { %1240 = vtanh.f32 %v555_v10 }
 0xf4d   :  { %v1241_v11 = vpop.eup %1240 }
 0xf4e   :  { %558 = vrot.lane.b32.xlu0 %v1241_v11, %s1534_s12 }
 0xfc0   :  { %v559_v12 = vpop.permute.xlu0 %558 }
 0xfc1   :  { %v561_v13 = vmul.f32 %v559_v12, %v544_v5 }
 0xfc3   :  { %v570_v14 = vpack.c.bf16 %v561_v13, %v561_v13 }
 0xfc5   :  { %572 = vrot.lane.b32.xlu1 %v570_v14, %s1531_s22 }
0x1037   :  { %v573_v15 = vpop.permute.xlu1 %572 }
0x1038   :  { %1160 = vmatmul.msk.bf16.vlgmr.msra.gmra.mxu0 %vm226_vm2, %v573_v15 }
0x1039   :  { %982 = vmatpush.bf16.msra.mxu0 %v1193_v36 }
0x103d   :  { %983 = vmatpush.bf16.msra.mxu0 %v1192_v42 }
0x10b5   :  { %v586_v17 = vpop.f32.mrf.mxu0 }
0x10b6   :  { %v590_v18 = vadd.f32 %v586_v17, %v569_v16 }
0x10b8   :  { %1242 = vtanh.f32 %v590_v18 }
0x10bd   :  { %v588_v19 = vpop.f32.mrf.mxu0 }
0x10be   :  { %v1243_v21 = vpop.eup %1242 }
0x10bf   :  { %v592_v24 = vmul.f32 %v1243_v21, %v1656_v20 }
0x10c1   :  { %v593_v25 = vadd.f32 %v592_v24, %v1658_v22 }
0x10c3   :  { %596 = vrot.lane.b32.xlu2 %v593_v25, %s1534_s12 }
0x10cb   :  { %269 = vrot.lane.b32.xlu2 %v1666_v34, %s1531_s22 }
0x10d3   :  { %416 = vrot.lane.b32.xlu2 %v1699_v23, %s1531_s22  ;;  %v594_v23 = vmul.f32 %v593_v25, %v555_v10 }
0x10db   :  { %563 = vrot.lane.b32.xlu2 %v561_v13, %s1531_s22 }
0x10e3   :  { %708 = vrot.lane.b32.xlu2 %v672_v46, %s1531_s22 }
0x111d   :  { %v597_v26 = vpop.permute.xlu2 %596 }
0x111e   :  { %v599_v27 = vmul.f32 %v597_v26, %v593_v25 }
0x1120   :  { %601 = vrot.lane.b32.xlu0 %v599_v27, %s1531_s22 }
0x1125   :  { %v270_v28 = vpop.permute.xlu2 %269 }
0x1126   :  { %273 = vst.msk [vmem:[#allocation17] sm:$0x3] %vm153_vm0, %v270_v28 }
0x1128   :  { %318 = vrot.lane.b32.xlu0 %v1677_v51, %s1531_s22 }
0x112d   :  { %v417_v29 = vpop.permute.xlu2 %416 }
0x112e   :  { %420 = vst.msk [vmem:[#allocation17 + $0x6] sm:$0x3] %vm153_vm0, %v417_v29 }
0x1130   :  { %465 = vrot.lane.b32.xlu0 %v1710_v41, %s1531_s22  ;;  %v152_v41 = vld [vmem:[#allocation8 + $0x2] sm:$0x3] }
0x1131   :  { %155 = vst.msk [vmem:[#allocation2 + $0x2] sm:$0x3] %vm153_vm0, %v152_v41 }
0x1135   :  { %v564_v34 = vpop.permute.xlu2 %563 }
0x1136   :  { %567 = vst.msk [vmem:[#allocation17 + $0xc] sm:$0x3] %vm153_vm0, %v564_v34 }
0x1138   :  { %v670_v43 = vld [vmem:[#allocation2 + $0x2] sm:$0x3] }
0x1139   :  { %v674_v44 = vpack.c.bf16 %v670_v43, %v670_v43 }
0x113b   :  { %1178 = vmatmul.msk.bf16.vlgmr.msra.gmra.mxu2 %vm226_vm2, %v674_v44 }
0x113d   :  { %v709_v3 = vpop.permute.xlu2 %708 }
0x1192   :  { %v602_v30 = vpop.permute.xlu0 %601 }
0x1193   :  { %v1746_v31 = vadd.f32 %v602_v30, %v594_v23 }
0x1195   :  { %1244 = vtanh.f32 %v1746_v31 }
0x119a   :  { %v319_v32 = vpop.permute.xlu0 %318 }
0x119b   :  { %v1245_v33 = vpop.eup %1244  ;;  %322 = vst.msk [vmem:[#allocation17 + $0x2] sm:$0x3] %vm153_vm0, %v319_v32 }
0x119c   :  { %607 = vrot.lane.b32.xlu1 %v1245_v33, %s1534_s12 }
0x11a2   :  { %v466_v51 = vpop.permute.xlu0 %465 }
0x11a3   :  { %469 = vst.msk [vmem:[#allocation17 + $0x8] sm:$0x3] %vm153_vm0, %v466_v51 }
0x11a4   :  { %367 = vrot.lane.b32.xlu1 %v1688_v4, %s1531_s22  ;;  %v1190_v4 = vld [vmem:[#allocation14] sm:$0xff] }
0x11a5   :  { %656 = vmatpush.bf16.msra.mxu1 %v1190_v4 }
0x11a9   :  { %841 = vmatpush.bf16.msrb.mxu1 %v1193_v36 }
0x11ac   :  { %514 = vrot.lane.b32.xlu1 %v512_v59, %s1531_s22 }
0x11ad   :  { %842 = vmatpush.bf16.msrb.mxu1 %v1192_v42 }
0x11be   :  { %v699_v53 = vpop.f32.mrf.mxu2 }
0x11c6   :  { %v701_v54 = vpop.f32.mrf.mxu2 }
0x120e   :  { %v608_v37 = vpop.permute.xlu1 %607 }
0x120f   :  { %v610_v38 = vmul.f32 %v608_v37, %v593_v25 }
0x1211   :  { %612 = vrot.lane.b32.xlu0 %v610_v38, %s1531_s22 }
0x1216   :  { %v368_v39 = vpop.permute.xlu1 %367 }
0x1217   :  { %371 = vst.msk [vmem:[#allocation17 + $0x4] sm:$0x3] %vm153_vm0, %v368_v39 }
0x121e   :  { %v515_v40 = vpop.permute.xlu1 %514  ;;  %v623_v48 = vld [vmem:[#allocation17] sm:$0xff] }
0x121f   :  { %518 = vst.msk [vmem:[#allocation17 + $0xa] sm:$0x3] %vm153_vm0, %v515_v40 }
0x1283   :  { %v613_v47 = vpop.permute.xlu0 %612 }
0x1284   :  { %616 = vst.msk [vmem:[#allocation17 + $0xe] sm:$0x3] %vm153_vm0, %v613_v47 }
0x1285   :  { %617 = vst.msk [vmem:[#allocation2] sm:$0x3] %vm153_vm0, %v613_v47 }
0x128b   :  { %v624_v49 = vld [vmem:[#allocation17 + $0x8] sm:$0xff] }
0x128c   :  { %v625_v50 = vpack.c.bf16 %v624_v49, %v623_v48  ;;  %v1071_v52 = vld [vmem:[#allocation2] sm:$0x3] }
0x128d   :  { %1073 = vst.msk [vmem:[#allocation18] sm:$0x3] %vm153_vm0, %v1071_v52 }
0x128e   :  { %1169 = vmatmul.msk.bf16.vlgmr.msra.gmra.mxu1 %vm226_vm2, %v625_v50 }
0x128f   :  { %1029 = vmatpush.bf16.msra.mxu1 %v1193_v36 }
0x1293   :  { %1030 = vmatpush.bf16.msra.mxu1 %v1192_v42 }
0x130b   :  { %v658_v56 = vpop.f32.mrf.mxu1 }
0x130c   :  { %v659_v57 = vadd.f32 %v1213_v55, %v658_v56 }
0x130e   :  { %663 = vst [vmem:[#allocation4] sm:$0xff] %v659_v57 }
0x1313   :  { %v660_v58 = vpop.f32.mrf.mxu1 }
0x1314   :  { %v661_v59 = vadd.f32 %v1213_v55, %v660_v58 }
0x1315   :  { %v673_v60 = vld [vmem:[#allocation4] sm:$0x3]  ;;  %v733_v13 = vld [vmem:[#allocation4 + $0x2] sm:$0x3]  ;;  %v780_v32 = vld [vmem:[#allocation4 + $0x4] sm:$0x3] }
0x1316   :  { %v703_v61 = vadd.f32 %v699_v53, %v673_v60  ;;  %664 = vst [vmem:[#allocation4 + $0x8] sm:$0xff] %v661_v59  ;;  %v827_v48 = vld [vmem:[#allocation4 + $0x6] sm:$0x3] }
0x1318   :  { %1246 = vtanh.f32 %v703_v61 }
0x131e   :  { %v1247_v62 = vpop.eup %1246 }
0x131f   :  { %v705_v63 = vmul.f32 %v1247_v62, %v1656_v20 }
0x1321   :  { %v706_v0 = vadd.f32 %v705_v63, %v1658_v22 }
0x1323   :  { %713 = vrot.lane.b32.xlu1 %v706_v0, %s1534_s12  ;;  %v711_v5 = vmul.f32 %v709_v3, %v706_v0 }
0x1395   :  { %v714_v1 = vpop.permute.xlu1 %713 }
0x1396   :  { %v716_v2 = vmul.f32 %v714_v1, %v706_v0 }
0x1398   :  { %718 = vrot.lane.b32.xlu0 %v716_v2, %s1531_s22  ;;  %v874_v2 = vld [vmem:[#allocation4 + $0x8] sm:$0x3] }
0x140a   :  { %v719_v6 = vpop.permute.xlu0 %718 }
0x140b   :  { %v721_v7 = vadd.f32 %v719_v6, %v711_v5 }
0x140d   :  { %1248 = vtanh.f32 %v721_v7 }
0x1413   :  { %v1249_v8 = vpop.eup %1248 }
0x1414   :  { %724 = vrot.lane.b32.xlu1 %v1249_v8, %s1534_s12 }
0x1486   :  { %v725_v9 = vpop.permute.xlu1 %724 }
0x1487   :  { %v1774_v10 = vmul.f32 %v725_v9, %v706_v0 }
0x1489   :  { %v734_v11 = vpack.c.bf16 %v1774_v10, %v1774_v10 }
0x148b   :  { %736 = vrot.lane.b32.xlu2 %v734_v11, %s1531_s22 }
0x14e5   :  { %v737_v12 = vpop.permute.xlu2 %736 }
0x14e6   :  { %1179 = vmatmul.msk.bf16.vlgmr.msra.gmra.mxu3 %vm226_vm2, %v737_v12 }
0x1569   :  { %v750_v14 = vpop.f32.mrf.mxu3 }
0x156a   :  { %v754_v15 = vadd.f32 %v750_v14, %v733_v13 }
0x156c   :  { %1250 = vtanh.f32 %v754_v15 }
0x1571   :  { %v752_v16 = vpop.f32.mrf.mxu3 }
0x1572   :  { %v1251_v17 = vpop.eup %1250 }
0x1573   :  { %v756_v18 = vmul.f32 %v1251_v17, %v1656_v20 }
0x1575   :  { %v757_v19 = vadd.f32 %v756_v18, %v1658_v22 }
0x1577   :  { %760 = vrot.lane.b32.xlu0 %v757_v19, %s1534_s12  ;;  %v758_v25 = vmul.f32 %v757_v19, %v721_v7 }
0x15e9   :  { %v761_v21 = vpop.permute.xlu0 %760 }
0x15ea   :  { %v763_v24 = vmul.f32 %v761_v21, %v757_v19 }
0x15ec   :  { %765 = vrot.lane.b32.xlu1 %v763_v24, %s1531_s22  ;;  %v921_v24 = vld [vmem:[#allocation4 + $0xa] sm:$0x3] }
0x165e   :  { %v766_v26 = vpop.permute.xlu1 %765 }
0x165f   :  { %v768_v27 = vadd.f32 %v766_v26, %v758_v25 }
0x1661   :  { %1252 = vtanh.f32 %v768_v27 }
0x1667   :  { %v1253_v28 = vpop.eup %1252 }
0x1668   :  { %771 = vrot.lane.b32.xlu2 %v1253_v28, %s1534_s12 }
0x16c2   :  { %v772_v29 = vpop.permute.xlu2 %771 }
0x16c3   :  { %v1785_v34 = vmul.f32 %v772_v29, %v757_v19 }
0x16c5   :  { %v781_v23 = vpack.c.bf16 %v1785_v34, %v1785_v34 }
0x16c7   :  { %783 = vrot.lane.b32.xlu0 %v781_v23, %s1531_s22 }
0x1739   :  { %v784_v30 = vpop.permute.xlu0 %783 }
0x173a   :  { %1180 = vmatmul.msk.bf16.vlgmr.msrb.gmra.mxu0 %vm226_vm2, %v784_v30 }
0x17b7   :  { %v797_v33 = vpop.f32.mrf.mxu0 }
0x17b8   :  { %v801_v51 = vadd.f32 %v797_v33, %v780_v32 }
0x17ba   :  { %1254 = vtanh.f32 %v801_v51 }
0x17bf   :  { %v799_v35 = vpop.f32.mrf.mxu0 }
0x17c0   :  { %v1255_v36 = vpop.eup %1254 }
0x17c1   :  { %v803_v37 = vmul.f32 %v1255_v36, %v1656_v20 }
0x17c3   :  { %v804_v38 = vadd.f32 %v803_v37, %v1658_v22 }
0x17c5   :  { %807 = vrot.lane.b32.xlu1 %v804_v38, %s1534_s12  ;;  %v805_v41 = vmul.f32 %v804_v38, %v768_v27 }
0x1837   :  { %v808_v39 = vpop.permute.xlu1 %807 }
0x1838   :  { %v810_v40 = vmul.f32 %v808_v39, %v804_v38 }
0x183a   :  { %812 = vrot.lane.b32.xlu2 %v810_v40, %s1531_s22 }
0x1894   :  { %v813_v4 = vpop.permute.xlu2 %812 }
0x1895   :  { %v815_v42 = vadd.f32 %v813_v4, %v805_v41  ;;  %v968_v41 = vld [vmem:[#allocation4 + $0xc] sm:$0x3] }
0x1897   :  { %1256 = vtanh.f32 %v815_v42 }
0x189d   :  { %v1257_v43 = vpop.eup %1256 }
0x189e   :  { %818 = vrot.lane.b32.xlu0 %v1257_v43, %s1534_s12 }
0x1910   :  { %v819_v44 = vpop.permute.xlu0 %818 }
0x1911   :  { %v1796_v45 = vmul.f32 %v819_v44, %v804_v38 }
0x1913   :  { %v828_v46 = vpack.c.bf16 %v1796_v45, %v1796_v45 }
0x1915   :  { %830 = vrot.lane.b32.xlu1 %v828_v46, %s1531_s22 }
0x1987   :  { %v831_v47 = vpop.permute.xlu1 %830 }
0x1988   :  { %1181 = vmatmul.msk.bf16.vlgmr.msrb.gmra.mxu1 %vm226_vm2, %v831_v47 }
0x1a05   :  { %v844_v49 = vpop.f32.mrf.mxu1 }
0x1a06   :  { %v848_v50 = vadd.f32 %v844_v49, %v827_v48 }
0x1a08   :  { %1258 = vtanh.f32 %v848_v50 }
0x1a0d   :  { %v846_v52 = vpop.f32.mrf.mxu1 }
0x1a0e   :  { %v1259_v53 = vpop.eup %1258 }
0x1a0f   :  { %v850_v54 = vmul.f32 %v1259_v53, %v1656_v20 }
0x1a11   :  { %v851_v55 = vadd.f32 %v850_v54, %v1658_v22 }
0x1a13   :  { %854 = vrot.lane.b32.xlu2 %v851_v55, %s1534_s12  ;;  %v852_v58 = vmul.f32 %v851_v55, %v815_v42 }
0x1a6d   :  { %v855_v56 = vpop.permute.xlu2 %854 }
0x1a6e   :  { %v857_v57 = vmul.f32 %v855_v56, %v851_v55 }
0x1a70   :  { %859 = vrot.lane.b32.xlu0 %v857_v57, %s1531_s22 }
0x1ae2   :  { %v860_v59 = vpop.permute.xlu0 %859 }
0x1ae3   :  { %v862_v60 = vadd.f32 %v860_v59, %v852_v58  ;;  %v1015_v59 = vld [vmem:[#allocation4 + $0xe] sm:$0x3] }
0x1ae5   :  { %1260 = vtanh.f32 %v862_v60 }
0x1aeb   :  { %v1261_v61 = vpop.eup %1260 }
0x1aec   :  { %865 = vrot.lane.b32.xlu1 %v1261_v61, %s1534_s12 }
0x1b5e   :  { %v866_v62 = vpop.permute.xlu1 %865 }
0x1b5f   :  { %v1807_v63 = vmul.f32 %v866_v62, %v851_v55 }
0x1b61   :  { %v875_v0 = vpack.c.bf16 %v1807_v63, %v1807_v63 }
0x1b63   :  { %877 = vrot.lane.b32.xlu2 %v875_v0, %s1531_s22 }
0x1bbd   :  { %v878_v1 = vpop.permute.xlu2 %877 }
0x1bbe   :  { %1182 = vmatmul.msk.bf16.vlgmr.msrb.gmra.mxu2 %vm226_vm2, %v878_v1 }
0x1c41   :  { %v891_v3 = vpop.f32.mrf.mxu2 }
0x1c42   :  { %v895_v5 = vadd.f32 %v891_v3, %v874_v2 }
0x1c44   :  { %1262 = vtanh.f32 %v895_v5 }
0x1c49   :  { %v893_v6 = vpop.f32.mrf.mxu2 }
0x1c4a   :  { %v1263_v7 = vpop.eup %1262 }
0x1c4b   :  { %v897_v8 = vmul.f32 %v1263_v7, %v1656_v20 }
0x1c4d   :  { %v898_v9 = vadd.f32 %v897_v8, %v1658_v22 }
0x1c4f   :  { %901 = vrot.lane.b32.xlu0 %v898_v9, %s1534_s12  ;;  %v899_v13 = vmul.f32 %v898_v9, %v862_v60 }
0x1cc1   :  { %v902_v11 = vpop.permute.xlu0 %901 }
0x1cc2   :  { %v904_v12 = vmul.f32 %v902_v11, %v898_v9 }
0x1cc4   :  { %906 = vrot.lane.b32.xlu1 %v904_v12, %s1531_s22 }
0x1d36   :  { %v907_v14 = vpop.permute.xlu1 %906 }
0x1d37   :  { %v909_v15 = vadd.f32 %v907_v14, %v899_v13 }
0x1d39   :  { %1264 = vtanh.f32 %v909_v15 }
0x1d3f   :  { %v1265_v16 = vpop.eup %1264 }
0x1d40   :  { %912 = vrot.lane.b32.xlu2 %v1265_v16, %s1534_s12 }
0x1d9a   :  { %v913_v17 = vpop.permute.xlu2 %912 }
0x1d9b   :  { %v1818_v18 = vmul.f32 %v913_v17, %v898_v9 }
0x1d9d   :  { %v922_v19 = vpack.c.bf16 %v1818_v18, %v1818_v18 }
0x1d9f   :  { %924 = vrot.lane.b32.xlu0 %v922_v19, %s1531_s22 }
0x1e11   :  { %v925_v21 = vpop.permute.xlu0 %924 }
0x1e12   :  { %1183 = vmatmul.msk.bf16.vlgmr.msrb.gmra.mxu3 %vm226_vm2, %v925_v21 }
0x1e95   :  { %v938_v25 = vpop.f32.mrf.mxu3 }
0x1e96   :  { %v942_v26 = vadd.f32 %v938_v25, %v921_v24 }
0x1e98   :  { %1266 = vtanh.f32 %v942_v26 }
0x1e9d   :  { %v940_v27 = vpop.f32.mrf.mxu3 }
0x1e9e   :  { %v1267_v28 = vpop.eup %1266 }
0x1e9f   :  { %v944_v29 = vmul.f32 %v1267_v28, %v1656_v20 }
0x1ea1   :  { %v945_v23 = vadd.f32 %v944_v29, %v1658_v22 }
0x1ea3   :  { %948 = vrot.lane.b32.xlu1 %v945_v23, %s1534_s12  ;;  %v946_v33 = vmul.f32 %v945_v23, %v909_v15 }
0x1f15   :  { %v949_v30 = vpop.permute.xlu1 %948 }
0x1f16   :  { %v951_v32 = vmul.f32 %v949_v30, %v945_v23 }
0x1f18   :  { %953 = vrot.lane.b32.xlu2 %v951_v32, %s1531_s22 }
0x1f72   :  { %v954_v51 = vpop.permute.xlu2 %953 }
0x1f73   :  { %v956_v35 = vadd.f32 %v954_v51, %v946_v33 }
0x1f75   :  { %1268 = vtanh.f32 %v956_v35 }
0x1f7b   :  { %v1269_v36 = vpop.eup %1268 }
0x1f7c   :  { %959 = vrot.lane.b32.xlu0 %v1269_v36, %s1534_s12 }
0x1fee   :  { %v960_v37 = vpop.permute.xlu0 %959 }
0x1fef   :  { %v1829_v38 = vmul.f32 %v960_v37, %v945_v23 }
0x1ff1   :  { %v969_v39 = vpack.c.bf16 %v1829_v38, %v1829_v38 }
0x1ff3   :  { %971 = vrot.lane.b32.xlu1 %v969_v39, %s1531_s22 }
0x2065   :  { %v972_v40 = vpop.permute.xlu1 %971 }
0x2066   :  { %1184 = vmatmul.msk.bf16.vlgmr.msra.gmra.mxu0 %vm226_vm2, %v972_v40 }
0x20e3   :  { %v985_v4 = vpop.f32.mrf.mxu0 }
0x20e4   :  { %v989_v42 = vadd.f32 %v985_v4, %v968_v41 }
0x20e6   :  { %1270 = vtanh.f32 %v989_v42 }
0x20eb   :  { %v987_v43 = vpop.f32.mrf.mxu0 }
0x20ec   :  { %v1271_v44 = vpop.eup %1270 }
0x20ed   :  { %v991_v46 = vmul.f32 %v1271_v44, %v1656_v20 }
0x20ef   :  { %v992_v47 = vadd.f32 %v991_v46, %v1658_v22 }
0x20f1   :  { %995 = vrot.lane.b32.xlu2 %v992_v47, %s1534_s12  ;;  %v993_v50 = vmul.f32 %v992_v47, %v956_v35 }
0x214b   :  { %v996_v48 = vpop.permute.xlu2 %995 }
0x214c   :  { %v998_v49 = vmul.f32 %v996_v48, %v992_v47 }
0x214e   :  { %1000 = vrot.lane.b32.xlu0 %v998_v49, %s1531_s22 }
0x21c0   :  { %v1001_v52 = vpop.permute.xlu0 %1000 }
0x21c1   :  { %v1003_v53 = vadd.f32 %v1001_v52, %v993_v50 }
0x21c3   :  { %1272 = vtanh.f32 %v1003_v53 }
0x21c9   :  { %v1273_v54 = vpop.eup %1272 }
0x21ca   :  { %1006 = vrot.lane.b32.xlu1 %v1273_v54, %s1534_s12 }
0x223c   :  { %v1007_v55 = vpop.permute.xlu1 %1006 }
0x223d   :  { %v1009_v56 = vmul.f32 %v1007_v55, %v992_v47 }
0x223f   :  { %v1016_v57 = vpack.c.bf16 %v1009_v56, %v1009_v56 }
0x2241   :  { %1018 = vrot.lane.b32.xlu2 %v1016_v57, %s1531_s22 }
0x229b   :  { %v1019_v58 = vpop.permute.xlu2 %1018 }
0x229c   :  { %1185 = vmatmul.msk.bf16.vlgmr.msra.gmra.mxu1 %vm226_vm2, %v1019_v58 }
0x2319   :  { %v1032_v60 = vpop.f32.mrf.mxu1 }
0x231a   :  { %v1036_v61 = vadd.f32 %v1032_v60, %v1015_v59 }
0x231c   :  { %1274 = vtanh.f32 %v1036_v61 }
0x2321   :  { %v1034_v62 = vpop.f32.mrf.mxu1 }
0x2322   :  { %v1275_v0 = vpop.eup %1274 }
0x2323   :  { %v1038_v1 = vmul.f32 %v1275_v0, %v1656_v20 }
0x2325   :  { %v1039_v2 = vadd.f32 %v1038_v1, %v1658_v22 }
0x2327   :  { %1042 = vrot.lane.b32.xlu0 %v1039_v2, %s1534_s12  ;;  %v1040_v20 = vmul.f32 %v1039_v2, %v1003_v53 }
0x232f   :  { %729 = vrot.lane.b32.xlu0 %v1774_v10, %s1531_s22 }
0x2399   :  { %v1043_v3 = vpop.permute.xlu0 %1042 }
0x239a   :  { %v1045_v5 = vmul.f32 %v1043_v3, %v1039_v2 }
0x239c   :  { %1047 = vrot.lane.b32.xlu1 %v1045_v5, %s1531_s22 }
0x23a1   :  { %v730_v6 = vpop.permute.xlu0 %729 }
0x23a2   :  { %732 = vst.msk [vmem:[#allocation17] sm:$0x3] %vm153_vm0, %v730_v6 }
0x23a4   :  { %619 = vrot.lane.b32.xlu1 %v1746_v31, %s1542_s8 }
0x23ac   :  { %776 = vrot.lane.b32.xlu1 %v1785_v34, %s1531_s22 }
0x23b4   :  { %917 = vrot.lane.b32.xlu1 %v1818_v18, %s1531_s22 }
0x240e   :  { %v1048_v22 = vpop.permute.xlu1 %1047 }
0x240f   :  { %v1050_v7 = vadd.f32 %v1048_v22, %v1040_v20 }
0x2411   :  { %1276 = vtanh.f32 %v1050_v7 }
0x2416   :  { %v620_v10 = vpop.permute.xlu1 %619 }
0x2417   :  { %v1277_v8 = vpop.eup %1276  ;;  %622 = vst.msk [vmem:[#allocation3] sm:$0x3] %vm153_vm0, %v620_v10 }
0x2418   :  { %1053 = vrot.lane.b32.xlu2 %v1277_v8, %s1534_s12  ;;  %s1543_s12 = smov [#allocation18]  }
0x2419   :  { %s1096_s16 = sshll.u32 %s1543_s12, 4  ;;  %s1097_s16 = int_to_ptr.vmem [resolvable:$true] %s1096_s16 }
0x241e   :  { %v777_v9 = vpop.permute.xlu1 %776  ;;  %v1075_v11 = vld [vmem:[#allocation3] sm:$0x3] }
0x241f   :  { %779 = vst.msk [vmem:[#allocation17 + $0x2] sm:$0x3] %vm153_vm0, %v777_v9 }
0x2420   :  { %1064 = vrot.lane.b32.xlu2 %v1050_v7, %s1542_s8  ;;  %1077 = vst.msk [vmem:[#allocation20] sm:$0x3] %vm153_vm0, %v1075_v11 }
0x2426   :  { %v918_v31 = vpop.permute.xlu1 %917 }
0x2427   :  { %920 = vst.msk [vmem:[#allocation17 + $0x8] sm:$0x3] %vm153_vm0, %v918_v31 }
0x2428   :  { %823 = vrot.lane.b32.xlu2 %v1796_v45, %s1531_s22 }
0x2430   :  { %964 = vrot.lane.b32.xlu2 %v1829_v38, %s1531_s22 }
0x2472   :  { %v1054_v34 = vpop.permute.xlu2 %1053 }
0x2473   :  { %v1056_v12 = vmul.f32 %v1054_v34, %v1039_v2 }
0x2475   :  { %1058 = vrot.lane.b32.xlu0 %v1056_v12, %s1531_s22 }
0x247a   :  { %v1065_v13 = vpop.permute.xlu2 %1064 }
0x247b   :  { %1067 = vst.msk [vmem:[#allocation3 + $0x2] sm:$0x3] %vm153_vm0, %v1065_v13 }
0x247d   :  { %870 = vrot.lane.b32.xlu0 %v1807_v63, %s1531_s22 }
0x2482   :  { %v824_v14 = vpop.permute.xlu2 %823  ;;  %v1076_v15 = vld [vmem:[#allocation3 + $0x2] sm:$0x3] }
0x2483   :  { %826 = vst.msk [vmem:[#allocation17 + $0x4] sm:$0x3] %vm153_vm0, %v824_v14 }
0x2484   :  { %1078 = vst.msk [vmem:[#allocation20 + $0x2] sm:$0x3] %vm153_vm0, %v1076_v15 }
0x2485   :  { %1011 = vrot.lane.b32.xlu0 %v1009_v56, %s1531_s22 }
0x248a   :  { %v965_v45 = vpop.permute.xlu2 %964 }
0x248b   :  { %967 = vst.msk [vmem:[#allocation17 + $0xa] sm:$0x3] %vm153_vm0, %v965_v45 }
0x24e7   :  { %v1059_v16 = vpop.permute.xlu0 %1058 }
0x24e8   :  { %1061 = vst.msk [vmem:[#allocation17 + $0xe] sm:$0x3] %vm153_vm0, %v1059_v16 }
0x24e9   :  { %1062 = vst.msk [vmem:[#allocation2 + $0x2] sm:$0x3] %vm153_vm0, %v1059_v16 }
0x24ef   :  { %v871_v63 = vpop.permute.xlu0 %870 }
0x24f0   :  { %873 = vst.msk [vmem:[#allocation17 + $0x6] sm:$0x3] %vm153_vm0, %v871_v63  ;;  %v1072_v17 = vld [vmem:[#allocation2 + $0x2] sm:$0x3] }
0x24f1   :  { %1074 = vst.msk [vmem:[#allocation18 + $0x2] sm:$0x3] %vm153_vm0, %v1072_v17 }
0x24f2   :  { %1104 = dma.vmem_to_hbm [thread:$0]  %s1097_s16, 64, %s1099_s6, [#allocation19], %s1531_s22, %s1531_s22, %s1532_s23  }
0x24f3   :  { %1117 = dma.vmem_to_hbm [thread:$0]  %s1110_s19, 64, %s1112_s0, [#allocation19], %s1531_s22, %s1531_s22, %s1532_s23  }
0x24f7   :  { %v1012_v18 = vpop.permute.xlu0 %1011 }
0x24f8   :  { %1014 = vst.msk [vmem:[#allocation17 + $0xc] sm:$0x3] %vm153_vm0, %v1012_v18 }
0x24f9   :  { %1091 = dma.vmem_to_hbm [thread:$0]  %s1084_s25, 256, %s1086_s27, [#allocation7], %s1546_s11, %s1546_s11, %s1547_s28  }
0x24fa   :  { %1526 = dma.done.wait [#allocation7], 256  }
0x24fb   :  { %1527 = vsyncadd [#allocation7], 4294967040 }
0x24fc   :  { %1528 = dma.done.wait [#allocation19], 128  }
0x24fd   :  { %1529 = vsyncadd [#allocation19], 4294967168 }
0x24fe   :  { %1130 = vsyncpa [#allocation6], 1 }
0x24ff   :  { %1131 = vsyncpa [#allocation9], 1 }
0x2500   :  { %1132 = vsyncpa [#allocation12], 1 }
0x2501   :  { %1133 = vsyncpa [#allocation15], 1 }
0x2502   :  { %1134 = vsyncpa [#allocation7], 1 }
0x2503   :  { %1135 = vsyncpa [#allocation19], 1 }

</bundles_post_ra>
